<compile_context>
chip_gen: v7x
topology: tpu7x:2x2x1
jax: 0.10.0
libtpu: 0.0.40
codegen_flags: <defaults>
</compile_context>

<pallas_src>
import numpy as np
import jax
import jax.numpy as jnp
from jax.experimental import pallas as pl
from jax.experimental.pallas import tpu as pltpu

N_OUT = 2500          # 50 * 50
SH    = 25            # per-parity output side (50 / 2)
SHBLK = 640           # 25*25 = 625 padded up to a multiple of 128 (lane-dense)


# ----------------------------- Pallas kernel --------------------------------
def _tcn_kernel(scal_ref, x_ref, m1_ref, c1_ref, out_ref):
    # scal_ref: (2, 16*C+1) f32 SMEM  per-branch ConvT2 tap weights + folded bias
    # x_ref   : (bm, D)      bf16    row block of [x, z] input pairs
    # m1_ref  : (D, 4*C*640) bf16    Linear+ConvT1+BN1 fold, 4 shifted h copies
    # c1_ref  : (1, 4*C*640) f32     folded pre-ReLU bias (0 in padded columns)
    # out_ref : (bm, 4*640)  bf16    4 per-parity 25x25 sigmoid slabs (lane-padded)
    br = pl.program_id(0)
    nblk = m1_ref.shape[1] // SHBLK          # 4 shifts * C channels
    h = jnp.dot(x_ref[...], m1_ref[...], preferred_element_type=jnp.float32)
    h = jnp.maximum(h + c1_ref[...], 0.0)    # ReLU; padded columns stay exactly 0
    blocks = [h[:, k * SHBLK:(k + 1) * SHBLK] for k in range(nblk)]
    c2 = scal_ref[br, 4 * nblk]              # folded ConvT2 bias + BN2 shift
    for p in range(4):                       # output parity p = pi*2 + pj
        acc = blocks[0] * scal_ref[br, p * nblk]
        for k in range(1, nblk):
            acc = acc + blocks[k] * scal_ref[br, p * nblk + k]
        pre = acc + c2
        # Exact, stable sigmoid: exp(-pre)->inf gives exactly 0, ->0 gives 1.
        out_ref[:, p * SHBLK:(p + 1) * SHBLK] = (
            1.0 / (1.0 + jnp.exp(-pre))).astype(out_ref.dtype)


def _pick_bm(M):
    for cand in (256, 128, 64, 32, 16, 8):
        if cand <= M and M % cand == 0:
            return cand
    return M


def transposed_convnet_pallas(x, z, params, bm=None):
    B, N, t_dim = x.shape
    z_dim = z.shape[-1]
    M = B * N
    D = t_dim + z_dim
    if bm is None:
        bm = _pick_bm(M)
    assert M % bm == 0

    M1 = params["M1_stack"]      # (2, D, 4*C*640)  bf16
    c1 = params["c1_stack"]      # (2, 1, 4*C*640)  f32
    scal = params["scal"]        # (2, 16*C+1)      f32
    K1 = M1.shape[-1]

    # glue: replicate z over points and concatenate (as in the PyTorch forward)
    z_rep = jnp.broadcast_to(z[:, None, :], (B, N, z_dim))
    input_pairs = jnp.concatenate(
        [x.reshape(M, t_dim), z_rep.reshape(M, z_dim)], axis=1).astype(jnp.bfloat16)

    grid = (2, M // bm)          # (branch: mu/sigma, row-block)
    out = pl.pallas_call(
        _tcn_kernel,
        out_shape=jax.ShapeDtypeStruct((2, M, 4 * SHBLK), jnp.bfloat16),
        grid_spec=pltpu.PrefetchScalarGridSpec(
            num_scalar_prefetch=1,                 # tap weights + c2 -> SMEM
            grid=grid,
            in_specs=[
                pl.BlockSpec((bm, D), lambda br, m, s: (m, 0)),
                pl.BlockSpec((None, D, K1), lambda br, m, s: (br, 0, 0)),
                pl.BlockSpec((None, 1, K1), lambda br, m, s: (br, 0, 0)),
            ],
            out_specs=pl.BlockSpec((None, bm, 4 * SHBLK),
                                   lambda br, m, s: (br, m, 0)),
        ),
        compiler_params=pltpu.CompilerParams(
            dimension_semantics=("parallel", "parallel"),
        ),
    )(scal, input_pairs, M1, c1)

    # Layout glue: de-interleave the 4 per-parity 25x25 slabs into the 50x50 grid.
    o = out.reshape(2, M, 4, SHBLK)[..., :SH * SH]      # (2, M, pi*2+pj, 625)
    o = o.reshape(2, M, 2, 2, SH, SH)                   # (2, M, pi, pj, a, b)
    o = o.transpose(0, 1, 4, 2, 5, 3)                   # (2, M, a, pi, b, pj)
    o = o.reshape(2, M, N_OUT).astype(jnp.float32)
    mean_grid = o[0].reshape(B, N, N_OUT)
    sigma_grid = o[1].reshape(B, N, N_OUT)
    return mean_grid, sigma_grid


# -------------------- parameter folding (glue, numpy) -----------------------
def build_branch_params(W1, b1, w_ct1, b_ct1, bn1, w_ct2, b_ct2, bn2, C, eps=1e-5):
    """Fold Linear -> ConvT1(k2,s2) + BN1 (eval) into one matrix, emitted in a
    4-way shifted / zero-padded column layout so ConvT2(k4,s2) + BN2 reduces to
    4*4*C scalar-weighted adds inside the kernel (no dense (Ck, 2500) matrix)."""
    W1 = np.asarray(W1, np.float32)          # (D, 144)  stored (in, out)
    b1 = np.asarray(b1, np.float32)          # (144,)
    w_ct1 = np.asarray(w_ct1, np.float32)    # (1, C, 2, 2) PyTorch ConvT layout
    b_ct1 = np.asarray(b_ct1, np.float32)    # (C,)
    w_ct2 = np.asarray(w_ct2, np.float32)    # (C, 1, 4, 4)
    b_ct2 = np.asarray(b_ct2, np.float32)    # (1,)
    g1, be1, rm1, rv1 = [np.asarray(a, np.float32) for a in bn1]
    g2, be2, rm2, rv2 = [np.asarray(a, np.float32) for a in bn2]

    s1 = g1 / np.sqrt(rv1 + eps)
    t1 = be1 - rm1 * s1

    # ConvT1: 12x12 (1 ch) -> 24x24 (C ch), k=2, s=2 (non-overlapping):
    #   pre[c, 2i+di, 2j+dj] = zu[i, j] * w_ct1[0, c, di, dj] + b_ct1[c]
    A1 = np.zeros((144, C * 576), np.float32)
    for i in range(12):
        for j in range(12):
            for di in range(2):
                for dj in range(2):
                    for c in range(C):
                        col = c * 576 + (2 * i + di) * 24 + (2 * j + dj)
                        A1[i * 12 + j, col] = w_ct1[0, c, di, dj]
    scol = np.repeat(s1, 576)
    tcol = np.repeat(t1, 576)
    A1p = A1 * scol[None, :]
    bias1 = np.repeat(b_ct1, 576) * scol + tcol

    # Fold the Linear layer into ConvT1+BN1 (exact: no nonlinearity in between).
    M1f = W1 @ A1p                    # (D, C*576)
    c1f = b1 @ A1p + bias1            # (C*576,)

    # Re-emit in the shifted layout: column (s*C + c)*640 + a*25 + b holds the
    # pre-activation of h[c, a-di, b-dj] with s = di*2+dj (zero when a-di or b-dj
    # is out of [0,24)), so relu() of the matmul output directly yields the four
    # shifted copies of h that the 16-tap ConvT2 needs.
    D = W1.shape[0]
    Kout = 4 * C * SHBLK
    M1p = np.zeros((D, Kout), np.float32)
    c1p = np.zeros((Kout,), np.float32)
    for di in range(2):
        for dj in range(2):
            s = di * 2 + dj
            for c in range(C):
                base = (s * C + c) * SHBLK
                for a in range(SH):
                    ia = a - di
                    if not (0 <= ia < 24):
                        continue
                    for b in range(SH):
                        jb = b - dj
                        if not (0 <= jb < 24):
                            continue
                        src = c * 576 + ia * 24 + jb
                        dst = base + a * SH + b
                        M1p[:, dst] = M1f[:, src]
                        c1p[dst] = c1f[src]

    # ConvT2 (k=4, s=2) + BN2 tap table: for output parity (pi, pj) and shift
    # (di, dj):  out[2a+pi, 2b+pj] += h[c, a-di, b-dj] * w_ct2[c,0,pi+2di,pj+2dj]*s2
    s2 = g2[0] / np.sqrt(rv2[0] + eps)
    t2 = be2[0] - rm2[0] * s2
    w2 = np.zeros((4, 4 * C), np.float32)
    for pi in range(2):
        for pj in range(2):
            p = pi * 2 + pj
            for di in range(2):
                for dj in range(2):
                    s = di * 2 + dj
                    for c in range(C):
                        w2[p, s * C + c] = w_ct2[c, 0, pi + 2 * di, pj + 2 * dj] * s2
    c2 = np.float32(b_ct2[0] * s2 + t2)
    return M1p, c1p, w2.reshape(-1), c2


# ------------------------- pure-JAX reference --------------------------------
def conv_transpose2d_ref(x, w, b, stride):
    # x: (M, Cin, H, W), w: (Cin, Cout, k, k)  (PyTorch ConvTranspose2d layout)
    M, Cin, H, Wd = x.shape
    _, Cout, k, _ = w.shape
    Ho = (H - 1) * stride + k
    Wo = (Wd - 1) * stride + k
    out = jnp.zeros((M, Cout, Ho, Wo), jnp.float32)
    for ki in range(k):
        for kj in range(k):
            contrib = jnp.einsum('mihw,io->mohw', x, w[:, :, ki, kj])
            out = out.at[:, :, ki:ki + (H - 1) * stride + 1:stride,
                               kj:kj + (Wd - 1) * stride + 1:stride].add(contrib)
    return out + b[None, :, None, None]


def bn_eval(x, gamma, beta, mean, var, eps=1e-5):
    g = gamma[None, :, None, None]
    b = beta[None, :, None, None]
    m = mean[None, :, None, None]
    v = var[None, :, None, None]
    return (x - m) / jnp.sqrt(v + eps) * g + b


def reference_forward(x, z, raw):
    B, N, t_dim = x.shape
    z_dim = z.shape[-1]
    M = B * N
    z_rep = jnp.broadcast_to(z[:, None, :], (B, N, z_dim))
    ip = jnp.concatenate([x.reshape(M, t_dim), z_rep.reshape(M, z_dim)], axis=1)
    zu = (ip @ raw["W1"] + raw["b1"]).reshape(M, 1, 12, 12)

    def branch(p):
        h = conv_transpose2d_ref(zu, p["ct1_w"], p["ct1_b"], 2)
        h = bn_eval(h, *p["bn1"])
        h = jnp.maximum(h, 0.0)
        o = conv_transpose2d_ref(h, p["ct2_w"], p["ct2_b"], 2)
        o = bn_eval(o, *p["bn2"])
        return jax.nn.sigmoid(o)

    mean = branch(raw["mu"]).squeeze(1).reshape(B, N, N_OUT)
    sigma = branch(raw["sigma"]).squeeze(1).reshape(B, N, N_OUT)
    return mean, sigma


# --------------------------------- main ---------------------------------------
if __name__ == "__main__":
    B, N = 2, 8
    t_dim, z_dim = 1, 32
    num_channels = 2
    grid_size = 50
    y_dim = grid_size * grid_size
    D = t_dim + z_dim

    all_keys = jax.random.split(jax.random.PRNGKey(0), 34)
    keys = iter(all_keys[:32])

    def nrm(shape, scale):
        return scale * jax.random.normal(next(keys), shape, jnp.float32)

    raw = {
        "W1": nrm((D, 144), 0.2),     # Linear(z_dim + t_dim, 144), stored (in, out)
        "b1": nrm((144,), 0.1),
    }
    for name in ("mu", "sigma"):
        raw[name] = {
            "ct1_w": nrm((1, num_channels, 2, 2), 0.3),
            "ct1_b": nrm((num_channels,), 0.1),
            "bn1": (1.0 + nrm((num_channels,), 0.1),
                    nrm((num_channels,), 0.1),
                    nrm((num_channels,), 0.1),
                    1.0 + jnp.abs(nrm((num_channels,), 0.1))),
            "ct2_w": nrm((num_channels, 1, 4, 4), 0.3),
            "ct2_b": nrm((1,), 0.1),
            "bn2": (1.0 + nrm((1,), 0.1),
                    nrm((1,), 0.1),
                    nrm((1,), 0.1),
                    1.0 + jnp.abs(nrm((1,), 0.1))),
        }

    m1s, c1s = [], []
    scal = np.zeros((2, 16 * num_channels + 1), np.float32)
    for bi, name in enumerate(("mu", "sigma")):
        bp = raw[name]
        M1p, c1p, w2flat, c2 = build_branch_params(
            raw["W1"], raw["b1"],
            bp["ct1_w"], bp["ct1_b"], bp["bn1"],
            bp["ct2_w"], bp["ct2_b"], bp["bn2"], num_channels)
        m1s.append(M1p)
        c1s.append(c1p)
        scal[bi, :16 * num_channels] = w2flat
        scal[bi, 16 * num_channels] = c2

    K1 = m1s[0].shape[-1]
    params = {
        "M1_stack": jnp.asarray(np.stack(m1s), jnp.bfloat16),               # (2, D, K1)
        "c1_stack": jnp.asarray(np.stack(c1s).reshape(2, 1, K1), jnp.float32),
        "scal": jnp.asarray(scal),                                           # (2, 33) f32
    }

    kx, kz = all_keys[32], all_keys[33]
    x = jax.random.normal(kx, (B, N, t_dim), jnp.float32)
    z = jax.random.normal(kz, (B, z_dim), jnp.float32)

    mean_grid, sigma_grid = transposed_convnet_pallas(x, z, params)
    jax.block_until_ready((mean_grid, sigma_grid))

    mean_ref, sigma_ref = reference_forward(x, z, raw)
    err = max(float(jnp.max(jnp.abs(mean_grid - mean_ref))),
              float(jnp.max(jnp.abs(sigma_grid - sigma_ref))))
    assert mean_grid.shape == (B, N, y_dim) and sigma_grid.shape == (B, N, y_dim)
    assert err < 2e-2, f"max abs err {err}"
    print("KERNEL_OK")
</pallas_src>

<mosaic_0001>
module attributes {stable_mosaic.version = 11 : i64} {
  func.func @_tcn_kernel(%arg0: i32, %arg1: i32, %arg2: memref<2x33xf32, #tpu.memory_space<smem>>, %arg3: memref<16x33xbf16, #tpu.memory_space<vmem>>, %arg4: memref<1x33x5120xbf16, #tpu.memory_space<vmem>>, %arg5: memref<1x1x5120xf32, #tpu.memory_space<vmem>>, %arg6: memref<1x16x2560xbf16, #tpu.memory_space<vmem>>) attributes {dimension_semantics = [#tpu.dimension_semantics<parallel>, #tpu.dimension_semantics<parallel>], iteration_bounds = array<i64: 2, 1>, scalar_prefetch = 1 : i64, scratch_operands = 0 : i64, tpu.core_type = #tpu.core_type<tc>, window_params = [{transform_indices = @transform_0, window_bounds = array<i64: 16, 33>}, {transform_indices = @transform_1, window_bounds = array<i64: 1, 33, 5120>}, {transform_indices = @transform_2, window_bounds = array<i64: 1, 1, 5120>}, {transform_indices = @transform_3, window_bounds = array<i64: 1, 16, 2560>}]} {
    %c0 = arith.constant 0 : index
    %c0_0 = arith.constant 0 : index
    %0 = vector.load %arg3[%c0, %c0_0] : memref<16x33xbf16, #tpu.memory_space<vmem>>, vector<16x33xbf16>
    %c0_1 = arith.constant 0 : index
    %c0_2 = arith.constant 0 : index
    %c0_3 = arith.constant 0 : index
    %1 = vector.load %arg4[%c0_1, %c0_2, %c0_3] : memref<1x33x5120xbf16, #tpu.memory_space<vmem>>, vector<1x33x5120xbf16>
    %2 = vector.shape_cast %1 : vector<1x33x5120xbf16> to vector<33x5120xbf16>
    %cst = arith.constant dense<0.000000e+00> : vector<16x5120xf32>
    %3 = tpu.matmul %0, %2, %cst {dimension_numbers = #tpu.dot_dimension_numbers<[1], [0], [0], [1], [0, 0, 1, 1], [], []>} : vector<16x33xbf16>, vector<33x5120xbf16>, vector<16x5120xf32> -> vector<16x5120xf32>
    %c0_4 = arith.constant 0 : index
    %c0_5 = arith.constant 0 : index
    %c0_6 = arith.constant 0 : index
    %4 = vector.load %arg5[%c0_4, %c0_5, %c0_6] : memref<1x1x5120xf32, #tpu.memory_space<vmem>>, vector<1x1x5120xf32>
    %5 = vector.shape_cast %4 : vector<1x1x5120xf32> to vector<1x5120xf32>
    %6 = vector.broadcast %5 : vector<1x5120xf32> to vector<16x5120xf32>
    %7 = arith.addf %3, %6 : vector<16x5120xf32>
    %cst_7 = arith.constant 0.000000e+00 : f32
    %8 = vector.broadcast %cst_7 : f32 to vector<16x5120xf32>
    %9 = arith.maximumf %7, %8 : vector<16x5120xf32>
    %10 = vector.extract_strided_slice %9 {offsets = [0, 0], sizes = [16, 640], strides = [1, 1]} : vector<16x5120xf32> to vector<16x640xf32>
    %11 = vector.extract_strided_slice %9 {offsets = [0, 640], sizes = [16, 640], strides = [1, 1]} : vector<16x5120xf32> to vector<16x640xf32>
    %12 = vector.extract_strided_slice %9 {offsets = [0, 1280], sizes = [16, 640], strides = [1, 1]} : vector<16x5120xf32> to vector<16x640xf32>
    %13 = vector.extract_strided_slice %9 {offsets = [0, 1920], sizes = [16, 640], strides = [1, 1]} : vector<16x5120xf32> to vector<16x640xf32>
    %14 = vector.extract_strided_slice %9 {offsets = [0, 2560], sizes = [16, 640], strides = [1, 1]} : vector<16x5120xf32> to vector<16x640xf32>
    %15 = vector.extract_strided_slice %9 {offsets = [0, 3200], sizes = [16, 640], strides = [1, 1]} : vector<16x5120xf32> to vector<16x640xf32>
    %16 = vector.extract_strided_slice %9 {offsets = [0, 3840], sizes = [16, 640], strides = [1, 1]} : vector<16x5120xf32> to vector<16x640xf32>
    %17 = vector.extract_strided_slice %9 {offsets = [0, 4480], sizes = [16, 640], strides = [1, 1]} : vector<16x5120xf32> to vector<16x640xf32>
    %18 = arith.index_cast %arg0 : i32 to index
    %c32 = arith.constant 32 : index
    %19 = memref.load %arg2[%18, %c32] : memref<2x33xf32, #tpu.memory_space<smem>>
    %20 = arith.index_cast %arg0 : i32 to index
    %c0_8 = arith.constant 0 : index
    %21 = memref.load %arg2[%20, %c0_8] : memref<2x33xf32, #tpu.memory_space<smem>>
    %22 = vector.broadcast %21 : f32 to vector<16x640xf32>
    %23 = arith.mulf %10, %22 : vector<16x640xf32>
    %24 = arith.index_cast %arg0 : i32 to index
    %c1 = arith.constant 1 : index
    %25 = memref.load %arg2[%24, %c1] : memref<2x33xf32, #tpu.memory_space<smem>>
    %26 = vector.broadcast %25 : f32 to vector<16x640xf32>
    %27 = arith.mulf %11, %26 : vector<16x640xf32>
    %28 = arith.addf %23, %27 : vector<16x640xf32>
    %29 = arith.index_cast %arg0 : i32 to index
    %c2 = arith.constant 2 : index
    %30 = memref.load %arg2[%29, %c2] : memref<2x33xf32, #tpu.memory_space<smem>>
    %31 = vector.broadcast %30 : f32 to vector<16x640xf32>
    %32 = arith.mulf %12, %31 : vector<16x640xf32>
    %33 = arith.addf %28, %32 : vector<16x640xf32>
    %34 = arith.index_cast %arg0 : i32 to index
    %c3 = arith.constant 3 : index
    %35 = memref.load %arg2[%34, %c3] : memref<2x33xf32, #tpu.memory_space<smem>>
    %36 = vector.broadcast %35 : f32 to vector<16x640xf32>
    %37 = arith.mulf %13, %36 : vector<16x640xf32>
    %38 = arith.addf %33, %37 : vector<16x640xf32>
    %39 = arith.index_cast %arg0 : i32 to index
    %c4 = arith.constant 4 : index
    %40 = memref.load %arg2[%39, %c4] : memref<2x33xf32, #tpu.memory_space<smem>>
    %41 = vector.broadcast %40 : f32 to vector<16x640xf32>
    %42 = arith.mulf %14, %41 : vector<16x640xf32>
    %43 = arith.addf %38, %42 : vector<16x640xf32>
    %44 = arith.index_cast %arg0 : i32 to index
    %c5 = arith.constant 5 : index
    %45 = memref.load %arg2[%44, %c5] : memref<2x33xf32, #tpu.memory_space<smem>>
    %46 = vector.broadcast %45 : f32 to vector<16x640xf32>
    %47 = arith.mulf %15, %46 : vector<16x640xf32>
    %48 = arith.addf %43, %47 : vector<16x640xf32>
    %49 = arith.index_cast %arg0 : i32 to index
    %c6 = arith.constant 6 : index
    %50 = memref.load %arg2[%49, %c6] : memref<2x33xf32, #tpu.memory_space<smem>>
    %51 = vector.broadcast %50 : f32 to vector<16x640xf32>
    %52 = arith.mulf %16, %51 : vector<16x640xf32>
    %53 = arith.addf %48, %52 : vector<16x640xf32>
    %54 = arith.index_cast %arg0 : i32 to index
    %c7 = arith.constant 7 : index
    %55 = memref.load %arg2[%54, %c7] : memref<2x33xf32, #tpu.memory_space<smem>>
    %56 = vector.broadcast %55 : f32 to vector<16x640xf32>
    %57 = arith.mulf %17, %56 : vector<16x640xf32>
    %58 = arith.addf %53, %57 : vector<16x640xf32>
    %59 = vector.broadcast %19 : f32 to vector<16x640xf32>
    %60 = arith.addf %58, %59 : vector<16x640xf32>
    %cst_9 = arith.constant 0.000000e+00 : f32
    %61 = vector.broadcast %cst_9 : f32 to vector<16x640xf32>
    %62 = arith.subf %61, %60 : vector<16x640xf32>
    %63 = math.exp %62 : vector<16x640xf32>
    %cst_10 = arith.constant 1.000000e+00 : f32
    %64 = vector.broadcast %cst_10 : f32 to vector<16x640xf32>
    %65 = arith.addf %64, %63 : vector<16x640xf32>
    %cst_11 = arith.constant 1.000000e+00 : f32
    %66 = vector.broadcast %cst_11 : f32 to vector<16x640xf32>
    %67 = arith.divf %66, %65 : vector<16x640xf32>
    %68 = arith.truncf %67 : vector<16x640xf32> to vector<16x640xbf16>
    %c0_12 = arith.constant 0 : index
    %c0_13 = arith.constant 0 : index
    %c0_14 = arith.constant 0 : index
    %69 = vector.load %arg6[%c0_12, %c0_13, %c0_14] : memref<1x16x2560xbf16, #tpu.memory_space<vmem>>, vector<1x16x640xbf16>
    %70 = vector.shape_cast %69 : vector<1x16x640xbf16> to vector<16x640xbf16>
    %71 = vector.shape_cast %68 : vector<16x640xbf16> to vector<1x16x640xbf16>
    tpu.vector_store %arg6[%c0_12, %c0_13, %c0_14], %71 {strides = array<i32>} : memref<1x16x2560xbf16, #tpu.memory_space<vmem>>, vector<1x16x640xbf16>,
    %72 = arith.index_cast %arg0 : i32 to index
    %c8 = arith.constant 8 : index
    %73 = memref.load %arg2[%72, %c8] : memref<2x33xf32, #tpu.memory_space<smem>>
    %74 = vector.broadcast %73 : f32 to vector<16x640xf32>
    %75 = arith.mulf %10, %74 : vector<16x640xf32>
    %76 = arith.index_cast %arg0 : i32 to index
    %c9 = arith.constant 9 : index
    %77 = memref.load %arg2[%76, %c9] : memref<2x33xf32, #tpu.memory_space<smem>>
    %78 = vector.broadcast %77 : f32 to vector<16x640xf32>
    %79 = arith.mulf %11, %78 : vector<16x640xf32>
    %80 = arith.addf %75, %79 : vector<16x640xf32>
    %81 = arith.index_cast %arg0 : i32 to index
    %c10 = arith.constant 10 : index
    %82 = memref.load %arg2[%81, %c10] : memref<2x33xf32, #tpu.memory_space<smem>>
    %83 = vector.broadcast %82 : f32 to vector<16x640xf32>
    %84 = arith.mulf %12, %83 : vector<16x640xf32>
    %85 = arith.addf %80, %84 : vector<16x640xf32>
    %86 = arith.index_cast %arg0 : i32 to index
    %c11 = arith.constant 11 : index
    %87 = memref.load %arg2[%86, %c11] : memref<2x33xf32, #tpu.memory_space<smem>>
    %88 = vector.broadcast %87 : f32 to vector<16x640xf32>
    %89 = arith.mulf %13, %88 : vector<16x640xf32>
    %90 = arith.addf %85, %89 : vector<16x640xf32>
    %91 = arith.index_cast %arg0 : i32 to index
    %c12 = arith.constant 12 : index
    %92 = memref.load %arg2[%91, %c12] : memref<2x33xf32, #tpu.memory_space<smem>>
    %93 = vector.broadcast %92 : f32 to vector<16x640xf32>
    %94 = arith.mulf %14, %93 : vector<16x640xf32>
    %95 = arith.addf %90, %94 : vector<16x640xf32>
    %96 = arith.index_cast %arg0 : i32 to index
    %c13 = arith.constant 13 : index
    %97 = memref.load %arg2[%96, %c13] : memref<2x33xf32, #tpu.memory_space<smem>>
    %98 = vector.broadcast %97 : f32 to vector<16x640xf32>
    %99 = arith.mulf %15, %98 : vector<16x640xf32>
    %100 = arith.addf %95, %99 : vector<16x640xf32>
    %101 = arith.index_cast %arg0 : i32 to index
    %c14 = arith.constant 14 : index
    %102 = memref.load %arg2[%101, %c14] : memref<2x33xf32, #tpu.memory_space<smem>>
    %103 = vector.broadcast %102 : f32 to vector<16x640xf32>
    %104 = arith.mulf %16, %103 : vector<16x640xf32>
    %105 = arith.addf %100, %104 : vector<16x640xf32>
    %106 = arith.index_cast %arg0 : i32 to index
    %c15 = arith.constant 15 : index
    %107 = memref.load %arg2[%106, %c15] : memref<2x33xf32, #tpu.memory_space<smem>>
    %108 = vector.broadcast %107 : f32 to vector<16x640xf32>
    %109 = arith.mulf %17, %108 : vector<16x640xf32>
    %110 = arith.addf %105, %109 : vector<16x640xf32>
    %111 = vector.broadcast %19 : f32 to vector<16x640xf32>
    %112 = arith.addf %110, %111 : vector<16x640xf32>
    %cst_15 = arith.constant 0.000000e+00 : f32
    %113 = vector.broadcast %cst_15 : f32 to vector<16x640xf32>
    %114 = arith.subf %113, %112 : vector<16x640xf32>
    %115 = math.exp %114 : vector<16x640xf32>
    %cst_16 = arith.constant 1.000000e+00 : f32
    %116 = vector.broadcast %cst_16 : f32 to vector<16x640xf32>
    %117 = arith.addf %116, %115 : vector<16x640xf32>
    %cst_17 = arith.constant 1.000000e+00 : f32
    %118 = vector.broadcast %cst_17 : f32 to vector<16x640xf32>
    %119 = arith.divf %118, %117 : vector<16x640xf32>
    %120 = arith.truncf %119 : vector<16x640xf32> to vector<16x640xbf16>
    %c0_18 = arith.constant 0 : index
    %c0_19 = arith.constant 0 : index
    %c640 = arith.constant 640 : index
    %121 = vector.load %arg6[%c0_18, %c0_19, %c640] : memref<1x16x2560xbf16, #tpu.memory_space<vmem>>, vector<1x16x640xbf16>
    %122 = vector.shape_cast %121 : vector<1x16x640xbf16> to vector<16x640xbf16>
    %123 = vector.shape_cast %120 : vector<16x640xbf16> to vector<1x16x640xbf16>
    tpu.vector_store %arg6[%c0_18, %c0_19, %c640], %123 {strides = array<i32>} : memref<1x16x2560xbf16, #tpu.memory_space<vmem>>, vector<1x16x640xbf16>,
    %124 = arith.index_cast %arg0 : i32 to index
    %c16 = arith.constant 16 : index
    %125 = memref.load %arg2[%124, %c16] : memref<2x33xf32, #tpu.memory_space<smem>>
    %126 = vector.broadcast %125 : f32 to vector<16x640xf32>
    %127 = arith.mulf %10, %126 : vector<16x640xf32>
    %128 = arith.index_cast %arg0 : i32 to index
    %c17 = arith.constant 17 : index
    %129 = memref.load %arg2[%128, %c17] : memref<2x33xf32, #tpu.memory_space<smem>>
    %130 = vector.broadcast %129 : f32 to vector<16x640xf32>
    %131 = arith.mulf %11, %130 : vector<16x640xf32>
    %132 = arith.addf %127, %131 : vector<16x640xf32>
    %133 = arith.index_cast %arg0 : i32 to index
    %c18 = arith.constant 18 : index
    %134 = memref.load %arg2[%133, %c18] : memref<2x33xf32, #tpu.memory_space<smem>>
    %135 = vector.broadcast %134 : f32 to vector<16x640xf32>
    %136 = arith.mulf %12, %135 : vector<16x640xf32>
    %137 = arith.addf %132, %136 : vector<16x640xf32>
    %138 = arith.index_cast %arg0 : i32 to index
    %c19 = arith.constant 19 : index
    %139 = memref.load %arg2[%138, %c19] : memref<2x33xf32, #tpu.memory_space<smem>>
    %140 = vector.broadcast %139 : f32 to vector<16x640xf32>
    %141 = arith.mulf %13, %140 : vector<16x640xf32>
    %142 = arith.addf %137, %141 : vector<16x640xf32>
    %143 = arith.index_cast %arg0 : i32 to index
    %c20 = arith.constant 20 : index
    %144 = memref.load %arg2[%143, %c20] : memref<2x33xf32, #tpu.memory_space<smem>>
    %145 = vector.broadcast %144 : f32 to vector<16x640xf32>
    %146 = arith.mulf %14, %145 : vector<16x640xf32>
    %147 = arith.addf %142, %146 : vector<16x640xf32>
    %148 = arith.index_cast %arg0 : i32 to index
    %c21 = arith.constant 21 : index
    %149 = memref.load %arg2[%148, %c21] : memref<2x33xf32, #tpu.memory_space<smem>>
    %150 = vector.broadcast %149 : f32 to vector<16x640xf32>
    %151 = arith.mulf %15, %150 : vector<16x640xf32>
    %152 = arith.addf %147, %151 : vector<16x640xf32>
    %153 = arith.index_cast %arg0 : i32 to index
    %c22 = arith.constant 22 : index
    %154 = memref.load %arg2[%153, %c22] : memref<2x33xf32, #tpu.memory_space<smem>>
    %155 = vector.broadcast %154 : f32 to vector<16x640xf32>
    %156 = arith.mulf %16, %155 : vector<16x640xf32>
    %157 = arith.addf %152, %156 : vector<16x640xf32>
    %158 = arith.index_cast %arg0 : i32 to index
    %c23 = arith.constant 23 : index
    %159 = memref.load %arg2[%158, %c23] : memref<2x33xf32, #tpu.memory_space<smem>>
    %160 = vector.broadcast %159 : f32 to vector<16x640xf32>
    %161 = arith.mulf %17, %160 : vector<16x640xf32>
    %162 = arith.addf %157, %161 : vector<16x640xf32>
    %163 = vector.broadcast %19 : f32 to vector<16x640xf32>
    %164 = arith.addf %162, %163 : vector<16x640xf32>
    %cst_20 = arith.constant 0.000000e+00 : f32
    %165 = vector.broadcast %cst_20 : f32 to vector<16x640xf32>
    %166 = arith.subf %165, %164 : vector<16x640xf32>
    %167 = math.exp %166 : vector<16x640xf32>
    %cst_21 = arith.constant 1.000000e+00 : f32
    %168 = vector.broadcast %cst_21 : f32 to vector<16x640xf32>
    %169 = arith.addf %168, %167 : vector<16x640xf32>
    %cst_22 = arith.constant 1.000000e+00 : f32
    %170 = vector.broadcast %cst_22 : f32 to vector<16x640xf32>
    %171 = arith.divf %170, %169 : vector<16x640xf32>
    %172 = arith.truncf %171 : vector<16x640xf32> to vector<16x640xbf16>
    %c0_23 = arith.constant 0 : index
    %c0_24 = arith.constant 0 : index
    %c1280 = arith.constant 1280 : index
    %173 = vector.load %arg6[%c0_23, %c0_24, %c1280] : memref<1x16x2560xbf16, #tpu.memory_space<vmem>>, vector<1x16x640xbf16>
    %174 = vector.shape_cast %173 : vector<1x16x640xbf16> to vector<16x640xbf16>
    %175 = vector.shape_cast %172 : vector<16x640xbf16> to vector<1x16x640xbf16>
    tpu.vector_store %arg6[%c0_23, %c0_24, %c1280], %175 {strides = array<i32>} : memref<1x16x2560xbf16, #tpu.memory_space<vmem>>, vector<1x16x640xbf16>,
    %176 = arith.index_cast %arg0 : i32 to index
    %c24 = arith.constant 24 : index
    %177 = memref.load %arg2[%176, %c24] : memref<2x33xf32, #tpu.memory_space<smem>>
    %178 = vector.broadcast %177 : f32 to vector<16x640xf32>
    %179 = arith.mulf %10, %178 : vector<16x640xf32>
    %180 = arith.index_cast %arg0 : i32 to index
    %c25 = arith.constant 25 : index
    %181 = memref.load %arg2[%180, %c25] : memref<2x33xf32, #tpu.memory_space<smem>>
    %182 = vector.broadcast %181 : f32 to vector<16x640xf32>
    %183 = arith.mulf %11, %182 : vector<16x640xf32>
    %184 = arith.addf %179, %183 : vector<16x640xf32>
    %185 = arith.index_cast %arg0 : i32 to index
    %c26 = arith.constant 26 : index
    %186 = memref.load %arg2[%185, %c26] : memref<2x33xf32, #tpu.memory_space<smem>>
    %187 = vector.broadcast %186 : f32 to vector<16x640xf32>
    %188 = arith.mulf %12, %187 : vector<16x640xf32>
    %189 = arith.addf %184, %188 : vector<16x640xf32>
    %190 = arith.index_cast %arg0 : i32 to index
    %c27 = arith.constant 27 : index
    %191 = memref.load %arg2[%190, %c27] : memref<2x33xf32, #tpu.memory_space<smem>>
    %192 = vector.broadcast %191 : f32 to vector<16x640xf32>
    %193 = arith.mulf %13, %192 : vector<16x640xf32>
    %194 = arith.addf %189, %193 : vector<16x640xf32>
    %195 = arith.index_cast %arg0 : i32 to index
    %c28 = arith.constant 28 : index
    %196 = memref.load %arg2[%195, %c28] : memref<2x33xf32, #tpu.memory_space<smem>>
    %197 = vector.broadcast %196 : f32 to vector<16x640xf32>
    %198 = arith.mulf %14, %197 : vector<16x640xf32>
    %199 = arith.addf %194, %198 : vector<16x640xf32>
    %200 = arith.index_cast %arg0 : i32 to index
    %c29 = arith.constant 29 : index
    %201 = memref.load %arg2[%200, %c29] : memref<2x33xf32, #tpu.memory_space<smem>>
    %202 = vector.broadcast %201 : f32 to vector<16x640xf32>
    %203 = arith.mulf %15, %202 : vector<16x640xf32>
    %204 = arith.addf %199, %203 : vector<16x640xf32>
    %205 = arith.index_cast %arg0 : i32 to index
    %c30 = arith.constant 30 : index
    %206 = memref.load %arg2[%205, %c30] : memref<2x33xf32, #tpu.memory_space<smem>>
    %207 = vector.broadcast %206 : f32 to vector<16x640xf32>
    %208 = arith.mulf %16, %207 : vector<16x640xf32>
    %209 = arith.addf %204, %208 : vector<16x640xf32>
    %210 = arith.index_cast %arg0 : i32 to index
    %c31 = arith.constant 31 : index
    %211 = memref.load %arg2[%210, %c31] : memref<2x33xf32, #tpu.memory_space<smem>>
    %212 = vector.broadcast %211 : f32 to vector<16x640xf32>
    %213 = arith.mulf %17, %212 : vector<16x640xf32>
    %214 = arith.addf %209, %213 : vector<16x640xf32>
    %215 = vector.broadcast %19 : f32 to vector<16x640xf32>
    %216 = arith.addf %214, %215 : vector<16x640xf32>
    %cst_25 = arith.constant 0.000000e+00 : f32
    %217 = vector.broadcast %cst_25 : f32 to vector<16x640xf32>
    %218 = arith.subf %217, %216 : vector<16x640xf32>
    %219 = math.exp %218 : vector<16x640xf32>
    %cst_26 = arith.constant 1.000000e+00 : f32
    %220 = vector.broadcast %cst_26 : f32 to vector<16x640xf32>
    %221 = arith.addf %220, %219 : vector<16x640xf32>
    %cst_27 = arith.constant 1.000000e+00 : f32
    %222 = vector.broadcast %cst_27 : f32 to vector<16x640xf32>
    %223 = arith.divf %222, %221 : vector<16x640xf32>
    %224 = arith.truncf %223 : vector<16x640xf32> to vector<16x640xbf16>
    %c0_28 = arith.constant 0 : index
    %c0_29 = arith.constant 0 : index
    %c1920 = arith.constant 1920 : index
    %225 = vector.load %arg6[%c0_28, %c0_29, %c1920] : memref<1x16x2560xbf16, #tpu.memory_space<vmem>>, vector<1x16x640xbf16>
    %226 = vector.shape_cast %225 : vector<1x16x640xbf16> to vector<16x640xbf16>
    %227 = vector.shape_cast %224 : vector<16x640xbf16> to vector<1x16x640xbf16>
    tpu.vector_store %arg6[%c0_28, %c0_29, %c1920], %227 {strides = array<i32>} : memref<1x16x2560xbf16, #tpu.memory_space<vmem>>, vector<1x16x640xbf16>,
    return
  }
  func.func @transform_0(%arg0: i32, %arg1: i32, %arg2: memref<2x33xf32, #tpu.memory_space<smem>>) -> (i32, i32) {
    %c0_i32 = arith.constant 0 : i32
    %c0_i32_0 = arith.constant 0 : i32
    return %arg1, %c0_i32 : i32, i32
  }
  func.func @transform_1(%arg0: i32, %arg1: i32, %arg2: memref<2x33xf32, #tpu.memory_space<smem>>) -> (i32, i32, i32) {
    %c0_i32 = arith.constant 0 : i32
    %c0_i32_0 = arith.constant 0 : i32
    %c0_i32_1 = arith.constant 0 : i32
    return %arg0, %c0_i32, %c0_i32_0 : i32, i32, i32
  }
  func.func @transform_2(%arg0: i32, %arg1: i32, %arg2: memref<2x33xf32, #tpu.memory_space<smem>>) -> (i32, i32, i32) {
    %c0_i32 = arith.constant 0 : i32
    %c0_i32_0 = arith.constant 0 : i32
    %c0_i32_1 = arith.constant 0 : i32
    return %arg0, %c0_i32, %c0_i32_0 : i32, i32, i32
  }
  func.func @transform_3(%arg0: i32, %arg1: i32, %arg2: memref<2x33xf32, #tpu.memory_space<smem>>) -> (i32, i32, i32) {
    %c0_i32 = arith.constant 0 : i32
    %c0_i32_0 = arith.constant 0 : i32
    return %arg0, %arg1, %c0_i32 : i32, i32, i32
  }
}

</mosaic_0001>

<bundles_post_ra>
// kernel: tpu_custom_call.1
= control target key start
LH: loop header
LB: loop body
LE: loop exit
PB: predicated region body
PF: predicated region fallthrough
CT: control target
= control target key end

     0   :  { %s6206_s0 = inlined_call_operand.vmem [shape: f32[2,33], index: 0, kind: input, shape index: {}]   ;;  %s6207_s1 = inlined_call_operand.vmem [shape: bf16[16,33], index: 1, kind: input, shape index: {}]   ;;  %s6208_s2 = inlined_call_operand.vmem [shape: bf16[2,33,5120], index: 2, kind: input, shape index: {}]   ;;  %s6209_s3 = inlined_call_operand.vmem [shape: f32[2,1,5120], index: 3, kind: input, shape index: {}]   ;;  %s6210_s4 = inlined_call_operand.hbm [shape: bf16[2,16,2560], index: 4, kind: output, shape index: {}]  }
   0x1   :  { %6257 = sst [smem:[#allocation72_spill]] %s6207_s1  ;;  %s9_s17 = sshll.u32 %s6206_s0, 4  ;;  %s10_s17 = int_to_ptr.vmem [resolvable:$true] %s9_s17 }
   0x2   :  { %6258 = sst [smem:[#allocation73_spill]] %s6208_s2  ;;  %s3828_s18 = scalar_lea.vmem %s10_s17, 32 }
   0x3   :  { %6259 = sst [smem:[#allocation74_spill]] %s6209_s3  ;;  %p3829_p0 = scmp.ne.s32.totalorder %s10_s17, %s3828_s18 }
   0x4   :  { %p3833_p1 = scmp.lt.s32.totalorder %s10_s17, %s10_s17  ;;  %p3834_p2 = scmp.lt.s32.totalorder %s3828_s18, %s3828_s18 }
   0x6   :  { %p3835_p3 = por %p3834_p2, %p3833_p1 }
   0x8   :  { %p3836_p4 = pnand %p3835_p3, %p3829_p0 }
   0xa   :  { %3839 = shalt.err (!%p3836_p4)  }
   0xb   :  { %s3922_s19 = smov [#allocation3]  }
   0xc   :  { %12 = dma.vmem_to_smem %s10_s17, 32, %s3922_s19, [#allocation2] }
   0xd   :  { %3892 = dma.done.wait [#allocation2], 32 }
   0xe   :  { %3893 = vsyncadd [#allocation2], 4294967264 }
   0xf   :  { %14 = sfence }
  0x10   :  { %15 = vsyncpa [#allocation5], 0 }
  0x11   :  { %17 = vsyncpa [#allocation5 + $0x1], 0  ;;  %s3955_s20 = smov 0   ;;  %s3957_s21 = smov 0  }
  0x12   :  { %s3959_s0 = smov 0   ;;  %s3961_s22 = smov 0  }
  0x13   :  { %s3963_s23 = smov 0   ;;  %s3965_s24 = smov 0  }
  0x14 LB: > { %6260 = sst [smem:[#allocation8_spill]] %s3908_s0  ;;  %s3363_s25 = sadd.s32 4294967295, %s3920_s24   ;;  %s3920_s24 = sphi %s3965_s24, %s23_s24   ;;  %s3916_s23 = sphi %s3963_s23, %s6525_s23   ;;  %s3912_s22 = sphi %s3961_s22, %s6524_s22   ;;  %s3908_s0 = sphi %s3959_s0, %s6523_s0   ;;  %s3904_s21 = sphi %s3957_s21, %s6527_s21   ;;  %s3900_s20 = sphi %s3955_s20, %s6526_s20  }
  0x15   : > { %6261 = sst [smem:[#allocation9_spill]] %s3916_s23  ;;  %s3364_s26 = sadd.s32 4294967294, %s3920_s24  }
  0x16   : > { %s35_s27 = sadd.s32 1, %s3916_s23  ;;  %s122_s28 = sadd.s32 1, %s3908_s0 }
  0x17   : > { %p37_p5 = scmp.ge.s32.totalorder %s35_s27, 2  ;;  %p132_p6 = scmp.ne.s32.totalorder %s3908_s0, %s3904_s21 }
  0x18   : > { %p133_p7 = scmp.eq.s32.totalorder %s3363_s25, 1  ;;  %p138_p8 = scmp.ne.s32.totalorder %s3904_s21, %s3900_s20 }
  0x19   : > { %s6529_s27 = smov (%p37_p5, %s35_s27), 0  ;;  %p139_p10 = scmp.eq.s32.totalorder %s3364_s26, 1 }
  0x1a   : > { %6262 = sst [smem:[#allocation10_spill]] %s6529_s27  ;;  %p3995_p9 = por %p133_p7, %p132_p6 }
  0x1b   : > { %s117_s30 = ssub.s32 %s3916_s23, %s6529_s27  ;;  %p3368_p11 = scmp.ge.s32.totalorder %s3920_s24, 1 }
  0x1c   : > { %p120_p12 = scmp.eq.s32.totalorder %s117_s30, 0  ;;  %p4002_p13 = por %p139_p10, %p138_p8 }
  0x1d   : > { %p181_p0 = scmp.lt.s32.totalorder %s3920_s24, 3 }
  0x1e   : > { %s6264_s5 = scalar_select %p4002_p13, 1, 0 }
  0x1f   : > { %s4008_s6 = scalar_select %p120_p12, %s3908_s0, %s122_s28  }
  0x20   : > { %6265 = sst [smem:[#allocation11_spill]] %s6264_s5  ;;  %p182_p1 = pnand %p3368_p11, %p181_p0 }
  0x21   : > { %6266 = sst [smem:[#allocation12_spill]] %s4008_s6 }
  0x22   : > { %185 = sbr.rel (%p182_p1) target bundleno = 585 (0x249), region = 32 }
  0x29   : > { %p220_p2 = scmp.lt.s32.totalorder %s3912_s22, 1  ;;  %v3923_v0 = vmov 0   ;;  %s6267_s2 = sld [smem:[#allocation73_spill]]  ;;  %vm1052_vm0 = vcmask 1040384   ;;  %vm1048_vm1 = vcmask 269312  }
  0x2a   : > { %1207 = vmatprep.mubr.bf16.mxu0 %v3923_v0  ;;  %1250 = vmatprep.mubr.bf16.mxu1 %v3923_v0  ;;  %v4032_v15 = vsel %vm1052_vm0, 65535, %v3923_v0  ;;  %s6268_s1 = sld [smem:[#allocation72_spill]]  ;;  %s4287_s15 = sshll.u32 %s3912_s22, 7 }
  0x2b   : > { %s4014_s7 = scalar_select %p220_p2, %s3912_s22, 1 }
  0x2c   : > { %s6269_s3 = sld [smem:[#allocation74_spill]]  ;;  %s2400_s19 = sadd.s32 8, %s4287_s15 }
  0x2d   : > { %s3564_s8 = smul.u32 800, %s4014_s7  ;;  %s4296_s25 = sld [smem:[#allocation3 + %s4287_s15]] }
  0x2e   : > { %s3565_s14 = smul.u32 40, %s4014_s7  ;;  %s2682_s26 = sadd.s32 16, %s4287_s15 }
  0x2f   : > { %s4020_s11 = scalar_lea.vmem %s6267_s2, %s3564_s8  ;;  %s2964_s28 = sadd.s32 24, %s4287_s15 }
  0x30   : > { %v233_v1 = vld [vmem:[%s4020_s11] sm:$0xff]  ;;  %v234_v3 = vld [vmem:[%s4020_s11 + $0x8] sm:$0xff]  ;;  %v235_v26 = vld [vmem:[%s4020_s11 + $0x10] sm:$0xff]  ;;  %s2130_s30 = sadd.s32 1, %s4287_s15  ;;  %s4301_s7 = sld [smem:[#allocation3 + %s2400_s19]] }
  0x31   : > { %v253_v2 = vld [vmem:[%s4020_s11 + $0xa0] sm:$0xff]  ;;  %v254_v5 = vld [vmem:[%s4020_s11 + $0xa8] sm:$0xff]  ;;  %v255_v27 = vld [vmem:[%s4020_s11 + $0xb0] sm:$0xff]  ;;  %s2413_s8 = sadd.s32 9, %s4287_s15  ;;  %s4304_s9 = sld [smem:[#allocation3 + %s2682_s26]] }
  0x32   : > { %v3372_v4 = vcombine.high %v233_v1, %v253_v2  ;;  %v3371_v6 = vcombine.low %v233_v1, %v253_v2  ;;  %v273_v7 = vld [vmem:[%s4020_s11 + $0x140] sm:$0xff]  ;;  %v3374_v9 = vcombine.high %v234_v3, %v254_v5  ;;  %v3373_v10 = vcombine.low %v234_v3, %v254_v5  ;;  %v274_v12 = vld [vmem:[%s4020_s11 + $0x148] sm:$0xff]  ;;  %v236_v28 = vld [vmem:[%s4020_s11 + $0x18] sm:$0xff]  ;;  %s4292_s18 = scalar_lea.vmem %s6269_s3, %s3565_s14  ;;  %s2695_s10 = sadd.s32 17, %s4287_s15 }
  0x33   : > { %v293_v8 = vld [vmem:[%s4020_s11 + $0x1e0] sm:$0xff]  ;;  %v294_v13 = vld [vmem:[%s4020_s11 + $0x1e8] sm:$0xff]  ;;  %v256_v29 = vld [vmem:[%s4020_s11 + $0xb8] sm:$0xff]  ;;  %v3376_v33 = vcombine.high %v235_v26, %v255_v27  ;;  %v3375_v41 = vcombine.low %v235_v26, %v255_v27  ;;  %s4309_s12 = sld [smem:[#allocation3 + %s2130_s30]]  ;;  %s2977_s14 = sadd.s32 25, %s4287_s15 }
  0x34   : > { %v3412_v11 = vcombine.high %v273_v7, %v293_v8  ;;  %v313_v14 = vld [vmem:[%s4020_s11 + $0x280] sm:$0x11]  ;;  %1175 = vmatprep.subr.bf16.mxu0 %v3372_v4  ;;  %v3414_v16 = vcombine.high %v274_v12, %v294_v13  ;;  %v314_v18 = vld [vmem:[%s4020_s11 + $0x288] sm:$0x11]  ;;  %1218 = vmatprep.subr.bf16.mxu1 %v3374_v9  ;;  %v3411_v19 = vcombine.low %v273_v7, %v293_v8  ;;  %v275_v35 = vld [vmem:[%s4020_s11 + $0x150] sm:$0xff]  ;;  %s4311_s13 = sld [smem:[#allocation3 + %s2413_s8]] }
  0x35   : > { %v3452_v17 = vcombine.high %v313_v14, %v313_v14  ;;  %1176 = vmatpush1.bf16.msra.mxu0 %v3371_v6  ;;  %v3454_v20 = vcombine.high %v314_v18, %v314_v18  ;;  %v3451_v21 = vcombine.low %v313_v14, %v313_v14  ;;  %1219 = vmatpush1.bf16.msra.mxu1 %v3373_v10  ;;  %v4046_v32 = vld [vmem:[%s6268_s1] sm:$0xff]   ;;  %v295_v36 = vld [vmem:[%s4020_s11 + $0x1f0] sm:$0xff]  ;;  %v276_v38 = vld [vmem:[%s4020_s11 + $0x158] sm:$0xff]  ;;  %s4314_s16 = sld [smem:[#allocation3 + %s2695_s10]]  ;;  %s2153_s17 = sadd.s32 2, %s4287_s15 }
  0x36   : > { %1177 = vmatprep.subr.bf16.mxu0 %v3412_v11  ;;  %v3413_v22 = vcombine.low %v274_v12, %v294_v13  ;;  %v3453_v24 = vcombine.low %v314_v18, %v314_v18  ;;  %1220 = vmatprep.subr.bf16.mxu1 %v3414_v16  ;;  %v3378_v34 = vcombine.high %v236_v28, %v256_v29  ;;  %v315_v37 = vld [vmem:[%s4020_s11 + $0x290] sm:$0x11]  ;;  %v296_v39 = vld [vmem:[%s4020_s11 + $0x1f8] sm:$0xff]  ;;  %v237_v53 = vld [vmem:[%s4020_s11 + $0x20] sm:$0xff]  ;;  %s2436_s19 = sadd.s32 10, %s4287_s15  ;;  %s2718_s1 = sadd.s32 18, %s4287_s15 }
  0x37   : > { %v1059_v23 = vand.u32 %v3452_v17, %v4032_v15  ;;  %v1065_v25 = vand.u32 %v3454_v20, %v4032_v15  ;;  %v1056_v30 = vand.u32 %v3451_v21, %v4032_v15  ;;  %v316_v40 = vld [vmem:[%s4020_s11 + $0x298] sm:$0x11]  ;;  %v3377_v42 = vcombine.low %v236_v28, %v256_v29  ;;  %v257_v54 = vld [vmem:[%s4020_s11 + $0xc0] sm:$0xff]  ;;  %v238_v55 = vld [vmem:[%s4020_s11 + $0x28] sm:$0xff]  ;;  %s4319_s26 = sld [smem:[#allocation3 + %s2977_s14]]  ;;  %s2176_s2 = sadd.s32 3, %s4287_s15 }
  0x38   : > { %v1062_v31 = vand.u32 %v3453_v24, %v4032_v15  ;;  %v3416_v43 = vcombine.high %v275_v35, %v295_v36  ;;  %v3456_v44 = vcombine.high %v315_v37, %v315_v37  ;;  %v3418_v45 = vcombine.high %v276_v38, %v296_v39  ;;  %v258_v56 = vld [vmem:[%s4020_s11 + $0xc8] sm:$0xff]  ;;  %v277_v60 = vld [vmem:[%s4020_s11 + $0x160] sm:$0xff]  ;;  %v4075_v4 = vld [vmem:[%s4020_s11 + $0x2d8] sm:$0x11]  ;;  %s4322_s30 = sld [smem:[#allocation3 + %s2153_s17]]  ;;  %s2459_s27 = sadd.s32 11, %s4287_s15 }
  0x39   : > { %1178 = vmatpush1.bf16.msra.mxu0 %v3411_v19  ;;  %1221 = vmatpush1.bf16.msra.mxu1 %v3413_v22  ;;  %v3458_v46 = vcombine.high %v316_v40, %v316_v40  ;;  %v3415_v47 = vcombine.low %v275_v35, %v295_v36  ;;  %v3455_v48 = vcombine.low %v315_v37, %v315_v37  ;;  %v297_v62 = vld [vmem:[%s4020_s11 + $0x200] sm:$0xff]  ;;  %v278_v63 = vld [vmem:[%s4020_s11 + $0x168] sm:$0xff]  ;;  %v239_v21 = vld [vmem:[%s4020_s11 + $0x30] sm:$0xff]  ;;  %s4325_s8 = sld [smem:[#allocation3 + %s2436_s19]]  ;;  %s2741_s6 = sadd.s32 19, %s4287_s15 }
  0x3a   : > { %1179 = vmatprep.subr.bf16.mxu0 %v1059_v23  ;;  %1222 = vmatprep.subr.bf16.mxu1 %v1065_v25  ;;  %v3417_v49 = vcombine.low %v276_v38, %v296_v39  ;;  %v1071_v50 = vand.u32 %v3456_v44, %v4032_v15  ;;  %v3457_v51 = vcombine.low %v316_v40, %v316_v40  ;;  %v317_v1 = vld [vmem:[%s4020_s11 + $0x2a0] sm:$0x11]  ;;  %v298_v2 = vld [vmem:[%s4020_s11 + $0x208] sm:$0xff]  ;;  %v259_v22 = vld [vmem:[%s4020_s11 + $0xd0] sm:$0xff]  ;;  %s4327_s3 = sld [smem:[#allocation3 + %s2718_s1]]  ;;  %s3023_s14 = sadd.s32 27, %s4287_s15 }
  0x3b   : > { %v1077_v52 = vand.u32 %v3458_v46, %v4032_v15  ;;  %v1068_v57 = vand.u32 %v3455_v48, %v4032_v15  ;;  %v3380_v59 = vcombine.high %v237_v53, %v257_v54  ;;  %v3382_v61 = vcombine.high %v238_v55, %v258_v56  ;;  %v318_v3 = vld [vmem:[%s4020_s11 + $0x2a8] sm:$0x11]  ;;  %v325_v12 = vld [vmem:[%s4020_s11 + $0x2e0] sm:$0x11]  ;;  %v240_v26 = vld [vmem:[%s4020_s11 + $0x38] sm:$0xff]  ;;  %s4332_s23 = sld [smem:[#allocation3 + %s2176_s2]] }
  0x3c   : > { %v1074_v58 = vand.u32 %v3457_v51, %v4032_v15  ;;  %v3379_v5 = vcombine.low %v237_v53, %v257_v54  ;;  %v3381_v6 = vcombine.low %v238_v55, %v258_v56  ;;  %v3420_v7 = vcombine.high %v277_v60, %v297_v62  ;;  %v326_v17 = vld [vmem:[%s4020_s11 + $0x2e8] sm:$0x11]  ;;  %v260_v27 = vld [vmem:[%s4020_s11 + $0xd8] sm:$0xff]  ;;  %v279_v38 = vld [vmem:[%s4020_s11 + $0x170] sm:$0xff]  ;;  %s2199_s17 = sadd.s32 4, %s4287_s15  ;;  %s4346_s1 = sld [smem:[#allocation3 + %s2459_s27]] }
  0x3d   : > { %1180 = vmatpush1.bf16.msra.mxu0 %v1056_v30  ;;  %1223 = vmatpush1.bf16.msra.mxu1 %v1062_v31  ;;  %v3460_v8 = vcombine.high %v317_v1, %v317_v1  ;;  %v3422_v9 = vcombine.high %v278_v63, %v298_v2  ;;  %v3462_v10 = vcombine.high %v318_v3, %v318_v3  ;;  %v327_v30 = vld [vmem:[%s4020_s11 + $0x2f0] sm:$0x11]  ;;  %v328_v36 = vld [vmem:[%s4020_s11 + $0x2f8] sm:$0x11]  ;;  %v329_v56 = vld [vmem:[%s4020_s11 + $0x300] sm:$0x11] }
  0x3e   : > { %1261 = vmatprep.subr.bf16.mxu0 %v3376_v33  ;;  %1304 = vmatprep.subr.bf16.mxu1 %v3378_v34  ;;  %v3473_v11 = vcombine.low %v4075_v4, %v4075_v4  ;;  %v3419_v13 = vcombine.low %v277_v60, %v297_v62  ;;  %v3459_v14 = vcombine.low %v317_v1, %v317_v1  ;;  %v299_v39 = vld [vmem:[%s4020_s11 + $0x210] sm:$0xff]  ;;  %v280_v46 = vld [vmem:[%s4020_s11 + $0x178] sm:$0xff]  ;;  %s2482_s19 = sadd.s32 12, %s4287_s15  ;;  %s4353_s2 = sld [smem:[#allocation3 + %s2741_s6]] }
  0x3f   : > { %v3421_v18 = vcombine.low %v278_v63, %v298_v2  ;;  %v1083_v19 = vand.u32 %v3460_v8, %v4032_v15  ;;  %v3461_v20 = vcombine.low %v318_v3, %v318_v3  ;;  %v1089_v23 = vand.u32 %v3462_v10, %v4032_v15  ;;  %v319_v40 = vld [vmem:[%s4020_s11 + $0x2b0] sm:$0x11]  ;;  %v320_v48 = vld [vmem:[%s4020_s11 + $0x2b8] sm:$0x11]  ;;  %s4360_s0 = sld [smem:[#allocation3 + %s3023_s14]]  ;;  %s3046_s5 = sadd.s32 28, %s4287_s15 }
  0x40   : > { %3491 = vmatmul.mubr.msk.bf16.vlgmr.msra.gmra.mrb[0].mxu0 %vm1048_vm1, %v4046_v32  ;;  %3492 = vmatmul.mubr.msk.bf16.vlgmr.msra.gmra.mrb[0].mxu1 %vm1048_vm1, %v4046_v32  ;;  %v4085_v16 = vand.u32 %v3473_v11, %v4032_v15  ;;  %v3475_v24 = vcombine.low %v325_v12, %v325_v12  ;;  %v3476_v25 = vcombine.high %v325_v12, %v325_v12  ;;  %v331_v10 = vld [vmem:[%s4020_s11 + $0x310] sm:$0x11]  ;;  %s4362_s27 = sld [smem:[#allocation3 + %s2199_s17]]  ;;  %s2222_s17 = sadd.s32 5, %s4287_s15 }
  0x41   : > { %1262 = vmatpush1.bf16.msra.mxu0 %v3375_v41  ;;  %1305 = vmatpush1.bf16.msra.mxu1 %v3377_v42  ;;  %v3477_v28 = vcombine.low %v326_v17, %v326_v17  ;;  %v3478_v29 = vcombine.high %v326_v17, %v326_v17  ;;  %v1080_v31 = vand.u32 %v3459_v14, %v4032_v15  ;;  %v332_v14 = vld [vmem:[%s4020_s11 + $0x318] sm:$0x11]  ;;  %s4370_s6 = sld [smem:[#allocation3 + %s2482_s19]]  ;;  %s2268_s19 = sadd.s32 7, %s4287_s15 }
  0x42   : > { %1263 = vmatprep.subr.bf16.mxu0 %v3416_v43  ;;  %1306 = vmatprep.subr.bf16.mxu1 %v3418_v45  ;;  %v3384_v33 = vcombine.high %v239_v21, %v259_v22  ;;  %v4099_v34 = vand.u32 %v3476_v25, %v4032_v15  ;;  %v4102_v35 = vand.u32 %v3475_v24, %v4032_v15 }
  0x43   : > { %1293 = vmatprep.mubr.bf16.mxu0 %v3923_v0  ;;  %1336 = vmatprep.mubr.bf16.mxu1 %v3923_v0  ;;  %v1086_v37 = vand.u32 %v3461_v20, %v4032_v15  ;;  %v4110_v41 = vand.u32 %v3478_v29, %v4032_v15  ;;  %v4113_v42 = vand.u32 %v3477_v28, %v4032_v15 }
  0x44   : > { %v3386_v43 = vcombine.high %v240_v26, %v260_v27  ;;  %v3479_v44 = vcombine.low %v327_v30, %v327_v30  ;;  %v3383_v45 = vcombine.low %v239_v21, %v259_v22  ;;  %v3482_v51 = vcombine.high %v328_v36, %v328_v36  ;;  %v242_v21 = vld [vmem:[%s4020_s11 + $0x48] sm:$0xff] }
  0x45   : > { %1264 = vmatpush1.bf16.msra.mxu0 %v3415_v47  ;;  %1307 = vmatpush1.bf16.msra.mxu1 %v3417_v49  ;;  %v300_v47 = vld [vmem:[%s4020_s11 + $0x218] sm:$0xff]  ;;  %v3480_v49 = vcombine.high %v327_v30, %v327_v30  ;;  %v3424_v53 = vcombine.high %v279_v38, %v299_v39  ;;  %v3464_v54 = vcombine.high %v319_v40, %v319_v40  ;;  %v262_v22 = vld [vmem:[%s4020_s11 + $0xe8] sm:$0xff] }
  0x46   : > { %1265 = vmatprep.subr.bf16.mxu0 %v1071_v50  ;;  %1308 = vmatprep.subr.bf16.mxu1 %v1077_v52  ;;  %v3481_v50 = vcombine.low %v328_v36, %v328_v36  ;;  %v3385_v52 = vcombine.low %v240_v26, %v260_v27  ;;  %v4119_v55 = vand.u32 %v3479_v44, %v4032_v15  ;;  %v301_v36 = vld [vmem:[%s4020_s11 + $0x220] sm:$0xff]  ;;  %v302_v44 = vld [vmem:[%s4020_s11 + $0x228] sm:$0xff] }
  0x47   : > { %v3425_v62 = vcombine.low %v280_v46, %v300_v47  ;;  %v3426_v63 = vcombine.high %v280_v46, %v300_v47  ;;  %v3466_v1 = vcombine.high %v320_v48, %v320_v48  ;;  %v3483_v2 = vcombine.low %v329_v56, %v329_v56 }
  0x48   : > { %v4130_v60 = vand.u32 %v3481_v50, %v4032_v15  ;;  %v3484_v3 = vcombine.high %v329_v56, %v329_v56  ;;  %v1095_v8 = vand.u32 %v3464_v54, %v4032_v15  ;;  %v3488_v25 = vcombine.high %v331_v10, %v331_v10 }
  0x49   : > { %1266 = vmatpush1.bf16.msra.mxu0 %v1068_v57  ;;  %1309 = vmatpush1.bf16.msra.mxu1 %v1074_v58  ;;  %v330_v57 = vld [vmem:[%s4020_s11 + $0x308] sm:$0x11]  ;;  %v4124_v58 = vand.u32 %v3480_v49, %v4032_v15  ;;  %v1101_v17 = vand.u32 %v3466_v1, %v4032_v15  ;;  %v3489_v26 = vcombine.low %v332_v14, %v332_v14  ;;  %v244_v1 = vld [vmem:[%s4020_s11 + $0x58] sm:$0xff] }
  0x4a   : > { %1347 = vmatprep.subr.bf16.mxu0 %v3380_v59  ;;  %1390 = vmatprep.subr.bf16.mxu1 %v3382_v61  ;;  %v4127_v59 = vand.u32 %v3482_v51, %v4032_v15  ;;  %v3423_v61 = vcombine.low %v279_v38, %v299_v39  ;;  %v4139_v11 = vand.u32 %v3484_v3, %v4032_v15 }
  0x4b   : > { %v3490_v27 = vcombine.high %v332_v14, %v332_v14  ;;  %v4167_v38 = vand.u32 %v3488_v25, %v4032_v15  ;;  %v3389_v47 = vcombine.low %v242_v21, %v262_v22  ;;  %v284_v14 = vld [vmem:[%s4020_s11 + $0x198] sm:$0xff] }
  0x4c   : > { %3493 = vmatmul.mubr.msk.bf16.vlgmr.msra.gmra.mrb[4].mxu0 %vm1048_vm1, %v4046_v32  ;;  %3494 = vmatmul.mubr.msk.bf16.vlgmr.msra.gmra.mrb[4].mxu1 %vm1048_vm1, %v4046_v32 }
  0x4d   : > { %1348 = vmatpush1.bf16.msra.mxu0 %v3379_v5  ;;  %1391 = vmatpush1.bf16.msra.mxu1 %v3381_v6  ;;  %v3485_v5 = vcombine.low %v330_v57, %v330_v57  ;;  %v3486_v6 = vcombine.high %v330_v57, %v330_v57  ;;  %v4170_v39 = vand.u32 %v3490_v27, %v4032_v15 }
  0x4e   : > { %1349 = vmatprep.subr.bf16.mxu0 %v3420_v7  ;;  %1392 = vmatprep.subr.bf16.mxu1 %v3422_v9  ;;  %v3463_v7 = vcombine.low %v319_v40, %v319_v40  ;;  %v3465_v9 = vcombine.low %v320_v48, %v320_v48  ;;  %v4173_v40 = vand.u32 %v3489_v26, %v4032_v15 }
  0x4f   : > { %1379 = vmatprep.mubr.bf16.mxu0 %v3923_v0  ;;  %1422 = vmatprep.mubr.bf16.mxu1 %v3923_v0  ;;  %v4142_v12 = vand.u32 %v3486_v6, %v4032_v15  ;;  %v4153_v20 = vand.u32 %v3485_v5, %v4032_v15 }
  0x50   : > { %v1092_v24 = vand.u32 %v3463_v7, %v4032_v15  ;;  %v1098_v28 = vand.u32 %v3465_v9, %v4032_v15  ;;  %v303_v9 = vld [vmem:[%s4020_s11 + $0x230] sm:$0xff] }
  0x51   : > { %1350 = vmatpush1.bf16.msra.mxu0 %v3419_v13  ;;  %1393 = vmatpush1.bf16.msra.mxu1 %v3421_v18  ;;  %v4145_v13 = vand.u32 %v3483_v2, %v4032_v15  ;;  %v241_v18 = vld [vmem:[%s4020_s11 + $0x40] sm:$0xff]  ;;  %v264_v2 = vld [vmem:[%s4020_s11 + $0xf8] sm:$0xff] }
  0x52   : > { %1351 = vmatprep.subr.bf16.mxu0 %v1083_v19  ;;  %1394 = vmatprep.subr.bf16.mxu1 %v1089_v23  ;;  %v261_v19 = vld [vmem:[%s4020_s11 + $0xe0] sm:$0xff]  ;;  %v3487_v23 = vcombine.low %v331_v10, %v331_v10  ;;  %v3394_v7 = vcombine.high %v244_v1, %v264_v2  ;;  %v323_v10 = vld [vmem:[%s4020_s11 + $0x2d0] sm:$0x11] }
  0x53   : > { %v3388_v29 = vcombine.high %v241_v18, %v261_v19  ;;  %v3387_v46 = vcombine.low %v241_v18, %v261_v19  ;;  %v3393_v19 = vcombine.low %v244_v1, %v264_v2  ;;  %v3471_v26 = vcombine.low %v323_v10, %v323_v10  ;;  %v307_v1 = vld [vmem:[%s4020_s11 + $0x250] sm:$0xff]  ;;  %v288_v2 = vld [vmem:[%s4020_s11 + $0x1b8] sm:$0xff] }
  0x54   : > { %v4161_v30 = vand.u32 %v3487_v23, %v4032_v15 }
  0x55   : > { %1352 = vmatpush1.bf16.msra.mxu0 %v1080_v31  ;;  %1395 = vmatpush1.bf16.msra.mxu1 %v1086_v37  ;;  %v3390_v31 = vcombine.high %v242_v21, %v262_v22  ;;  %v321_v37 = vld [vmem:[%s4020_s11 + $0x2c0] sm:$0x11]  ;;  %v3472_v22 = vcombine.high %v323_v10, %v323_v10  ;;  %v270_v10 = vld [vmem:[%s4020_s11 + $0x128] sm:$0xff] }
  0x56   : > { %1433 = vmatprep.subr.bf16.mxu0 %v3384_v33  ;;  %1476 = vmatprep.subr.bf16.mxu1 %v3386_v43  ;;  %v281_v33 = vld [vmem:[%s4020_s11 + $0x180] sm:$0xff]  ;;  %v282_v43 = vld [vmem:[%s4020_s11 + $0x188] sm:$0xff]  ;;  %v3468_v49 = vcombine.high %v321_v37, %v321_v37 }
  0x57   : > { %v3428_v48 = vcombine.high %v281_v33, %v301_v36  ;;  %v3430_v50 = vcombine.high %v282_v43, %v302_v44  ;;  %v3429_v54 = vcombine.low %v282_v43, %v302_v44 }
  0x58   : > { %3495 = vmatmul.mubr.msk.bf16.vlgmr.msra.gmra.mrb[8].mxu0 %vm1048_vm1, %v4046_v32  ;;  %3496 = vmatmul.mubr.msk.bf16.vlgmr.msra.gmra.mrb[8].mxu1 %vm1048_vm1, %v4046_v32  ;;  %v1107_v56 = vand.u32 %v3468_v49, %v4032_v15 }
  0x59   : > { %1434 = vmatpush1.bf16.msra.mxu0 %v3383_v45  ;;  %1477 = vmatpush1.bf16.msra.mxu1 %v3385_v52  ;;  %v322_v45 = vld [vmem:[%s4020_s11 + $0x2c8] sm:$0x11]  ;;  %v3427_v52 = vcombine.low %v281_v33, %v301_v36 }
  0x5a   : > { %1435 = vmatprep.subr.bf16.mxu0 %v3424_v53  ;;  %1478 = vmatprep.subr.bf16.mxu1 %v3426_v63  ;;  %v3470_v51 = vcombine.high %v322_v45, %v322_v45  ;;  %v3467_v53 = vcombine.low %v321_v37, %v321_v37  ;;  %v3469_v57 = vcombine.low %v322_v45, %v322_v45  ;;  %v263_v63 = vld [vmem:[%s4020_s11 + $0xf0] sm:$0xff]  ;;  %v246_v33 = vld [vmem:[%s4020_s11 + $0x68] sm:$0xff]  ;;  %v285_v45 = vld [vmem:[%s4020_s11 + $0x1a0] sm:$0xff] }
  0x5b   : > { %1465 = vmatprep.mubr.bf16.mxu0 %v3923_v0  ;;  %1508 = vmatprep.mubr.bf16.mxu1 %v3923_v0  ;;  %v266_v36 = vld [vmem:[%s4020_s11 + $0x108] sm:$0xff]  ;;  %v1116_v37 = vand.u32 %v3471_v26, %v4032_v15  ;;  %v271_v26 = vld [vmem:[%s4020_s11 + $0x130] sm:$0xff] }
  0x5c   : > { %v1104_v3 = vand.u32 %v3467_v53, %v4032_v15  ;;  %v1110_v5 = vand.u32 %v3469_v57, %v4032_v15  ;;  %v3398_v44 = vcombine.high %v246_v33, %v266_v36  ;;  %v247_v53 = vld [vmem:[%s4020_s11 + $0x70] sm:$0xff]  ;;  %v268_v57 = vld [vmem:[%s4020_s11 + $0x118] sm:$0xff] }
  0x5d   : > { %1436 = vmatpush1.bf16.msra.mxu0 %v3423_v61  ;;  %1479 = vmatpush1.bf16.msra.mxu1 %v3425_v62  ;;  %v1113_v61 = vand.u32 %v3470_v51, %v4032_v15  ;;  %v243_v62 = vld [vmem:[%s4020_s11 + $0x50] sm:$0xff] }
  0x5e   : > { %1437 = vmatprep.subr.bf16.mxu0 %v1095_v8  ;;  %1480 = vmatprep.subr.bf16.mxu1 %v1101_v17  ;;  %v3392_v6 = vcombine.high %v243_v62, %v263_v63  ;;  %v283_v8 = vld [vmem:[%s4020_s11 + $0x190] sm:$0xff]  ;;  %v304_v17 = vld [vmem:[%s4020_s11 + $0x238] sm:$0xff]  ;;  %v3391_v18 = vcombine.low %v243_v62, %v263_v63 }
  0x5f   : > { %v3432_v21 = vcombine.high %v283_v8, %v303_v9  ;;  %v3434_v23 = vcombine.high %v284_v14, %v304_v17  ;;  %v3431_v25 = vcombine.low %v283_v8, %v303_v9  ;;  %v3433_v27 = vcombine.low %v284_v14, %v304_v17  ;;  %v287_v63 = vld [vmem:[%s4020_s11 + $0x1b0] sm:$0xff]  ;;  %v269_v8 = vld [vmem:[%s4020_s11 + $0x120] sm:$0xff]  ;;  %v250_v9 = vld [vmem:[%s4020_s11 + $0x88] sm:$0xff] }
  0x60   : > { %v3406_v17 = vcombine.high %v250_v9, %v270_v10 }
  0x61   : > { %1438 = vmatpush1.bf16.msra.mxu0 %v1092_v24  ;;  %1481 = vmatpush1.bf16.msra.mxu1 %v1098_v28  ;;  %v3474_v24 = vcombine.high %v4075_v4, %v4075_v4  ;;  %v1119_v28 = vand.u32 %v3472_v22, %v4032_v15  ;;  %v310_v22 = vld [vmem:[%s4020_s11 + $0x268] sm:$0xff] }
  0x62   : > { %1519 = vmatprep.subr.bf16.mxu0 %v3388_v29  ;;  %1562 = vmatprep.subr.bf16.mxu1 %v3390_v31  ;;  %v245_v29 = vld [vmem:[%s4020_s11 + $0x60] sm:$0xff] }
  0x63   : > { %v1125_v4 = vand.u32 %v3474_v24, %v4032_v15  ;;  %v265_v31 = vld [vmem:[%s4020_s11 + $0x100] sm:$0xff]  ;;  %v3405_v24 = vcombine.low %v250_v9, %v270_v10  ;;  %v335_v9 = vld [vmem:[%s4292_s18 + $0x10] sm:$0xff]  ;;  %v4450_v10 = vstv %s4327_s3  ;;  %s2245_s3 = sadd.s32 6, %s4287_s15 }
  0x64   : > { %3497 = vmatmul.mubr.msk.bf16.vlgmr.msra.gmra.mrb[12].mxu0 %vm1048_vm1, %v4046_v32  ;;  %3498 = vmatmul.mubr.msk.bf16.vlgmr.msra.gmra.mrb[12].mxu1 %vm1048_vm1, %v4046_v32  ;;  %v3396_v43 = vcombine.high %v245_v29, %v265_v31  ;;  %v3395_v49 = vcombine.low %v245_v29, %v265_v31  ;;  %v291_v31 = vld [vmem:[%s4020_s11 + $0x1d0] sm:$0xff] }
  0x65   : > { %1520 = vmatpush1.bf16.msra.mxu0 %v3387_v46  ;;  %1563 = vmatpush1.bf16.msra.mxu1 %v3389_v47  ;;  %v305_v46 = vld [vmem:[%s4020_s11 + $0x240] sm:$0xff]  ;;  %v286_v47 = vld [vmem:[%s4020_s11 + $0x1a8] sm:$0xff] }
  0x66   : > { %1521 = vmatprep.subr.bf16.mxu0 %v3428_v48  ;;  %1564 = vmatprep.subr.bf16.mxu1 %v3430_v50  ;;  %v306_v48 = vld [vmem:[%s4020_s11 + $0x248] sm:$0xff]  ;;  %v3397_v50 = vcombine.low %v246_v33, %v266_v36  ;;  %v3436_v51 = vcombine.high %v285_v45, %v305_v46  ;;  %v311_v33 = vld [vmem:[%s4020_s11 + $0x270] sm:$0xff]  ;;  %v292_v36 = vld [vmem:[%s4020_s11 + $0x1d8] sm:$0xff] }
  0x67   : > { %1551 = vmatprep.mubr.bf16.mxu0 %v3923_v0  ;;  %1594 = vmatprep.mubr.bf16.mxu1 %v3923_v0  ;;  %v3438_v15 = vcombine.high %v286_v47, %v306_v48 }
  0x69   : > { %1522 = vmatpush1.bf16.msra.mxu0 %v3427_v52  ;;  %1565 = vmatpush1.bf16.msra.mxu1 %v3429_v54  ;;  %v3435_v52 = vcombine.low %v285_v45, %v305_v46  ;;  %v267_v54 = vld [vmem:[%s4020_s11 + $0x110] sm:$0xff]  ;;  %v3448_v45 = vcombine.high %v291_v31, %v311_v33 }
  0x6a   : > { %1523 = vmatprep.subr.bf16.mxu0 %v1107_v56  ;;  %1566 = vmatprep.subr.bf16.mxu1 %v1113_v61  ;;  %v248_v56 = vld [vmem:[%s4020_s11 + $0x78] sm:$0xff]  ;;  %v3400_v61 = vcombine.high %v247_v53, %v267_v54 }
  0x6b   : > { %v3402_v62 = vcombine.high %v248_v56, %v268_v57 }
  0x6d   : > { %1524 = vmatpush1.bf16.msra.mxu0 %v1104_v3  ;;  %1567 = vmatpush1.bf16.msra.mxu1 %v1110_v5  ;;  %v308_v3 = vld [vmem:[%s4020_s11 + $0x258] sm:$0xff]  ;;  %v3399_v5 = vcombine.low %v247_v53, %v267_v54  ;;  %v334_v54 = vld [vmem:[%s4292_s18 + $0x8] sm:$0xff] }
  0x6e   : > { %1605 = vmatprep.subr.bf16.mxu0 %v3392_v6  ;;  %1648 = vmatprep.subr.bf16.mxu1 %v3394_v7  ;;  %v3401_v6 = vcombine.low %v248_v56, %v268_v57  ;;  %v3440_v7 = vcombine.high %v287_v63, %v307_v1  ;;  %v4390_v56 = vstv %s4304_s9  ;;  %s4415_s9 = sld [smem:[#allocation3 + %s3046_s5]] }
  0x70   : > { %3499 = vmatmul.mubr.msk.bf16.vlgmr.msra.gmra.mrb[16].mxu0 %vm1048_vm1, %v4046_v32  ;;  %3500 = vmatmul.mubr.msk.bf16.vlgmr.msra.gmra.mrb[16].mxu1 %vm1048_vm1, %v4046_v32 }
  0x71   : > { %1606 = vmatpush1.bf16.msra.mxu0 %v3391_v18  ;;  %1649 = vmatpush1.bf16.msra.mxu1 %v3393_v19  ;;  %v289_v18 = vld [vmem:[%s4020_s11 + $0x1c0] sm:$0xff] }
  0x72   : > { %1607 = vmatprep.subr.bf16.mxu0 %v3432_v21  ;;  %1650 = vmatprep.subr.bf16.mxu1 %v3434_v23  ;;  %v309_v19 = vld [vmem:[%s4020_s11 + $0x260] sm:$0xff]  ;;  %v290_v21 = vld [vmem:[%s4020_s11 + $0x1c8] sm:$0xff] }
  0x73   : > { %1637 = vmatprep.mubr.bf16.mxu0 %v3923_v0  ;;  %1680 = vmatprep.mubr.bf16.mxu1 %v3923_v0 }
  0x75   : > { %1608 = vmatpush1.bf16.msra.mxu0 %v3431_v25  ;;  %1651 = vmatpush1.bf16.msra.mxu1 %v3433_v27  ;;  %v3444_v25 = vcombine.high %v289_v18, %v309_v19  ;;  %v252_v27 = vld [vmem:[%s4020_s11 + $0x98] sm:$0xff] }
  0x76   : > { %1609 = vmatprep.subr.bf16.mxu0 %v1119_v28  ;;  %1652 = vmatprep.subr.bf16.mxu1 %v1125_v4  ;;  %v272_v28 = vld [vmem:[%s4020_s11 + $0x138] sm:$0xff] }
  0x77   : > { %v3410_v29 = vcombine.high %v252_v27, %v272_v28 }
  0x79   : > { %1610 = vmatpush1.bf16.msra.mxu0 %v1116_v37  ;;  %1653 = vmatpush1.bf16.msra.mxu1 %v4085_v16  ;;  %v3437_v16 = vcombine.low %v286_v47, %v306_v48  ;;  %v312_v37 = vld [vmem:[%s4020_s11 + $0x278] sm:$0xff] }
  0x7a   : > { %1691 = vmatprep.subr.bf16.mxu0 %v3396_v43  ;;  %1734 = vmatprep.subr.bf16.mxu1 %v3398_v44  ;;  %v3409_v44 = vcombine.low %v252_v27, %v272_v28  ;;  %v3450_v46 = vcombine.high %v292_v36, %v312_v37 }
  0x7c   : > { %3501 = vmatmul.mubr.msk.bf16.vlgmr.msra.gmra.mrb[20].mxu0 %vm1048_vm1, %v4046_v32  ;;  %3502 = vmatmul.mubr.msk.bf16.vlgmr.msra.gmra.mrb[20].mxu1 %vm1048_vm1, %v4046_v32 }
  0x7d   : > { %1692 = vmatpush1.bf16.msra.mxu0 %v3395_v49  ;;  %1735 = vmatpush1.bf16.msra.mxu1 %v3397_v50 }
  0x7e   : > { %1693 = vmatprep.subr.bf16.mxu0 %v3436_v51  ;;  %1736 = vmatprep.subr.bf16.mxu1 %v3438_v15  ;;  %v4374_v15 = vstv %s4296_s25  ;;  %s2505_s25 = sadd.s32 13, %s4287_s15 }
  0x7f   : > { %1723 = vmatprep.mubr.bf16.mxu0 %v3923_v0  ;;  %1766 = vmatprep.mubr.bf16.mxu1 %v3923_v0  ;;  %s4445_s5 = sld [smem:[#allocation3 + %s2505_s25]] }
  0x81   : > { %1694 = vmatpush1.bf16.msra.mxu0 %v3435_v52  ;;  %1737 = vmatpush1.bf16.msra.mxu1 %v3437_v16  ;;  %v4377_v52 = vstv %s4301_s7  ;;  %s2787_s7 = sadd.s32 21, %s4287_s15 }
  0x82   : > { %1695 = vmatprep.subr.bf16.mxu0 %v4099_v34  ;;  %1738 = vmatprep.subr.bf16.mxu1 %v4110_v41  ;;  %v3442_v34 = vcombine.high %v288_v2, %v308_v3  ;;  %v3441_v41 = vcombine.low %v288_v2, %v308_v3 }
  0x85   : > { %1696 = vmatpush1.bf16.msra.mxu0 %v4102_v35  ;;  %1739 = vmatpush1.bf16.msra.mxu1 %v4113_v42  ;;  %v3439_v35 = vcombine.low %v287_v63, %v307_v1  ;;  %v249_v42 = vld [vmem:[%s4020_s11 + $0x80] sm:$0xff]  ;;  %v4404_v63 = vstv %s4309_s12  ;;  %v4407_v1 = vstv %s4311_s13  ;;  %s4430_s12 = sld [smem:[#allocation3 + %s2222_s17]]  ;;  %s3115_s17 = sadd.s32 31, %s4287_s15 }
  0x86   : > { %1777 = vmatprep.subr.bf16.mxu0 %v3400_v61  ;;  %1820 = vmatprep.subr.bf16.mxu1 %v3402_v62  ;;  %v3404_v14 = vcombine.high %v249_v42, %v269_v8  ;;  %v3403_v23 = vcombine.low %v249_v42, %v269_v8  ;;  %s4447_s13 = sld [smem:[#allocation3 + %s2787_s7]]  ;;  %s211_s7 = sand.u32 1, %s3904_s21  }
  0x88   : > { %3503 = vmatmul.mubr.msk.bf16.vlgmr.msra.gmra.mrb[24].mxu0 %vm1048_vm1, %v4046_v32  ;;  %3504 = vmatmul.mubr.msk.bf16.vlgmr.msra.gmra.mrb[24].mxu1 %vm1048_vm1, %v4046_v32 }
  0x89   : > { %1778 = vmatpush1.bf16.msra.mxu0 %v3399_v5  ;;  %1821 = vmatpush1.bf16.msra.mxu1 %v3401_v6  ;;  %v4419_v5 = vstv %s4314_s16  ;;  %v4422_v6 = vstv %s4319_s26 }
  0x8a   : > { %1779 = vmatprep.subr.bf16.mxu0 %v3440_v7  ;;  %1822 = vmatprep.subr.bf16.mxu1 %v3442_v34 }
  0x8b   : > { %1809 = vmatprep.mubr.bf16.mxu0 %v3923_v0  ;;  %1852 = vmatprep.mubr.bf16.mxu1 %v3923_v0 }
  0x8d   : > { %1780 = vmatpush1.bf16.msra.mxu0 %v3439_v35  ;;  %1823 = vmatpush1.bf16.msra.mxu1 %v3441_v41  ;;  %v4433_v35 = vstv %s4322_s30  ;;  %v4436_v41 = vstv %s4325_s8  ;;  %s2810_s30 = sadd.s32 22, %s4287_s15  ;;  %s3092_s8 = sadd.s32 30, %s4287_s15 }
  0x8e   : > { %1781 = vmatprep.subr.bf16.mxu0 %v4124_v58  ;;  %1824 = vmatprep.subr.bf16.mxu1 %v4127_v59  ;;  %v3446_v58 = vcombine.high %v290_v21, %v310_v22  ;;  %v3445_v59 = vcombine.low %v290_v21, %v310_v22  ;;  %v4470_v22 = vstv %s4332_s23  ;;  %s4587_s23 = sld [smem:[#allocation3 + %s2245_s3]] }
  0x8f   : > { %6282 = vst [vmem:[#allocation25_spill] sm:$0xff] %v4470_v22 }
  0x91   : > { %1782 = vmatpush1.bf16.msra.mxu0 %v4119_v55  ;;  %1825 = vmatpush1.bf16.msra.mxu1 %v4130_v60  ;;  %v3443_v55 = vcombine.low %v289_v18, %v309_v19  ;;  %v251_v60 = vld [vmem:[%s4020_s11 + $0x90] sm:$0xff]  ;;  %s4307_s11 = sld [smem:[#allocation3 + %s2964_s28]]  ;;  %s3000_s28 = sadd.s32 26, %s4287_s15 }
  0x92   : > { %1863 = vmatprep.subr.bf16.mxu0 %v3404_v14  ;;  %1906 = vmatprep.subr.bf16.mxu1 %v3406_v17  ;;  %v3408_v4 = vcombine.high %v251_v60, %v271_v26  ;;  %v3407_v43 = vcombine.low %v251_v60, %v271_v26  ;;  %s4329_s10 = sld [smem:[#allocation3 + %s3000_s28]]  ;;  %s2764_s28 = sadd.s32 20, %s4287_s15 }
  0x93   : > { %s4386_s14 = sld [smem:[#allocation3 + %s2764_s28]]  ;;  %s2116_s28 = sadd.s32 32, %s4287_s15 }
  0x94   : > { %3505 = vmatmul.mubr.msk.bf16.vlgmr.msra.gmra.mrb[28].mxu0 %vm1048_vm1, %v4046_v32  ;;  %3506 = vmatmul.mubr.msk.bf16.vlgmr.msra.gmra.mrb[28].mxu1 %vm1048_vm1, %v4046_v32 }
  0x95   : > { %1864 = vmatpush1.bf16.msra.mxu0 %v3403_v23  ;;  %1907 = vmatpush1.bf16.msra.mxu1 %v3405_v24  ;;  %v4473_v23 = vstv %s4346_s1  ;;  %v4476_v24 = vstv %s4353_s2  ;;  %s5570_s1 = sld [smem:[#allocation3 + %s3092_s8]]  ;;  %s2551_s2 = sadd.s32 15, %s4287_s15 }
  0x96   : > { %1865 = vmatprep.subr.bf16.mxu0 %v3444_v25  ;;  %1908 = vmatprep.subr.bf16.mxu1 %v3446_v58  ;;  %6283 = vst [vmem:[#allocation26_spill] sm:$0xff] %v4473_v23  ;;  %6284 = vst [vmem:[#allocation27_spill] sm:$0xff] %v4476_v24  ;;  %v4479_v25 = vstv %s4360_s0  ;;  %s2528_s0 = sadd.s32 14, %s4287_s15 }
  0x97   : > { %1895 = vmatprep.mubr.bf16.mxu0 %v3923_v0  ;;  %1938 = vmatprep.mubr.bf16.mxu1 %v3923_v0  ;;  %v4393_v57 = vstv %s4307_s11  ;;  %s3069_s11 = sadd.s32 29, %s4287_s15  ;;  %6285 = vst [vmem:[#allocation28_spill] sm:$0xff] %v4479_v25  ;;  %s4589_s26 = sld [smem:[#allocation3 + %s2528_s0]] }
  0x98   : > { %v4453_v14 = vstv %s4329_s10  ;;  %s4461_s16 = sld [smem:[#allocation3 + %s3069_s11]] }
  0x99   : > { %1866 = vmatpush1.bf16.msra.mxu0 %v3443_v55  ;;  %1909 = vmatpush1.bf16.msra.mxu1 %v3445_v59  ;;  %v336_v59 = vld [vmem:[%s4292_s18 + $0x18] sm:$0xff]  ;;  %s5568_s10 = sld [smem:[#allocation3 + %s2810_s30]] }
  0x9a   : > { %1867 = vmatprep.subr.bf16.mxu0 %v4139_v11  ;;  %1910 = vmatprep.subr.bf16.mxu1 %v4142_v12  ;;  %v3447_v11 = vcombine.low %v291_v31, %v311_v33  ;;  %v3449_v12 = vcombine.low %v292_v36, %v312_v37  ;;  %v4513_v37 = vstv %s4386_s14  ;;  %s5742_s14 = sld [smem:[#allocation3 + %s2551_s2]] }
  0x9b   : > { %6296 = vst [vmem:[#allocation39_spill] sm:$0xff] %v4513_v37 }
  0x9d   : > { %1868 = vmatpush1.bf16.msra.mxu0 %v4145_v13  ;;  %1911 = vmatpush1.bf16.msra.mxu1 %v4153_v20 }
  0x9e   : > { %1949 = vmatprep.subr.bf16.mxu0 %v3408_v4  ;;  %1992 = vmatprep.subr.bf16.mxu1 %v3410_v29  ;;  %v4501_v4 = vstv %s4362_s27  ;;  %v4504_v29 = vstv %s4370_s6  ;;  %s2833_s27 = sadd.s32 23, %s4287_s15  ;;  %s5728_s6 = sld [smem:[#allocation3 + %s2268_s19]] }
  0x9f   : > { %6292 = vst [vmem:[#allocation35_spill] sm:$0xff] %v4501_v4  ;;  %6293 = vst [vmem:[#allocation36_spill] sm:$0xff] %v4504_v29  ;;  %s5751_s25 = sld [smem:[#allocation3 + %s2833_s27]] }
  0xa0   : > { %3507 = vmatmul.mubr.msk.bf16.vlgmr.msra.gmra.mrb[32].mxu0 %vm1048_vm1, %v4046_v32  ;;  %3508 = vmatmul.mubr.msk.bf16.vlgmr.msra.gmra.mrb[32].mxu1 %vm1048_vm1, %v4046_v32  ;;  %s3116_s15 = sld [smem:[#allocation3 + %s3115_s17]] }
  0xa1   : > { %1950 = vmatpush1.bf16.msra.mxu0 %v3407_v43  ;;  %1993 = vmatpush1.bf16.msra.mxu1 %v3409_v44  ;;  %v4516_v43 = vstv %s4415_s9  ;;  %s6037_s9 = smul.u32 160, %s211_s7 }
  0xa2   : > { %1951 = vmatprep.subr.bf16.mxu0 %v3448_v45  ;;  %1994 = vmatprep.subr.bf16.mxu1 %v3450_v46  ;;  %6297 = vst [vmem:[#allocation40_spill] sm:$0xff] %v4516_v43 }
  0xa3   : > { %1981 = vmatprep.mubr.bf16.mxu0 %v3923_v0  ;;  %2024 = vmatprep.mubr.bf16.mxu1 %v3923_v0  ;;  %v343_v0 = vlaneseq  ;;  %s6062_s11 = scalar_lea.vmem [#allocation4], %s6037_s9 }
  0xa5   : > { %1952 = vmatpush1.bf16.msra.mxu0 %v3447_v11  ;;  %1995 = vmatpush1.bf16.msra.mxu1 %v3449_v12 }
  0xa6   : > { %1953 = vmatprep.subr.bf16.mxu0 %v4167_v38  ;;  %1996 = vmatprep.subr.bf16.mxu1 %v4170_v39 }
  0xa9   : > { %1954 = vmatpush1.bf16.msra.mxu0 %v4161_v30  ;;  %1997 = vmatpush1.bf16.msra.mxu1 %v4173_v40  ;;  %v333_v30 = vld [vmem:[%s4292_s18] sm:$0xff] }
  0xac   : > { %3509 = vmatmul.mubr.msk.bf16.vlgmr.msra.gmra.mrb[36].mxu0 %vm1048_vm1, %v4046_v32  ;;  %3510 = vmatmul.mubr.msk.bf16.vlgmr.msra.gmra.mrb[36].mxu1 %vm1048_vm1, %v4046_v32  ;;  %v344_v32 = vshrl.u32 %v343_v0, 7  ;;  %v4526_v0 = vstv %s4430_s12  ;;  %s3566_s12 = smul.u32 2560, %s3912_s22  ;;  %s6160_s22 = scalar_lea.sflag [#allocation5], %s211_s7 }
  0xad   : > { %6300 = vst [vmem:[#allocation43_spill] sm:$0xff] %v4526_v0 }
  0xae   : > { %v4335_v13 = vsub.s32 0, %v344_v32  ;;  %v4337_v20 = vsub.s32 2, %v344_v32  ;;  %v4342_v38 = vsub.s32 1, %v344_v32  ;;  %v4344_v39 = vsub.s32 3, %v344_v32  ;;  %s6151_s3 = scalar_lea.hbm %s6210_s4, %s3566_s12 }
  0xaf   : > { %v4349_v40 = vsub.s32 4, %v344_v32  ;;  %v4351_v47 = vsub.s32 6, %v344_v32  ;;  %v4356_v48 = vsub.s32 5, %v344_v32  ;;  %v4358_v49 = vsub.s32 7, %v344_v32 }
  0xb0   : > { %6270 = vst [vmem:[#allocation13_spill] sm:$0xff] %v4335_v13  ;;  %6271 = vst [vmem:[#allocation14_spill] sm:$0xff] %v4337_v20  ;;  %v4365_v50 = vrot.slane %v333_v30, %v4335_v13  ;;  %v4368_v51 = vrot.slane %v333_v30, %v4337_v20  ;;  %v4380_v16 = vrot.slane %v333_v30, %v4342_v38 }
  0xb1   : > { %6272 = vst [vmem:[#allocation15_spill] sm:$0xff] %v4342_v38  ;;  %6273 = vst [vmem:[#allocation16_spill] sm:$0xff] %v4344_v39  ;;  %v4383_v53 = vrot.slane %v333_v30, %v4344_v39  ;;  %v4396_v61 = vrot.slane %v333_v30, %v4349_v40  ;;  %v4399_v62 = vrot.slane %v333_v30, %v4351_v47 }
  0xb2   : > { %6274 = vst [vmem:[#allocation17_spill] sm:$0xff] %v4349_v40  ;;  %6275 = vst [vmem:[#allocation18_spill] sm:$0xff] %v4351_v47  ;;  %v4410_v2 = vrot.slane %v333_v30, %v4356_v48  ;;  %v4413_v3 = vrot.slane %v333_v30, %v4358_v49  ;;  %v4425_v7 = vrot.slane %v334_v54, %v4335_v13 }
  0xb3   : > { %6276 = vst [vmem:[#allocation19_spill] sm:$0xff] %v4356_v48  ;;  %6277 = vst [vmem:[#allocation20_spill] sm:$0xff] %v4358_v49  ;;  %v4428_v34 = vrot.slane %v334_v54, %v4337_v20  ;;  %v4439_v42 = vrot.slane %v334_v54, %v4342_v38  ;;  %v4442_v8 = vrot.slane %v334_v54, %v4344_v39 }
  0xb4   : > { %v4456_v17 = vrot.slane %v334_v54, %v4349_v40  ;;  %v4459_v18 = vrot.slane %v334_v54, %v4351_v47  ;;  %v4464_v19 = vrot.slane %v334_v54, %v4356_v48  ;;  %v4467_v21 = vrot.slane %v334_v54, %v4358_v49 }
  0xb5   : > { %v4482_v58 = vrot.slane %v335_v9, %v4335_v13  ;;  %v4485_v55 = vrot.slane %v335_v9, %v4337_v20  ;;  %v4489_v60 = vrot.slane %v335_v9, %v4342_v38  ;;  %v4492_v26 = vrot.slane %v335_v9, %v4344_v39 }
  0xb6   : > { %6278 = vst [vmem:[#allocation21_spill] sm:$0xff] %v4456_v17  ;;  %6279 = vst [vmem:[#allocation22_spill] sm:$0xff] %v4459_v18  ;;  %v4495_v27 = vrot.slane %v335_v9, %v4349_v40  ;;  %v4498_v28 = vrot.slane %v335_v9, %v4351_v47  ;;  %v4507_v31 = vrot.slane %v335_v9, %v4356_v48  ;;  %v4655_v17 = vstv %s4587_s23  ;;  %s3924_s23 = smov [#allocation4]  }
  0xb7   : > { %6280 = vst [vmem:[#allocation23_spill] sm:$0xff] %v4464_v19  ;;  %6281 = vst [vmem:[#allocation24_spill] sm:$0xff] %v4467_v21  ;;  %v4510_v33 = vrot.slane %v335_v9, %v4358_v49  ;;  %v4519_v44 = vrot.slane %v336_v59, %v4335_v13  ;;  %v4522_v45 = vrot.slane %v336_v59, %v4337_v20  ;;  %v4540_v49 = vstv %s4447_s13 }
  0xb8   : > { %6286 = vst [vmem:[#allocation29_spill] sm:$0xff] %v4482_v58  ;;  %6287 = vst [vmem:[#allocation30_spill] sm:$0xff] %v4485_v55  ;;  %v4529_v32 = vrot.slane %v336_v59, %v4342_v38  ;;  %v4532_v30 = vrot.slane %v336_v59, %v4344_v39 }
  0xb9   : > { %6288 = vst [vmem:[#allocation31_spill] sm:$0xff] %v4489_v60  ;;  %6289 = vst [vmem:[#allocation32_spill] sm:$0xff] %v4492_v26 }
  0xba   : > { %6290 = vst [vmem:[#allocation33_spill] sm:$0xff] %v4495_v27  ;;  %6291 = vst [vmem:[#allocation34_spill] sm:$0xff] %v4498_v28  ;;  %v4599_v28 = vrot.slane %v336_v59, %v4356_v48 }
  0xbb   : > { %6294 = vst [vmem:[#allocation37_spill] sm:$0xff] %v4507_v31  ;;  %6295 = vst [vmem:[#allocation38_spill] sm:$0xff] %v4510_v33  ;;  %v4593_v33 = vrot.slane %v336_v59, %v4349_v40  ;;  %v4596_v31 = vrot.slane %v336_v59, %v4351_v47 }
  0xbc   : > { %6298 = vst [vmem:[#allocation41_spill] sm:$0xff] %v4519_v44  ;;  %6299 = vst [vmem:[#allocation42_spill] sm:$0xff] %v4522_v45 }
  0xbd   : > { %6301 = vst [vmem:[#allocation44_spill] sm:$0xff] %v4529_v32  ;;  %6302 = vst [vmem:[#allocation45_spill] sm:$0xff] %v4532_v30  ;;  %v4545_v30 = vstv %s4461_s16 }
  0xbe   : > { %6304 = vst [vmem:[#allocation47_spill] sm:$0xff] %v4540_v49  ;;  %6305 = vst [vmem:[#allocation48_spill] sm:$0xff] %v4545_v30 }
  0xbf   : > { %6306 = vst [vmem:[#allocation49_spill] sm:$0xff] %v4593_v33  ;;  %6307 = vst [vmem:[#allocation50_spill] sm:$0xff] %v4596_v31 }
  0xc0   : > { %6308 = vst [vmem:[#allocation51_spill] sm:$0xff] %v4599_v28  ;;  %6312 = vst [vmem:[#allocation55_spill] sm:$0xff] %v4655_v17 }
 0x113   : > { %v1209_v36 = vpop.f32.mrb[0].mxu0  ;;  %v1252_v11 = vpop.f32.mrb[0].mxu1 }
 0x114   : > { %v1210_v46 = vadd.f32 %v1209_v36, %v4365_v50  ;;  %v1211_v12 = vpop.f32.mrb[1].mxu0  ;;  %v1253_v54 = vadd.f32 %v1252_v11, %v4368_v51  ;;  %v1254_v20 = vpop.f32.mrb[1].mxu1  ;;  %v4537_v36 = vstv %s4445_s5  ;;  %s3263_s5 = sshll.u32 %s6062_s11, 4  ;;  %s6153_s5 = int_to_ptr.vmem [resolvable:$true] %s3263_s5 }
 0x115   : > { %v1212_v9 = vadd.f32 %v1211_v12, %v4380_v16  ;;  %v1213_v13 = vpop.f32.mrb[2].mxu0  ;;  %6303 = vst [vmem:[#allocation46_spill] sm:$0xff] %v4537_v36  ;;  %v1255_v0 = vadd.f32 %v1254_v20, %v4383_v53  ;;  %v1256_v32 = vpop.f32.mrb[2].mxu1  ;;  %s3840_s0 = scalar_lea.vmem %s6153_s5, 2560 }
 0x116   : > { %v2035_v45 = vmax.f32 %v1210_v46, 0.0  ;;  %v1214_v38 = vadd.f32 %v1213_v13, %v4365_v50  ;;  %v1215_v39 = vpop.f32.mrb[3].mxu0  ;;  %v2037_v11 = vmax.f32 %v1253_v54, 0.0  ;;  %v1257_v12 = vadd.f32 %v1256_v32, %v4368_v51  ;;  %v1258_v37 = vpop.f32.mrb[3].mxu1  ;;  %p3841_p3 = scmp.ne.s32.totalorder %s6153_s5, %s3840_s0 }
 0x117   : > { %v2036_v44 = vmax.f32 %v1212_v9, 0.0  ;;  %v1216_v43 = vadd.f32 %v1215_v39, %v4380_v16  ;;  %v2038_v30 = vmax.f32 %v1255_v0, 0.0  ;;  %v1259_v4 = vadd.f32 %v1258_v37, %v4383_v53 }
 0x118   : > { %v4552_v49 = vmul.f32 %v4374_v15, %v2035_v45  ;;  %v4555_v20 = vmul.f32 %v4377_v52, %v2035_v45  ;;  %v4558_v13 = vmul.f32 %v4390_v56, %v2035_v45  ;;  %v4561_v50 = vmul.f32 %v4393_v57, %v2035_v45  ;;  %p3842_p4 = pnand %p3841_p3, %p3995_p9 }
 0x119   : > { %v4564_v46 = vmul.f32 %v4374_v15, %v2037_v11  ;;  %v4567_v39 = vmul.f32 %v4377_v52, %v2037_v11  ;;  %v4570_v51 = vmul.f32 %v4390_v56, %v2037_v11  ;;  %v4573_v16 = vmul.f32 %v4393_v57, %v2037_v11 }
 0x11a   : > { %v4576_v32 = vmul.f32 %v4374_v15, %v2036_v44  ;;  %v4579_v54 = vmul.f32 %v4377_v52, %v2036_v44  ;;  %v4582_v45 = vmul.f32 %v4390_v56, %v2036_v44  ;;  %v4585_v9 = vmul.f32 %v4393_v57, %v2036_v44  ;;  %p3843_p5 = pneg %p3842_p4 }
 0x11b   : > { %v2075_v36 = vmax.f32 %v1214_v38, 0.0  ;;  %v2077_v11 = vmax.f32 %v1257_v12, 0.0  ;;  %v2076_v29 = vmax.f32 %v1216_v43, 0.0  ;;  %v4602_v44 = vmul.f32 %v4374_v15, %v2038_v30 }
 0x11c   : > { %v4605_v27 = vmul.f32 %v4377_v52, %v2038_v30  ;;  %v4608_v38 = vmul.f32 %v4390_v56, %v2038_v30  ;;  %v4611_v53 = vmul.f32 %v4393_v57, %v2038_v30  ;;  %v2078_v55 = vmax.f32 %v1259_v4, 0.0 }
 0x11d   : > { %v4614_v37 = vmul.f32 %v4374_v15, %v2075_v36  ;;  %v4617_v43 = vmul.f32 %v4377_v52, %v2075_v36  ;;  %v4620_v59 = vmul.f32 %v4390_v56, %v2075_v36  ;;  %v4623_v0 = vmul.f32 %v4393_v57, %v2075_v36 }
 0x11e   : > { %6309 = vst [vmem:[#allocation52_spill] sm:$0xff] %v4605_v27  ;;  %6310 = vst [vmem:[#allocation53_spill] sm:$0xff] %v4608_v38  ;;  %v4626_v12 = vmul.f32 %v4374_v15, %v2077_v11  ;;  %v4629_v48 = vmul.f32 %v4377_v52, %v2077_v11  ;;  %v4632_v30 = vmul.f32 %v4390_v56, %v2077_v11 }
 0x11f   : > { %6311 = vst [vmem:[#allocation54_spill] sm:$0xff] %v4611_v53  ;;  %v4635_v47 = vmul.f32 %v4393_v57, %v2077_v11  ;;  %v1295_v40 = vpop.f32.mrb[4].mxu0  ;;  %v4638_v28 = vmul.f32 %v4374_v15, %v2076_v29  ;;  %v4641_v36 = vmul.f32 %v4377_v52, %v2076_v29  ;;  %v4644_v31 = vmul.f32 %v4390_v56, %v2076_v29  ;;  %v1338_v26 = vpop.f32.mrb[4].mxu1 }
 0x120   : > { %v4647_v33 = vmul.f32 %v4393_v57, %v2076_v29  ;;  %v1297_v60 = vpop.f32.mrb[5].mxu0  ;;  %v1296_v11 = vadd.f32 %v1295_v40, %v4396_v61  ;;  %v1339_v25 = vadd.f32 %v1338_v26, %v4399_v62  ;;  %v1340_v23 = vpop.f32.mrb[5].mxu1  ;;  %v4658_v29 = vstv %s4589_s26  ;;  %s3844_s26 = sshll.u32 %s3924_s23, 4  ;;  %s3845_s26 = int_to_ptr.vmem [resolvable:$false] %s3844_s26 }
 0x121   : > { %v1298_v24 = vadd.f32 %v1297_v60, %v4410_v2  ;;  %v1299_v22 = vpop.f32.mrb[6].mxu0  ;;  %v1341_v58 = vadd.f32 %v1340_v23, %v4413_v3  ;;  %v1342_v19 = vpop.f32.mrb[6].mxu1  ;;  %6313 = vst [vmem:[#allocation56_spill] sm:$0xff] %v4658_v29  ;;  %v4661_v4 = vmul.f32 %v4374_v15, %v2078_v55  ;;  %v4664_v40 = vmul.f32 %v4377_v52, %v2078_v55  ;;  %s3846_s30 = scalar_lea.vmem %s3845_s26, 5120  ;;  %p3847_p6 = scmp.lt.s32.totalorder %s6153_s5, %s3845_s26 }
 0x122   : > { %v1300_v21 = vadd.f32 %v1299_v22, %v4396_v61  ;;  %v1301_v18 = vpop.f32.mrb[7].mxu0  ;;  %v4667_v60 = vmul.f32 %v4390_v56, %v2078_v55  ;;  %v4670_v26 = vmul.f32 %v4393_v57, %v2078_v55  ;;  %v1344_v23 = vpop.f32.mrb[7].mxu1  ;;  %v2039_v61 = vmax.f32 %v1296_v11, 0.0  ;;  %p3848_p7 = scmp.lt.s32.totalorder %s3846_s30, %s3840_s0 }
 0x123   : > { %6314 = vst [vmem:[#allocation57_spill] sm:$0xff] %v4661_v4  ;;  %6315 = vst [vmem:[#allocation58_spill] sm:$0xff] %v4664_v40  ;;  %v2041_v22 = vmax.f32 %v1339_v25, 0.0  ;;  %v2040_v53 = vmax.f32 %v1298_v24, 0.0  ;;  %v2042_v38 = vmax.f32 %v1341_v58, 0.0  ;;  %v1343_v29 = vadd.f32 %v1342_v19, %v4399_v62 }
 0x124   : > { %6316 = vst [vmem:[#allocation59_spill] sm:$0xff] %v4667_v60  ;;  %6317 = vst [vmem:[#allocation60_spill] sm:$0xff] %v4670_v26  ;;  %v2079_v17 = vmax.f32 %v1300_v21, 0.0  ;;  %v1302_v27 = vadd.f32 %v1301_v18, %v4410_v2  ;;  %v1345_v4 = vadd.f32 %v1344_v23, %v4413_v3  ;;  %v4676_v40 = vmul.f32 %v4374_v15, %v2039_v61  ;;  %p3849_p8 = por %p3848_p7, %p3847_p6 }
 0x125   : > { %v4679_v60 = vmul.f32 %v4377_v52, %v2039_v61  ;;  %v4682_v55 = vmul.f32 %v4390_v56, %v2039_v61  ;;  %v4685_v25 = vmul.f32 %v4393_v57, %v2039_v61  ;;  %v2134_v21 = vmul.f32 %v4404_v63, %v2041_v22 }
 0x126   : > { %v2417_v62 = vmul.f32 %v4407_v1, %v2041_v22  ;;  %v2699_v2 = vmul.f32 %v4419_v5, %v2041_v22  ;;  %v2981_v3 = vmul.f32 %v4422_v6, %v2041_v22  ;;  %v2133_v18 = vmul.f32 %v4404_v63, %v2040_v53  ;;  %p3850_p10 = pnand %p3849_p8, %p3843_p5 }
 0x127   : > { %6318 = vst [vmem:[#allocation61_spill] sm:$0xff] %v4685_v25  ;;  %v2416_v19 = vmul.f32 %v4407_v1, %v2040_v53  ;;  %v2698_v24 = vmul.f32 %v4419_v5, %v2040_v53  ;;  %v2980_v58 = vmul.f32 %v4422_v6, %v2040_v53  ;;  %v4696_v11 = vadd.f32 %v2134_v21, %v4576_v32 }
 0x128   : > { %v4699_v23 = vadd.f32 %v2417_v62, %v4579_v54  ;;  %v4702_v61 = vadd.f32 %v2699_v2, %v4582_v45  ;;  %v4705_v26 = vadd.f32 %v2981_v3, %v4585_v9  ;;  %v4708_v22 = vadd.f32 %v2133_v18, %v4552_v49 }
 0x129   : > { %v4711_v25 = vadd.f32 %v2416_v19, %v4555_v20  ;;  %v4714_v53 = vadd.f32 %v2698_v24, %v4558_v13  ;;  %v4717_v32 = vadd.f32 %v2980_v58, %v4561_v50  ;;  %v2135_v54 = vmul.f32 %v4404_v63, %v2042_v38 }
 0x12a   : > { %v2418_v45 = vmul.f32 %v4407_v1, %v2042_v38  ;;  %v2700_v21 = vmul.f32 %v4419_v5, %v2042_v38  ;;  %v2982_v9 = vmul.f32 %v4422_v6, %v2042_v38  ;;  %v4724_v49 = vmul.f32 %v4374_v15, %v2079_v17 }
 0x12b   : > { %v1381_v62 = vpop.f32.mrb[8].mxu0  ;;  %v4727_v20 = vmul.f32 %v4377_v52, %v2079_v17  ;;  %v4730_v13 = vmul.f32 %v4390_v56, %v2079_v17  ;;  %v4733_v50 = vmul.f32 %v4393_v57, %v2079_v17  ;;  %v1424_v2 = vpop.f32.mrb[8].mxu1  ;;  %v4736_v18 = vadd.f32 %v2135_v54, %v4564_v46 }
 0x12c   : > { %v1383_v3 = vpop.f32.mrb[9].mxu0  ;;  %v4739_v38 = vadd.f32 %v2418_v45, %v4567_v39  ;;  %v4742_v15 = vadd.f32 %v2700_v21, %v4570_v51  ;;  %v4745_v52 = vadd.f32 %v2982_v9, %v4573_v16  ;;  %v1426_v19 = vpop.f32.mrb[9].mxu1  ;;  %v2081_v24 = vmax.f32 %v1343_v29, 0.0 }
 0x12d   : > { %6319 = vst [vmem:[#allocation62_spill] sm:$0xff] %v4733_v50  ;;  %v1385_v56 = vpop.f32.mrb[10].mxu0  ;;  %v2080_v58 = vmax.f32 %v1302_v27, 0.0  ;;  %v2082_v57 = vmax.f32 %v1345_v4, 0.0  ;;  %v1382_v17 = vadd.f32 %v1381_v62, %v4425_v7  ;;  %v4748_v50 = vpop.f32.mrb[10].mxu1  ;;  %v1425_v39 = vadd.f32 %v1424_v2, %v4428_v34 }
 0x12e   : > { %6320 = vst [vmem:[#allocation63_spill] sm:$0xff] %v4742_v15  ;;  %6321 = vst [vmem:[#allocation64_spill] sm:$0xff] %v4745_v52  ;;  %v4750_v46 = vpop.f32.mrb[11].mxu0  ;;  %v1384_v54 = vadd.f32 %v1383_v3, %v4439_v42  ;;  %v1427_v51 = vadd.f32 %v1426_v19, %v4442_v8  ;;  %v4756_v16 = vadd.f32 %v1385_v56, %v4425_v7  ;;  %v4758_v45 = vpop.f32.mrb[11].mxu1 }
 0x12f   : > { %v2139_v27 = vmul.f32 %v4404_v63, %v2081_v24  ;;  %v2422_v29 = vmul.f32 %v4407_v1, %v2081_v24  ;;  %v2704_v4 = vmul.f32 %v4419_v5, %v2081_v24  ;;  %v2986_v21 = vmul.f32 %v4422_v6, %v2081_v24 }
 0x130   : > { %v2138_v9 = vmul.f32 %v4404_v63, %v2080_v58  ;;  %v2421_v62 = vmul.f32 %v4407_v1, %v2080_v58  ;;  %v2703_v2 = vmul.f32 %v4419_v5, %v2080_v58  ;;  %v2985_v3 = vmul.f32 %v4422_v6, %v2080_v58 }
 0x131   : > { %v4769_v7 = vadd.f32 %v2139_v27, %v4638_v28  ;;  %v4772_v19 = vadd.f32 %v2422_v29, %v4641_v36  ;;  %v4775_v56 = vadd.f32 %v2704_v4, %v4644_v31  ;;  %v4778_v52 = vadd.f32 %v2986_v21, %v4647_v33 }
 0x132   : > { %v4781_v24 = vadd.f32 %v2138_v9, %v4614_v37  ;;  %v4784_v15 = vadd.f32 %v2421_v62, %v4617_v43  ;;  %v4787_v58 = vadd.f32 %v2703_v2, %v4620_v59  ;;  %v4790_v28 = vadd.f32 %v2985_v3, %v4623_v0 }
 0x133   : > { %v2140_v36 = vmul.f32 %v4404_v63, %v2082_v57  ;;  %v2423_v31 = vmul.f32 %v4407_v1, %v2082_v57  ;;  %v2705_v27 = vmul.f32 %v4419_v5, %v2082_v57  ;;  %v2987_v33 = vmul.f32 %v4422_v6, %v2082_v57 }
 0x134   : > { %v2043_v29 = vmax.f32 %v1382_v17, 0.0  ;;  %v2045_v37 = vmax.f32 %v1425_v39, 0.0  ;;  %v2044_v4 = vmax.f32 %v1384_v54, 0.0  ;;  %v2046_v21 = vmax.f32 %v1427_v51, 0.0 }
 0x135   : > { %v4797_v43 = vadd.f32 %v2140_v36, %v4626_v12  ;;  %v4800_v59 = vadd.f32 %v2423_v31, %v4629_v48  ;;  %v4803_v0 = vadd.f32 %v2705_v27, %v4632_v30  ;;  %v4806_v9 = vadd.f32 %v2987_v33, %v4635_v47  ;;  %v6326_v36 = vld [vmem:[#allocation52_spill] sm:$0xff]  ;;  %v6327_v27 = vld [vmem:[#allocation53_spill] sm:$0xff] }
 0x136   : > { %v2136_v62 = vmul.f32 %v4404_v63, %v2043_v29  ;;  %v2419_v57 = vmul.f32 %v4407_v1, %v2043_v29  ;;  %v2701_v17 = vmul.f32 %v4419_v5, %v2043_v29  ;;  %v2983_v39 = vmul.f32 %v4422_v6, %v2043_v29  ;;  %v6328_v29 = vld [vmem:[#allocation54_spill] sm:$0xff] }
 0x137   : > { %6322 = vst [vmem:[#allocation65_spill] sm:$0xff] %v4797_v43  ;;  %6323 = vst [vmem:[#allocation66_spill] sm:$0xff] %v4800_v59  ;;  %v1467_v54 = vpop.f32.mrb[12].mxu0  ;;  %v2156_v12 = vmul.f32 %v4433_v35, %v2045_v37  ;;  %v2439_v48 = vmul.f32 %v4436_v41, %v2045_v37  ;;  %v2721_v51 = vmul.f32 %v4450_v10, %v2045_v37  ;;  %v1510_v2 = vpop.f32.mrb[12].mxu1 }
 0x138   : > { %6324 = vst [vmem:[#allocation67_spill] sm:$0xff] %v4803_v0  ;;  %6325 = vst [vmem:[#allocation68_spill] sm:$0xff] %v4806_v9  ;;  %v3003_v30 = vmul.f32 %v4453_v14, %v2045_v37  ;;  %v1469_v47 = vpop.f32.mrb[13].mxu0  ;;  %v4817_v3 = vadd.f32 %v2136_v62, %v4602_v44  ;;  %v4820_v31 = vadd.f32 %v2419_v57, %v6326_v36  ;;  %v1512_v0 = vpop.f32.mrb[13].mxu1 }
 0x139   : > { %v4823_v33 = vadd.f32 %v2701_v17, %v6327_v27  ;;  %v4826_v9 = vadd.f32 %v2983_v39, %v6328_v29  ;;  %v4828_v59 = vpop.f32.mrb[14].mxu0  ;;  %v4831_v43 = vadd.f32 %v2156_v12, %v4708_v22  ;;  %v4834_v37 = vadd.f32 %v2439_v48, %v4711_v25  ;;  %v4842_v57 = vpop.f32.mrb[14].mxu1 }
 0x13a   : > { %v4837_v44 = vadd.f32 %v2721_v51, %v4714_v53  ;;  %v4840_v62 = vadd.f32 %v3003_v30, %v4717_v32  ;;  %v4844_v17 = vpop.f32.mrb[15].mxu0  ;;  %v2137_v39 = vmul.f32 %v4404_v63, %v2044_v4  ;;  %v2420_v36 = vmul.f32 %v4407_v1, %v2044_v4  ;;  %v4850_v25 = vpop.f32.mrb[15].mxu1 }
 0x13b   : > { %6329 = vst [vmem:[#allocation52_spill] sm:$0xff] %v4834_v37  ;;  %v2702_v22 = vmul.f32 %v4419_v5, %v2044_v4  ;;  %v2984_v12 = vmul.f32 %v4422_v6, %v2044_v4  ;;  %v2157_v53 = vmul.f32 %v4433_v35, %v2046_v21  ;;  %v2440_v48 = vmul.f32 %v4436_v41, %v2046_v21  ;;  %v6332_v4 = vld [vmem:[#allocation61_spill] sm:$0xff] }
 0x13c   : > { %6330 = vst [vmem:[#allocation53_spill] sm:$0xff] %v4837_v44  ;;  %6331 = vst [vmem:[#allocation54_spill] sm:$0xff] %v4840_v62  ;;  %v2722_v32 = vmul.f32 %v4450_v10, %v2046_v21  ;;  %v3004_v51 = vmul.f32 %v4453_v14, %v2046_v21  ;;  %v4857_v30 = vadd.f32 %v2137_v39, %v4676_v40 }
 0x13d   : > { %v4860_v27 = vadd.f32 %v2420_v36, %v4679_v60  ;;  %v4863_v29 = vadd.f32 %v2702_v22, %v4682_v55  ;;  %v4866_v62 = vadd.f32 %v2984_v12, %v6332_v4  ;;  %v4869_v44 = vadd.f32 %v2157_v53, %v4696_v11  ;;  %v6337_v36 = vld [vmem:[#allocation21_spill] sm:$0xff]  ;;  %v6338_v22 = vld [vmem:[#allocation22_spill] sm:$0xff] }
 0x13e   : > { %v4872_v37 = vadd.f32 %v2440_v48, %v4699_v23  ;;  %v4875_v21 = vadd.f32 %v2722_v32, %v4702_v61  ;;  %v4878_v40 = vadd.f32 %v3004_v51, %v4705_v26  ;;  %v2083_v60 = vmax.f32 %v4756_v16, 0.0  ;;  %v6339_v61 = vld [vmem:[#allocation23_spill] sm:$0xff]  ;;  %v6340_v48 = vld [vmem:[#allocation24_spill] sm:$0xff] }
 0x13f   : > { %6333 = vst [vmem:[#allocation61_spill] sm:$0xff] %v4869_v44  ;;  %v1429_v55 = vadd.f32 %v4748_v50, %v4428_v34  ;;  %v1388_v39 = vadd.f32 %v4750_v46, %v4439_v42  ;;  %v1431_v11 = vadd.f32 %v4758_v45, %v4442_v8  ;;  %v1468_v23 = vadd.f32 %v1467_v54, %v6337_v36  ;;  %v6341_v45 = vld [vmem:[#allocation57_spill] sm:$0xff] }
 0x140   : > { %6334 = vst [vmem:[#allocation69_spill] sm:$0xff] %v4872_v37  ;;  %6335 = vst [vmem:[#allocation70_spill] sm:$0xff] %v4875_v21  ;;  %v1511_v12 = vadd.f32 %v1510_v2, %v6338_v22  ;;  %v1470_v53 = vadd.f32 %v1469_v47, %v6339_v61  ;;  %v1513_v26 = vadd.f32 %v1512_v0, %v6340_v48  ;;  %v6342_v2 = vld [vmem:[#allocation58_spill] sm:$0xff]  ;;  %v6343_v47 = vld [vmem:[#allocation59_spill] sm:$0xff] }
 0x141   : > { %6336 = vst [vmem:[#allocation71_spill] sm:$0xff] %v4878_v40  ;;  %v2141_v32 = vmul.f32 %v4404_v63, %v2083_v60  ;;  %v2424_v16 = vmul.f32 %v4407_v1, %v2083_v60  ;;  %v2706_v34 = vmul.f32 %v4419_v5, %v2083_v60  ;;  %v2988_v50 = vmul.f32 %v4422_v6, %v2083_v60  ;;  %v6344_v40 = vld [vmem:[#allocation60_spill] sm:$0xff] }
 0x142   : > { %v2085_v42 = vmax.f32 %v1429_v55, 0.0  ;;  %v2084_v46 = vmax.f32 %v1388_v39, 0.0  ;;  %v2086_v51 = vmax.f32 %v1431_v11, 0.0  ;;  %v2047_v8 = vmax.f32 %v1468_v23, 0.0 }
 0x143   : > { %v4896_v54 = vadd.f32 %v2141_v32, %v6341_v45  ;;  %v4899_v4 = vadd.f32 %v2424_v16, %v6342_v2  ;;  %v4902_v0 = vadd.f32 %v2706_v34, %v6343_v47  ;;  %v4905_v21 = vadd.f32 %v2988_v50, %v6344_v40  ;;  %v1553_v37 = vpop.f32.mrb[16].mxu0  ;;  %v4911_v11 = vpop.f32.mrb[16].mxu1 }
 0x144   : > { %v2161_v44 = vmul.f32 %v4433_v35, %v2085_v42  ;;  %v2444_v60 = vmul.f32 %v4436_v41, %v2085_v42  ;;  %v2726_v55 = vmul.f32 %v4450_v10, %v2085_v42  ;;  %v3008_v39 = vmul.f32 %v4453_v14, %v2085_v42  ;;  %v4913_v23 = vpop.f32.mrb[17].mxu0  ;;  %v4919_v50 = vpop.f32.mrb[17].mxu1 }
 0x145   : > { %v2142_v32 = vmul.f32 %v4404_v63, %v2084_v46  ;;  %v2425_v16 = vmul.f32 %v4407_v1, %v2084_v46  ;;  %v2707_v40 = vmul.f32 %v4419_v5, %v2084_v46  ;;  %v2989_v34 = vmul.f32 %v4422_v6, %v2084_v46  ;;  %v4921_v45 = vpop.f32.mrb[18].mxu0  ;;  %v4935_v1 = vpop.f32.mrb[18].mxu1 }
 0x146   : > { %v4924_v2 = vadd.f32 %v2161_v44, %v4781_v24  ;;  %v4927_v42 = vadd.f32 %v2444_v60, %v4784_v15  ;;  %v4930_v47 = vadd.f32 %v2726_v55, %v4787_v58  ;;  %v4933_v63 = vadd.f32 %v3008_v39, %v4790_v28  ;;  %v4937_v5 = vpop.f32.mrb[19].mxu0  ;;  %v6346_v15 = vld [vmem:[#allocation62_spill] sm:$0xff]  ;;  %v4951_v58 = vpop.f32.mrb[19].mxu1 }
 0x147   : > { %6345 = vst [vmem:[#allocation21_spill] sm:$0xff] %v4937_v5  ;;  %v4940_v6 = vadd.f32 %v2142_v32, %v4724_v49  ;;  %v4943_v46 = vadd.f32 %v2425_v16, %v4727_v20  ;;  %v4946_v24 = vadd.f32 %v2707_v40, %v4730_v13  ;;  %v4949_v44 = vadd.f32 %v2989_v34, %v6346_v15  ;;  %v6350_v5 = vld [vmem:[#allocation63_spill] sm:$0xff] }
 0x148   : > { %6347 = vst [vmem:[#allocation22_spill] sm:$0xff] %v4951_v58  ;;  %v2162_v28 = vmul.f32 %v4433_v35, %v2086_v51  ;;  %v2445_v60 = vmul.f32 %v4436_v41, %v2086_v51  ;;  %v2727_v55 = vmul.f32 %v4450_v10, %v2086_v51  ;;  %v3009_v49 = vmul.f32 %v4453_v14, %v2086_v51 }
 0x149   : > { %v2158_v39 = vmul.f32 %v4433_v35, %v2047_v8  ;;  %v2441_v20 = vmul.f32 %v4436_v41, %v2047_v8  ;;  %v2723_v13 = vmul.f32 %v4450_v10, %v2047_v8  ;;  %v3005_v32 = vmul.f32 %v4453_v14, %v2047_v8 }
 0x14a   : > { %v4962_v16 = vadd.f32 %v2162_v28, %v4769_v7  ;;  %v4965_v40 = vadd.f32 %v2445_v60, %v4772_v19  ;;  %v4968_v34 = vadd.f32 %v2727_v55, %v4775_v56  ;;  %v4971_v15 = vadd.f32 %v3009_v49, %v4778_v52  ;;  %v6351_v7 = vld [vmem:[#allocation64_spill] sm:$0xff] }
 0x14b   : > { %v4974_v51 = vadd.f32 %v2158_v39, %v4736_v18  ;;  %v4977_v58 = vadd.f32 %v2441_v20, %v4739_v38  ;;  %v4980_v8 = vadd.f32 %v2723_v13, %v6350_v5  ;;  %v4983_v28 = vadd.f32 %v3005_v32, %v6351_v7  ;;  %v6352_v5 = vld [vmem:[#allocation29_spill] sm:$0xff] }
 0x14c   : > { %6348 = vst [vmem:[#allocation23_spill] sm:$0xff] %v4965_v40  ;;  %6349 = vst [vmem:[#allocation24_spill] sm:$0xff] %v4971_v15  ;;  %v2049_v19 = vmax.f32 %v1511_v12, 0.0  ;;  %v2048_v60 = vmax.f32 %v1470_v53, 0.0  ;;  %v2050_v40 = vmax.f32 %v1513_v26, 0.0  ;;  %v1472_v56 = vadd.f32 %v4828_v59, %v6337_v36  ;;  %v6358_v7 = vld [vmem:[#allocation25_spill] sm:$0xff] }
 0x14d   : > { %v1515_v52 = vadd.f32 %v4842_v57, %v6338_v22  ;;  %v1474_v18 = vadd.f32 %v4844_v17, %v6339_v61  ;;  %v1517_v38 = vadd.f32 %v4850_v25, %v6340_v48  ;;  %v4994_v55 = vadd.f32 %v1553_v37, %v6352_v5 }
 0x14e   : > { %v2160_v49 = vmul.f32 %v4433_v35, %v2049_v19  ;;  %v2443_v12 = vmul.f32 %v4436_v41, %v2049_v19  ;;  %v2725_v53 = vmul.f32 %v4450_v10, %v2049_v19  ;;  %v3007_v59 = vmul.f32 %v4453_v14, %v2049_v19 }
 0x14f   : > { %v2159_v36 = vmul.f32 %v4433_v35, %v2048_v60  ;;  %v2442_v57 = vmul.f32 %v4436_v41, %v2048_v60  ;;  %v2724_v17 = vmul.f32 %v4450_v10, %v2048_v60  ;;  %v3006_v22 = vmul.f32 %v4453_v14, %v2048_v60  ;;  %v5004_v25 = vpop.f32.mrb[20].mxu0  ;;  %v5018_v39 = vpop.f32.mrb[20].mxu1  ;;  %v6359_v60 = vld [vmem:[#allocation26_spill] sm:$0xff] }
 0x150   : > { %6353 = vst [vmem:[#allocation57_spill] sm:$0xff] %v5004_v25  ;;  %v5007_v37 = vadd.f32 %v2160_v49, %v4857_v30  ;;  %v5010_v61 = vadd.f32 %v2443_v12, %v4860_v27  ;;  %v5013_v48 = vadd.f32 %v2725_v53, %v4863_v29  ;;  %v5016_v26 = vadd.f32 %v3007_v59, %v4866_v62  ;;  %v5020_v20 = vpop.f32.mrb[21].mxu0  ;;  %v5034_v29 = vpop.f32.mrb[21].mxu1  ;;  %v6360_v12 = vld [vmem:[#allocation27_spill] sm:$0xff]  ;;  %v6361_v53 = vld [vmem:[#allocation28_spill] sm:$0xff] }
 0x151   : > { %6354 = vst [vmem:[#allocation58_spill] sm:$0xff] %v5018_v39  ;;  %6355 = vst [vmem:[#allocation59_spill] sm:$0xff] %v5020_v20  ;;  %v5023_v13 = vadd.f32 %v2159_v36, %v4817_v3  ;;  %v5026_v32 = vadd.f32 %v2442_v57, %v4820_v31  ;;  %v5029_v30 = vadd.f32 %v2724_v17, %v4823_v33  ;;  %v5036_v62 = vpop.f32.mrb[22].mxu0  ;;  %v5042_v31 = vpop.f32.mrb[22].mxu1  ;;  %v2087_v33 = vmax.f32 %v1472_v56, 0.0  ;;  %v6366_v39 = vld [vmem:[#allocation53_spill] sm:$0xff] }
 0x152   : > { %v5032_v27 = vadd.f32 %v3006_v22, %v4826_v9  ;;  %6356 = vst [vmem:[#allocation60_spill] sm:$0xff] %v5034_v29  ;;  %6357 = vst [vmem:[#allocation62_spill] sm:$0xff] %v5036_v62  ;;  %v2179_v19 = vmul.f32 %v6358_v7, %v2050_v40  ;;  %v2462_v49 = vmul.f32 %v6359_v60, %v2050_v40  ;;  %v5044_v36 = vpop.f32.mrb[23].mxu0  ;;  %v2089_v57 = vmax.f32 %v1515_v52, 0.0  ;;  %v5046_v22 = vpop.f32.mrb[23].mxu1  ;;  %v6365_v29 = vld [vmem:[#allocation52_spill] sm:$0xff] }
 0x153   : > { %v2744_v3 = vmul.f32 %v6360_v12, %v2050_v40  ;;  %v3026_v59 = vmul.f32 %v6361_v53, %v2050_v40  ;;  %6362 = vst [vmem:[#allocation63_spill] sm:$0xff] %v5042_v31  ;;  %6363 = vst [vmem:[#allocation64_spill] sm:$0xff] %v5044_v36  ;;  %v2088_v9 = vmax.f32 %v1474_v18, 0.0  ;;  %v2090_v17 = vmax.f32 %v1517_v38, 0.0  ;;  %v6368_v40 = vld [vmem:[#allocation54_spill] sm:$0xff]  ;;  %v6373_v31 = vld [vmem:[#allocation68_spill] sm:$0xff] }
 0x154   : > { %6364 = vst [vmem:[#allocation29_spill] sm:$0xff] %v5046_v22  ;;  %v5049_v62 = vadd.f32 %v2179_v19, %v4831_v43  ;;  %v5052_v20 = vadd.f32 %v2462_v49, %v6365_v29  ;;  %v2163_v36 = vmul.f32 %v4433_v35, %v2087_v33  ;;  %v2446_v56 = vmul.f32 %v4436_v41, %v2087_v33  ;;  %v6370_v19 = vld [vmem:[#allocation65_spill] sm:$0xff] }
 0x155   : > { %v5055_v25 = vadd.f32 %v2744_v3, %v6366_v39  ;;  %v5058_v15 = vadd.f32 %v3026_v59, %v6368_v40  ;;  %v2728_v52 = vmul.f32 %v4450_v10, %v2087_v33  ;;  %v3010_v18 = vmul.f32 %v4453_v14, %v2087_v33  ;;  %v6371_v3 = vld [vmem:[#allocation66_spill] sm:$0xff]  ;;  %v6372_v40 = vld [vmem:[#allocation67_spill] sm:$0xff] }
 0x156   : > { %v2165_v43 = vmul.f32 %v4433_v35, %v2089_v57  ;;  %v2448_v38 = vmul.f32 %v4436_v41, %v2089_v57  ;;  %v2730_v29 = vmul.f32 %v4450_v10, %v2089_v57  ;;  %v3012_v39 = vmul.f32 %v4453_v14, %v2089_v57 }
 0x157   : > { %6367 = vst [vmem:[#allocation25_spill] sm:$0xff] %v5055_v25  ;;  %6369 = vst [vmem:[#allocation26_spill] sm:$0xff] %v5058_v15  ;;  %v5069_v49 = vadd.f32 %v2163_v36, %v6370_v19  ;;  %v5072_v59 = vadd.f32 %v2446_v56, %v6371_v3  ;;  %v5075_v22 = vadd.f32 %v2728_v52, %v6372_v40 }
 0x158   : > { %v5078_v15 = vadd.f32 %v3010_v18, %v6373_v31  ;;  %v5081_v33 = vadd.f32 %v2165_v43, %v4940_v6  ;;  %v5084_v25 = vadd.f32 %v2448_v38, %v4943_v46  ;;  %v5087_v57 = vadd.f32 %v2730_v29, %v4946_v24  ;;  %v6375_v38 = vld [vmem:[#allocation30_spill] sm:$0xff] }
 0x159   : > { %v5090_v36 = vadd.f32 %v3012_v39, %v4949_v44  ;;  %v2164_v56 = vmul.f32 %v4433_v35, %v2088_v9  ;;  %v2447_v52 = vmul.f32 %v4436_v41, %v2088_v9  ;;  %v2729_v19 = vmul.f32 %v4450_v10, %v2088_v9 }
 0x15a   : > { %v3011_v31 = vmul.f32 %v4453_v14, %v2088_v9  ;;  %v2184_v6 = vmul.f32 %v6358_v7, %v2090_v17  ;;  %v2467_v18 = vmul.f32 %v6359_v60, %v2090_v17  ;;  %v2749_v46 = vmul.f32 %v6360_v12, %v2090_v17 }
 0x15b   : > { %v3031_v24 = vmul.f32 %v6361_v53, %v2090_v17  ;;  %v5101_v43 = vadd.f32 %v2164_v56, %v4896_v54  ;;  %v5104_v44 = vadd.f32 %v2447_v52, %v4899_v4  ;;  %v5107_v35 = vadd.f32 %v2729_v19, %v4902_v0  ;;  %v5112_v10 = vpop.f32.mrb[24].mxu0  ;;  %v5126_v17 = vpop.f32.mrb[24].mxu1 }
 0x15c   : > { %v5110_v41 = vadd.f32 %v3011_v31, %v4905_v21  ;;  %v5115_v14 = vadd.f32 %v2184_v6, %v4924_v2  ;;  %v5118_v9 = vadd.f32 %v2467_v18, %v4927_v42  ;;  %v5121_v54 = vadd.f32 %v2749_v46, %v4930_v47  ;;  %v5128_v0 = vpop.f32.mrb[25].mxu0  ;;  %v6376_v2 = vld [vmem:[#allocation31_spill] sm:$0xff]  ;;  %v6377_v42 = vld [vmem:[#allocation32_spill] sm:$0xff]  ;;  %v5137_v47 = vpop.f32.mrb[25].mxu1 }
 0x15d   : > { %v5124_v4 = vadd.f32 %v3031_v24, %v4933_v63  ;;  %v2051_v21 = vmax.f32 %v4994_v55, 0.0  ;;  %v1597_v29 = vadd.f32 %v4911_v11, %v6375_v38  ;;  %v1556_v39 = vadd.f32 %v4913_v23, %v6376_v2  ;;  %v5139_v40 = vpop.f32.mrb[26].mxu0  ;;  %v6379_v55 = vld [vmem:[#allocation21_spill] sm:$0xff]  ;;  %v6380_v11 = vld [vmem:[#allocation22_spill] sm:$0xff]  ;;  %v5149_v23 = vpop.f32.mrb[26].mxu1 }
 0x15e   : > { %v1599_v3 = vadd.f32 %v4919_v50, %v6377_v42  ;;  %6378 = vst [vmem:[#allocation28_spill] sm:$0xff] %v5139_v40  ;;  %v1558_v63 = vadd.f32 %v4921_v45, %v6352_v5  ;;  %v1601_v56 = vadd.f32 %v4935_v1, %v6375_v38  ;;  %v1560_v52 = vadd.f32 %v6379_v55, %v6376_v2  ;;  %v5151_v31 = vpop.f32.mrb[27].mxu0  ;;  %v5157_v5 = vpop.f32.mrb[27].mxu1  ;;  %v6384_v2 = vld [vmem:[#allocation61_spill] sm:$0xff]  ;;  %v6387_v40 = vld [vmem:[#allocation71_spill] sm:$0xff] }
 0x15f   : > { %6374 = vst [vmem:[#allocation27_spill] sm:$0xff] %v5124_v4  ;;  %v1603_v19 = vadd.f32 %v6380_v11, %v6377_v42  ;;  %6381 = vst [vmem:[#allocation52_spill] sm:$0xff] %v5149_v23  ;;  %v2180_v50 = vmul.f32 %v6358_v7, %v2051_v21  ;;  %v2463_v6 = vmul.f32 %v6359_v60, %v2051_v21  ;;  %v2053_v1 = vmax.f32 %v1597_v29, 0.0  ;;  %v6385_v55 = vld [vmem:[#allocation69_spill] sm:$0xff] }
 0x160   : > { %6382 = vst [vmem:[#allocation53_spill] sm:$0xff] %v5151_v31  ;;  %v2745_v18 = vmul.f32 %v6360_v12, %v2051_v21  ;;  %v3027_v45 = vmul.f32 %v6361_v53, %v2051_v21  ;;  %6383 = vst [vmem:[#allocation54_spill] sm:$0xff] %v5157_v5  ;;  %v2052_v46 = vmax.f32 %v1556_v39, 0.0  ;;  %v2054_v24 = vmax.f32 %v1599_v3, 0.0  ;;  %v6386_v31 = vld [vmem:[#allocation70_spill] sm:$0xff] }
 0x161   : > { %v2091_v38 = vmax.f32 %v1558_v63, 0.0  ;;  %v5160_v42 = vadd.f32 %v2180_v50, %v6384_v2  ;;  %v5163_v11 = vadd.f32 %v2463_v6, %v6385_v55  ;;  %v2182_v21 = vmul.f32 %v6358_v7, %v2053_v1 }
 0x162   : > { %v5166_v23 = vadd.f32 %v2745_v18, %v6386_v31  ;;  %v5169_v4 = vadd.f32 %v3027_v45, %v6387_v40  ;;  %v2465_v5 = vmul.f32 %v6359_v60, %v2053_v1  ;;  %v2747_v29 = vmul.f32 %v6360_v12, %v2053_v1 }
 0x163   : > { %v3029_v39 = vmul.f32 %v6361_v53, %v2053_v1  ;;  %v2181_v3 = vmul.f32 %v6358_v7, %v2052_v46  ;;  %v2464_v63 = vmul.f32 %v6359_v60, %v2052_v46  ;;  %v2746_v50 = vmul.f32 %v6360_v12, %v2052_v46 }
 0x164   : > { %v3028_v31 = vmul.f32 %v6361_v53, %v2052_v46  ;;  %v5180_v6 = vadd.f32 %v2182_v21, %v5023_v13  ;;  %v5183_v40 = vadd.f32 %v2465_v5, %v5026_v32  ;;  %v5186_v18 = vadd.f32 %v2747_v29, %v5029_v30 }
 0x165   : > { %v5189_v45 = vadd.f32 %v3029_v39, %v5032_v27  ;;  %v5192_v1 = vadd.f32 %v2181_v3, %v4974_v51  ;;  %v5195_v2 = vadd.f32 %v2464_v63, %v4977_v58  ;;  %v5198_v46 = vadd.f32 %v2746_v50, %v4980_v8  ;;  %v6395_v50 = vld [vmem:[#allocation23_spill] sm:$0xff] }
 0x166   : > { %v5201_v13 = vadd.f32 %v3028_v31, %v4983_v28  ;;  %v2183_v32 = vmul.f32 %v6358_v7, %v2054_v24  ;;  %v2466_v30 = vmul.f32 %v6359_v60, %v2054_v24  ;;  %v2748_v5 = vmul.f32 %v6360_v12, %v2054_v24 }
 0x167   : > { %v3030_v27 = vmul.f32 %v6361_v53, %v2054_v24  ;;  %v2185_v51 = vmul.f32 %v6358_v7, %v2091_v38  ;;  %v2468_v55 = vmul.f32 %v6359_v60, %v2091_v38  ;;  %v2750_v58 = vmul.f32 %v6360_v12, %v2091_v38  ;;  %v5211_v21 = vpop.f32.mrb[28].mxu0  ;;  %v5225_v3 = vpop.f32.mrb[28].mxu1 }
 0x168   : > { %v3032_v8 = vmul.f32 %v6361_v53, %v2091_v38  ;;  %6388 = vst [vmem:[#allocation65_spill] sm:$0xff] %v5211_v21  ;;  %v5214_v28 = vadd.f32 %v2183_v32, %v5007_v37  ;;  %v5217_v29 = vadd.f32 %v2466_v30, %v5010_v61  ;;  %v5220_v39 = vadd.f32 %v2748_v5, %v5013_v48  ;;  %v5227_v63 = vpop.f32.mrb[29].mxu0  ;;  %v6396_v61 = vld [vmem:[#allocation24_spill] sm:$0xff]  ;;  %v5241_v48 = vpop.f32.mrb[29].mxu1  ;;  %v6406_v21 = vld [vmem:[#allocation37_spill] sm:$0xff] }
 0x169   : > { %v5223_v24 = vadd.f32 %v3030_v27, %v5016_v26  ;;  %6393 = vst [vmem:[#allocation31_spill] sm:$0xff] %v5225_v3  ;;  %6394 = vst [vmem:[#allocation32_spill] sm:$0xff] %v5227_v63  ;;  %v5230_v38 = vadd.f32 %v2185_v51, %v4962_v16  ;;  %v5233_v31 = vadd.f32 %v2468_v55, %v6395_v50  ;;  %v5243_v26 = vpop.f32.mrb[30].mxu0  ;;  %v2093_v30 = vmax.f32 %v1601_v56, 0.0  ;;  %v6400_v63 = vld [vmem:[#allocation33_spill] sm:$0xff]  ;;  %v5247_v51 = vpop.f32.mrb[30].mxu1 }
 0x16a   : > { %6389 = vst [vmem:[#allocation66_spill] sm:$0xff] %v5214_v28  ;;  %6390 = vst [vmem:[#allocation67_spill] sm:$0xff] %v5217_v29  ;;  %v5236_v37 = vadd.f32 %v2750_v58, %v4968_v34  ;;  %v5239_v32 = vadd.f32 %v3032_v8, %v6396_v61  ;;  %v2092_v5 = vmax.f32 %v1560_v52, 0.0  ;;  %v2094_v27 = vmax.f32 %v1603_v19, 0.0  ;;  %v6401_v3 = vld [vmem:[#allocation57_spill] sm:$0xff]  ;;  %v5249_v55 = vpop.f32.mrb[31].mxu0 }
 0x16b   : > { %6391 = vst [vmem:[#allocation68_spill] sm:$0xff] %v5220_v39  ;;  %6392 = vst [vmem:[#allocation30_spill] sm:$0xff] %v5223_v24  ;;  %v1640_v16 = vadd.f32 %v6401_v3, %v6400_v63  ;;  %v6404_v50 = vld [vmem:[#allocation34_spill] sm:$0xff]  ;;  %v6407_v8 = vld [vmem:[#allocation59_spill] sm:$0xff]  ;;  %v5261_v19 = vpop.f32.mrb[31].mxu1  ;;  %v2187_v3 = vmul.f32 %v6358_v7, %v2093_v30 }
 0x16c   : > { %6397 = vst [vmem:[#allocation21_spill] sm:$0xff] %v5239_v32  ;;  %6398 = vst [vmem:[#allocation22_spill] sm:$0xff] %v5241_v48  ;;  %v6405_v34 = vld [vmem:[#allocation58_spill] sm:$0xff]  ;;  %v1642_v61 = vadd.f32 %v6407_v8, %v6406_v21  ;;  %v6409_v48 = vld [vmem:[#allocation60_spill] sm:$0xff]  ;;  %v2469_v8 = vmul.f32 %v6359_v60, %v2092_v5  ;;  %v3033_v29 = vmul.f32 %v6361_v53, %v2092_v5 }
 0x16d   : > { %6399 = vst [vmem:[#allocation61_spill] sm:$0xff] %v5243_v26  ;;  %6402 = vst [vmem:[#allocation69_spill] sm:$0xff] %v5247_v51  ;;  %v1683_v58 = vadd.f32 %v6405_v34, %v6404_v50  ;;  %v6408_v24 = vld [vmem:[#allocation38_spill] sm:$0xff]  ;;  %v2470_v51 = vmul.f32 %v6359_v60, %v2093_v30  ;;  %v3034_v34 = vmul.f32 %v6361_v53, %v2093_v30 }
 0x16e   : > { %6403 = vst [vmem:[#allocation70_spill] sm:$0xff] %v5249_v55  ;;  %v1685_v39 = vadd.f32 %v6409_v48, %v6408_v24  ;;  %v6410_v56 = vld [vmem:[#allocation62_spill] sm:$0xff]  ;;  %6411 = vst [vmem:[#allocation71_spill] sm:$0xff] %v5261_v19  ;;  %v2752_v55 = vmul.f32 %v6360_v12, %v2093_v30  ;;  %v2186_v26 = vmul.f32 %v6358_v7, %v2092_v5 }
 0x16f   : > { %v5259_v52 = vadd.f32 %v6410_v56, %v6400_v63  ;;  %v2751_v48 = vmul.f32 %v6360_v12, %v2092_v5  ;;  %v5272_v63 = vadd.f32 %v2187_v3, %v5101_v43  ;;  %v5275_v56 = vadd.f32 %v2470_v51, %v5104_v44 }
 0x170   : > { %v5278_v19 = vadd.f32 %v2752_v55, %v5107_v35  ;;  %v5281_v28 = vadd.f32 %v3034_v34, %v5110_v41  ;;  %v5284_v30 = vadd.f32 %v2186_v26, %v5069_v49  ;;  %v5287_v32 = vadd.f32 %v2469_v8, %v5072_v59 }
 0x171   : > { %v5290_v5 = vadd.f32 %v2751_v48, %v5075_v22  ;;  %v5293_v43 = vadd.f32 %v3033_v29, %v5078_v15  ;;  %v2188_v44 = vmul.f32 %v6358_v7, %v2094_v27  ;;  %v2471_v35 = vmul.f32 %v6359_v60, %v2094_v27  ;;  %v6413_v60 = vld [vmem:[#allocation35_spill] sm:$0xff]  ;;  %v6414_v29 = vld [vmem:[#allocation36_spill] sm:$0xff] }
 0x172   : > { %v2753_v51 = vmul.f32 %v6360_v12, %v2094_v27  ;;  %v3035_v41 = vmul.f32 %v6361_v53, %v2094_v27  ;;  %v2055_v55 = vmax.f32 %v1640_v16, 0.0  ;;  %v2057_v49 = vmax.f32 %v1683_v58, 0.0  ;;  %v6415_v27 = vld [vmem:[#allocation39_spill] sm:$0xff]  ;;  %v6416_v58 = vld [vmem:[#allocation40_spill] sm:$0xff] }
 0x173   : > { %v2056_v26 = vmax.f32 %v1642_v61, 0.0  ;;  %v2058_v3 = vmax.f32 %v1685_v39, 0.0  ;;  %v5300_v59 = vadd.f32 %v2188_v44, %v5081_v33  ;;  %v5303_v22 = vadd.f32 %v2471_v35, %v5084_v25  ;;  %v5315_v61 = vpop.f32.mrb[32].mxu0  ;;  %v6420_v35 = vld [vmem:[#allocation25_spill] sm:$0xff] }
 0x174   : > { %v5306_v15 = vadd.f32 %v2753_v51, %v5087_v57  ;;  %v5309_v7 = vadd.f32 %v3035_v41, %v5090_v36  ;;  %v2202_v12 = vmul.f32 %v6413_v60, %v2055_v55  ;;  %v2485_v53 = vmul.f32 %v6414_v29, %v2055_v55  ;;  %6417 = vst [vmem:[#allocation24_spill] sm:$0xff] %v5315_v61  ;;  %v5321_v36 = vpop.f32.mrb[32].mxu1  ;;  %v5323_v8 = vpop.f32.mrb[33].mxu0  ;;  %v6421_v41 = vld [vmem:[#allocation26_spill] sm:$0xff] }
 0x175   : > { %v2767_v16 = vmul.f32 %v6415_v27, %v2055_v55  ;;  %v3049_v39 = vmul.f32 %v6416_v58, %v2055_v55  ;;  %v2204_v33 = vmul.f32 %v6413_v60, %v2057_v49  ;;  %v2487_v25 = vmul.f32 %v6414_v29, %v2057_v49  ;;  %6418 = vst [vmem:[#allocation33_spill] sm:$0xff] %v5321_v36  ;;  %v5337_v61 = vpop.f32.mrb[33].mxu1 }
 0x176   : > { %6412 = vst [vmem:[#allocation23_spill] sm:$0xff] %v5309_v7  ;;  %v2769_v57 = vmul.f32 %v6415_v27, %v2057_v49  ;;  %v3051_v34 = vmul.f32 %v6416_v58, %v2057_v49  ;;  %6419 = vst [vmem:[#allocation57_spill] sm:$0xff] %v5323_v8  ;;  %v5326_v48 = vadd.f32 %v2202_v12, %v5049_v62  ;;  %v5339_v7 = vpop.f32.mrb[34].mxu0  ;;  %v5353_v12 = vpop.f32.mrb[34].mxu1 }
 0x177   : > { %v5329_v44 = vadd.f32 %v2485_v53, %v5052_v20  ;;  %v5332_v51 = vadd.f32 %v2767_v16, %v6420_v35  ;;  %v5335_v55 = vadd.f32 %v3049_v39, %v6421_v41  ;;  %6422 = vst [vmem:[#allocation34_spill] sm:$0xff] %v5337_v61  ;;  %6423 = vst [vmem:[#allocation58_spill] sm:$0xff] %v5339_v7  ;;  %v5355_v53 = vpop.f32.mrb[35].mxu0 }
 0x178   : > { %v5342_v49 = vadd.f32 %v2204_v33, %v5192_v1  ;;  %v5345_v8 = vadd.f32 %v2487_v25, %v5195_v2  ;;  %v5348_v62 = vadd.f32 %v2769_v57, %v5198_v46  ;;  %v5351_v20 = vadd.f32 %v3051_v34, %v5201_v13  ;;  %6424 = vst [vmem:[#allocation37_spill] sm:$0xff] %v5353_v12  ;;  %v5361_v2 = vpop.f32.mrb[35].mxu1  ;;  %v6434_v12 = vld [vmem:[#allocation27_spill] sm:$0xff] }
 0x179   : > { %6425 = vst [vmem:[#allocation59_spill] sm:$0xff] %v5355_v53  ;;  %v2203_v16 = vmul.f32 %v6413_v60, %v2056_v26  ;;  %v2486_v39 = vmul.f32 %v6414_v29, %v2056_v26  ;;  %v2768_v1 = vmul.f32 %v6415_v27, %v2056_v26  ;;  %v3050_v33 = vmul.f32 %v6416_v58, %v2056_v26 }
 0x17a   : > { %6426 = vst [vmem:[#allocation38_spill] sm:$0xff] %v5361_v2  ;;  %v2205_v46 = vmul.f32 %v6413_v60, %v2058_v3  ;;  %v2488_v25 = vmul.f32 %v6414_v29, %v2058_v3  ;;  %v2770_v13 = vmul.f32 %v6415_v27, %v2058_v3  ;;  %v3052_v57 = vmul.f32 %v6416_v58, %v2058_v3 }
 0x17b   : > { %v5368_v34 = vadd.f32 %v2203_v16, %v5160_v42  ;;  %v5371_v35 = vadd.f32 %v2486_v39, %v5163_v11  ;;  %v5374_v41 = vadd.f32 %v2768_v1, %v5166_v23  ;;  %v5377_v26 = vadd.f32 %v3050_v33, %v5169_v4  ;;  %v6427_v23 = vld [vmem:[#allocation63_spill] sm:$0xff]  ;;  %v6428_v4 = vld [vmem:[#allocation64_spill] sm:$0xff]  ;;  %v6430_v33 = vld [vmem:[#allocation41_spill] sm:$0xff] }
 0x17c   : > { %v5380_v2 = vadd.f32 %v2205_v46, %v5180_v6  ;;  %v5383_v53 = vadd.f32 %v2488_v25, %v5183_v40  ;;  %v5386_v3 = vadd.f32 %v2770_v13, %v5186_v18  ;;  %v5389_v42 = vadd.f32 %v3052_v57, %v5189_v45  ;;  %v6429_v6 = vld [vmem:[#allocation29_spill] sm:$0xff]  ;;  %v6431_v46 = vld [vmem:[#allocation42_spill] sm:$0xff]  ;;  %v6432_v25 = vld [vmem:[#allocation44_spill] sm:$0xff] }
 0x17d   : > { %v2095_v11 = vmax.f32 %v5259_v52, 0.0  ;;  %v1687_v16 = vadd.f32 %v6427_v23, %v6404_v50  ;;  %v1646_v39 = vadd.f32 %v6428_v4, %v6406_v21  ;;  %v1689_v1 = vadd.f32 %v6429_v6, %v6408_v24  ;;  %v6433_v13 = vld [vmem:[#allocation45_spill] sm:$0xff] }
 0x17e   : > { %v1726_v40 = vadd.f32 %v5112_v10, %v6430_v33  ;;  %v1769_v18 = vadd.f32 %v5126_v17, %v6431_v46  ;;  %v1728_v45 = vadd.f32 %v5128_v0, %v6432_v25  ;;  %v1771_v52 = vadd.f32 %v5137_v47, %v6433_v13 }
 0x17f   : > { %v2207_v50 = vmul.f32 %v6413_v60, %v2095_v11  ;;  %v2490_v57 = vmul.f32 %v6414_v29, %v2095_v11  ;;  %v2772_v21 = vmul.f32 %v6415_v27, %v2095_v11  ;;  %v3054_v24 = vmul.f32 %v6416_v58, %v2095_v11  ;;  %v5422_v61 = vpop.f32.mrb[36].mxu0 }
 0x180   : > { %v2097_v23 = vmax.f32 %v1687_v16, 0.0  ;;  %v2096_v4 = vmax.f32 %v1646_v39, 0.0  ;;  %v2098_v10 = vmax.f32 %v1689_v1, 0.0  ;;  %v2059_v6 = vmax.f32 %v1726_v40, 0.0  ;;  %6435 = vst [vmem:[#allocation60_spill] sm:$0xff] %v5422_v61  ;;  %v5428_v1 = vpop.f32.mrb[36].mxu1 }
 0x181   : > { %v5411_v17 = vadd.f32 %v2207_v50, %v5115_v14  ;;  %v5414_v0 = vadd.f32 %v2490_v57, %v5118_v9  ;;  %v5417_v47 = vadd.f32 %v2772_v21, %v5121_v54  ;;  %v5420_v7 = vadd.f32 %v3054_v24, %v6434_v12  ;;  %6436 = vst [vmem:[#allocation62_spill] sm:$0xff] %v5428_v1  ;;  %v5430_v9 = vpop.f32.mrb[37].mxu0  ;;  %v5436_v57 = vpop.f32.mrb[37].mxu1 }
 0x182   : > { %v2209_v11 = vmul.f32 %v6413_v60, %v2097_v23  ;;  %v2492_v16 = vmul.f32 %v6414_v29, %v2097_v23  ;;  %v2774_v39 = vmul.f32 %v6415_v27, %v2097_v23  ;;  %v3056_v14 = vmul.f32 %v6416_v58, %v2097_v23  ;;  %6437 = vst [vmem:[#allocation35_spill] sm:$0xff] %v5430_v9  ;;  %v5438_v21 = vpop.f32.mrb[38].mxu0  ;;  %v5452_v61 = vpop.f32.mrb[38].mxu1 }
 0x183   : > { %v2208_v54 = vmul.f32 %v6413_v60, %v2096_v4  ;;  %v2491_v40 = vmul.f32 %v6414_v29, %v2096_v4  ;;  %v2773_v12 = vmul.f32 %v6415_v27, %v2096_v4  ;;  %v3055_v50 = vmul.f32 %v6416_v58, %v2096_v4  ;;  %6438 = vst [vmem:[#allocation36_spill] sm:$0xff] %v5436_v57  ;;  %v5454_v36 = vpop.f32.mrb[39].mxu0  ;;  %v6450_v57 = vld [vmem:[#allocation68_spill] sm:$0xff] }
 0x184   : > { %6439 = vst [vmem:[#allocation39_spill] sm:$0xff] %v5438_v21  ;;  %v5441_v24 = vadd.f32 %v2209_v11, %v5284_v30  ;;  %v5444_v23 = vadd.f32 %v2492_v16, %v5287_v32  ;;  %v5447_v9 = vadd.f32 %v2774_v39, %v5290_v5  ;;  %v5450_v1 = vadd.f32 %v3056_v14, %v5293_v43  ;;  %v6442_v32 = vld [vmem:[#allocation21_spill] sm:$0xff]  ;;  %v5468_v5 = vpop.f32.mrb[39].mxu1 }
 0x185   : > { %6440 = vst [vmem:[#allocation40_spill] sm:$0xff] %v5452_v61  ;;  %6441 = vst [vmem:[#allocation25_spill] sm:$0xff] %v5454_v36  ;;  %v5457_v4 = vadd.f32 %v2208_v54, %v5230_v38  ;;  %v5460_v21 = vadd.f32 %v2491_v40, %v5233_v31  ;;  %v5463_v30 = vadd.f32 %v2773_v12, %v5236_v37  ;;  %v6449_v36 = vld [vmem:[#allocation67_spill] sm:$0xff] }
 0x186   : > { %v5466_v11 = vadd.f32 %v3055_v50, %v6442_v32  ;;  %6443 = vst [vmem:[#allocation26_spill] sm:$0xff] %v5468_v5  ;;  %v2210_v43 = vmul.f32 %v6413_v60, %v2098_v10  ;;  %v2493_v16 = vmul.f32 %v6414_v29, %v2098_v10  ;;  %v2775_v39 = vmul.f32 %v6415_v27, %v2098_v10 }
 0x187   : > { %v3057_v38 = vmul.f32 %v6416_v58, %v2098_v10  ;;  %v2206_v14 = vmul.f32 %v6413_v60, %v2059_v6  ;;  %v2489_v31 = vmul.f32 %v6414_v29, %v2059_v6  ;;  %v2771_v37 = vmul.f32 %v6415_v27, %v2059_v6  ;;  %v6448_v10 = vld [vmem:[#allocation66_spill] sm:$0xff] }
 0x188   : > { %v3053_v54 = vmul.f32 %v6416_v58, %v2059_v6  ;;  %v5479_v40 = vadd.f32 %v2210_v43, %v5272_v63  ;;  %v5482_v12 = vadd.f32 %v2493_v16, %v5275_v56  ;;  %v5485_v50 = vadd.f32 %v2775_v39, %v5278_v19  ;;  %v6451_v63 = vld [vmem:[#allocation30_spill] sm:$0xff]  ;;  %v6453_v19 = vld [vmem:[#allocation28_spill] sm:$0xff] }
 0x189   : > { %v5488_v32 = vadd.f32 %v3057_v38, %v5281_v28  ;;  %v5491_v5 = vadd.f32 %v2206_v14, %v6448_v10  ;;  %v5494_v61 = vadd.f32 %v2489_v31, %v6449_v36  ;;  %v5497_v6 = vadd.f32 %v2771_v37, %v6450_v57  ;;  %v6454_v28 = vld [vmem:[#allocation52_spill] sm:$0xff]  ;;  %v6455_v14 = vld [vmem:[#allocation53_spill] sm:$0xff]  ;;  %v6456_v36 = vld [vmem:[#allocation54_spill] sm:$0xff] }
 0x18a   : > { %6444 = vst [vmem:[#allocation63_spill] sm:$0xff] %v5479_v40  ;;  %6445 = vst [vmem:[#allocation64_spill] sm:$0xff] %v5482_v12  ;;  %v5500_v43 = vadd.f32 %v3053_v54, %v6451_v63  ;;  %v2061_v56 = vmax.f32 %v1769_v18, 0.0  ;;  %v2060_v16 = vmax.f32 %v1728_v45, 0.0  ;;  %v2062_v12 = vmax.f32 %v1771_v52, 0.0  ;;  %v6457_v57 = vld [vmem:[#allocation49_spill] sm:$0xff] }
 0x18b   : > { %6446 = vst [vmem:[#allocation29_spill] sm:$0xff] %v5485_v50  ;;  %6447 = vst [vmem:[#allocation41_spill] sm:$0xff] %v5488_v32  ;;  %v1730_v39 = vadd.f32 %v6453_v19, %v6430_v33  ;;  %v1773_v38 = vadd.f32 %v6454_v28, %v6431_v46  ;;  %v1732_v10 = vadd.f32 %v6455_v14, %v6432_v25  ;;  %v6458_v37 = vld [vmem:[#allocation65_spill] sm:$0xff]  ;;  %v6459_v54 = vld [vmem:[#allocation43_spill] sm:$0xff] }
 0x18c   : > { %6452 = vst [vmem:[#allocation42_spill] sm:$0xff] %v5500_v43  ;;  %v1775_v31 = vadd.f32 %v6456_v36, %v6433_v13  ;;  %v5512_v32 = vadd.f32 %v6458_v37, %v6457_v57  ;;  %v2226_v18 = vmul.f32 %v6459_v54, %v2061_v56  ;;  %v6460_v45 = vld [vmem:[#allocation46_spill] sm:$0xff]  ;;  %v6461_v63 = vld [vmem:[#allocation47_spill] sm:$0xff]  ;;  %v6462_v33 = vld [vmem:[#allocation48_spill] sm:$0xff]  ;;  %v2225_v46 = vmul.f32 %v6459_v54, %v2060_v16 }
 0x18d   : > { %v2509_v52 = vmul.f32 %v6460_v45, %v2061_v56  ;;  %v2791_v50 = vmul.f32 %v6461_v63, %v2061_v56  ;;  %v3073_v19 = vmul.f32 %v6462_v33, %v2061_v56  ;;  %v2508_v25 = vmul.f32 %v6460_v45, %v2060_v16 }
 0x18e   : > { %v2790_v13 = vmul.f32 %v6461_v63, %v2060_v16  ;;  %v3072_v28 = vmul.f32 %v6462_v33, %v2060_v16  ;;  %v5523_v14 = vadd.f32 %v2226_v18, %v5368_v34  ;;  %v5535_v40 = vadd.f32 %v2225_v46, %v5326_v48 }
 0x18f   : > { %v5526_v36 = vadd.f32 %v2509_v52, %v5371_v35  ;;  %v5529_v37 = vadd.f32 %v2791_v50, %v5374_v41  ;;  %v5532_v56 = vadd.f32 %v3073_v19, %v5377_v26  ;;  %v5538_v43 = vadd.f32 %v2508_v25, %v5329_v44 }
 0x190   : > { %v5541_v16 = vadd.f32 %v2790_v13, %v5332_v51  ;;  %v5544_v34 = vadd.f32 %v3072_v28, %v5335_v55  ;;  %v2227_v35 = vmul.f32 %v6459_v54, %v2062_v12  ;;  %v2510_v41 = vmul.f32 %v6460_v45, %v2062_v12 }
 0x191   : > { %v2792_v50 = vmul.f32 %v6461_v63, %v2062_v12  ;;  %v3074_v26 = vmul.f32 %v6462_v33, %v2062_v12  ;;  %v2099_v48 = vmax.f32 %v1730_v39, 0.0  ;;  %v2101_v18 = vmax.f32 %v1773_v38, 0.0 }
 0x192   : > { %v2100_v44 = vmax.f32 %v1732_v10, 0.0  ;;  %v2102_v52 = vmax.f32 %v1775_v31, 0.0  ;;  %v5553_v51 = vadd.f32 %v2227_v35, %v5342_v49  ;;  %v5556_v55 = vadd.f32 %v2510_v41, %v5345_v8 }
 0x193   : > { %v5559_v19 = vadd.f32 %v2792_v50, %v5348_v62  ;;  %v5562_v46 = vadd.f32 %v3074_v26, %v5351_v20  ;;  %v2211_v12 = vmul.f32 %v6413_v60, %v2099_v48  ;;  %v2494_v25 = vmul.f32 %v6414_v29, %v2099_v48 }
 0x194   : > { %v2776_v39 = vmul.f32 %v6415_v27, %v2099_v48  ;;  %v3058_v38 = vmul.f32 %v6416_v58, %v2099_v48  ;;  %v2231_v8 = vmul.f32 %v6459_v54, %v2101_v18  ;;  %v2514_v49 = vmul.f32 %v6460_v45, %v2101_v18  ;;  %v6463_v58 = vld [vmem:[#allocation23_spill] sm:$0xff] }
 0x195   : > { %v2796_v62 = vmul.f32 %v6461_v63, %v2101_v18  ;;  %v3078_v20 = vmul.f32 %v6462_v33, %v2101_v18  ;;  %v5577_v60 = vadd.f32 %v2211_v12, %v5300_v59  ;;  %v5580_v29 = vadd.f32 %v2494_v25, %v5303_v22  ;;  %v6466_v25 = vld [vmem:[#allocation50_spill] sm:$0xff] }
 0x196   : > { %v5583_v27 = vadd.f32 %v2776_v39, %v5306_v15  ;;  %v5586_v10 = vadd.f32 %v3058_v38, %v6463_v58  ;;  %v5589_v31 = vadd.f32 %v2231_v8, %v5457_v4  ;;  %v5592_v13 = vadd.f32 %v2514_v49, %v5460_v21  ;;  %v6469_v8 = vld [vmem:[#allocation32_spill] sm:$0xff] }
 0x197   : > { %v5595_v28 = vadd.f32 %v2796_v62, %v5463_v30  ;;  %v5598_v59 = vadd.f32 %v3078_v20, %v5466_v11  ;;  %v2230_v22 = vmul.f32 %v6459_v54, %v2100_v44  ;;  %v2513_v15 = vmul.f32 %v6460_v45, %v2100_v44  ;;  %v6470_v62 = vld [vmem:[#allocation20_spill] sm:$0xff] }
 0x198   : > { %v2795_v35 = vmul.f32 %v6461_v63, %v2100_v44  ;;  %v3077_v41 = vmul.f32 %v6462_v33, %v2100_v44  ;;  %v2232_v4 = vmul.f32 %v6459_v54, %v2102_v52  ;;  %v2515_v21 = vmul.f32 %v6460_v45, %v2102_v52 }
 0x199   : > { %v2797_v30 = vmul.f32 %v6461_v63, %v2102_v52  ;;  %v3079_v11 = vmul.f32 %v6462_v33, %v2102_v52  ;;  %v5609_v50 = vadd.f32 %v2230_v22, %v5411_v17  ;;  %v5612_v26 = vadd.f32 %v2513_v15, %v5414_v0 }
 0x19a   : > { %v5615_v48 = vadd.f32 %v2795_v35, %v5417_v47  ;;  %v5618_v18 = vadd.f32 %v3077_v41, %v5420_v7  ;;  %v5621_v44 = vadd.f32 %v2232_v4, %v5441_v24  ;;  %v5624_v12 = vadd.f32 %v2515_v21, %v5444_v23  ;;  %v6467_v47 = vld [vmem:[#allocation31_spill] sm:$0xff]  ;;  %v3827_v23 = vld [vmem:[%s4292_s18 + $0x18] sm:$0xff] }
 0x19b   : > { %v5627_v52 = vadd.f32 %v2797_v30, %v5447_v9  ;;  %v5630_v17 = vadd.f32 %v3079_v11, %v5450_v1  ;;  %v2063_v0 = vmax.f32 %v5512_v32, 0.0  ;;  %v1855_v39 = vadd.f32 %v6467_v47, %v6466_v25  ;;  %v6468_v24 = vld [vmem:[#allocation51_spill] sm:$0xff]  ;;  %v6471_v9 = vld [vmem:[#allocation61_spill] sm:$0xff]  ;;  %v6473_v30 = vld [vmem:[#allocation22_spill] sm:$0xff] }
 0x19c   : > { %v5636_v38 = vstv %s5568_s10  ;;  %v5639_v7 = vstv %s5570_s1  ;;  %v1814_v49 = vadd.f32 %v6469_v8, %v6468_v24  ;;  %v470_v20 = vrot.slane %v3827_v23, %v6470_v62  ;;  %v6472_v1 = vld [vmem:[#allocation69_spill] sm:$0xff] }
 0x19d   : > { %6464 = vst [vmem:[#allocation44_spill] sm:$0xff] %v5627_v52  ;;  %6465 = vst [vmem:[#allocation45_spill] sm:$0xff] %v5630_v17  ;;  %v1816_v58 = vadd.f32 %v6471_v9, %v6457_v57  ;;  %v1859_v22 = vadd.f32 %v6472_v1, %v6466_v25  ;;  %v2228_v32 = vmul.f32 %v6459_v54, %v2063_v0  ;;  %v2065_v4 = vmax.f32 %v1855_v39, 0.0  ;;  %v6474_v9 = vld [vmem:[#allocation55_spill] sm:$0xff]  ;;  %v5726_v17 = vld [vmem:[%s4292_s18 + $0x20] sm:$0xff]  ;;  %s5749_s18 = sld [smem:[#allocation3 + %s2116_s28]] }
 0x19e   : > { %v2511_v15 = vmul.f32 %v6460_v45, %v2063_v0  ;;  %v2793_v35 = vmul.f32 %v6461_v63, %v2063_v0  ;;  %v3075_v41 = vmul.f32 %v6462_v33, %v2063_v0  ;;  %v2064_v21 = vmax.f32 %v1814_v49, 0.0  ;;  %v6475_v0 = vld [vmem:[#allocation56_spill] sm:$0xff] }
 0x19f   : > { %v1857_v11 = vadd.f32 %v6473_v30, %v470_v20  ;;  %v2103_v47 = vmax.f32 %v1816_v58, 0.0  ;;  %v5655_v8 = vadd.f32 %v2228_v32, %v5380_v2  ;;  %v2248_v1 = vmul.f32 %v6474_v9, %v2065_v4 }
 0x1a0   : > { %v5658_v57 = vadd.f32 %v2511_v15, %v5383_v53  ;;  %v5661_v25 = vadd.f32 %v2793_v35, %v5386_v3  ;;  %v5664_v23 = vadd.f32 %v3075_v41, %v5389_v42  ;;  %v2531_v39 = vmul.f32 %v6475_v0, %v2065_v4 }
 0x1a1   : > { %v2813_v49 = vmul.f32 %v5636_v38, %v2065_v4  ;;  %v3095_v58 = vmul.f32 %v5639_v7, %v2065_v4  ;;  %v2229_v2 = vmul.f32 %v6459_v54, %v2064_v21  ;;  %v2512_v53 = vmul.f32 %v6460_v45, %v2064_v21 }
 0x1a2   : > { %v2794_v32 = vmul.f32 %v6461_v63, %v2064_v21  ;;  %v3076_v3 = vmul.f32 %v6462_v33, %v2064_v21  ;;  %v5675_v42 = vadd.f32 %v2248_v1, %v5535_v40  ;;  %v5678_v15 = vadd.f32 %v2531_v39, %v5538_v43  ;;  %v6476_v40 = vld [vmem:[#allocation42_spill] sm:$0xff] }
 0x1a3   : > { %v5681_v35 = vadd.f32 %v2813_v49, %v5541_v16  ;;  %v5684_v41 = vadd.f32 %v3095_v58, %v5544_v34  ;;  %v5687_v4 = vadd.f32 %v2229_v2, %v5491_v5  ;;  %v5690_v30 = vadd.f32 %v2512_v53, %v5494_v61  ;;  %v6478_v58 = vld [vmem:[#allocation71_spill] sm:$0xff] }
 0x1a4   : > { %v5693_v21 = vadd.f32 %v2794_v32, %v5497_v6  ;;  %v5696_v43 = vadd.f32 %v3076_v3, %v6476_v40  ;;  %v2066_v1 = vmax.f32 %v1857_v11, 0.0  ;;  %v2233_v16 = vmul.f32 %v6459_v54, %v2103_v47  ;;  %v6477_v6 = vld [vmem:[#allocation70_spill] sm:$0xff]  ;;  %v6479_v40 = vld [vmem:[#allocation63_spill] sm:$0xff] }
 0x1a5   : > { %v2516_v34 = vmul.f32 %v6460_v45, %v2103_v47  ;;  %v2798_v39 = vmul.f32 %v6461_v63, %v2103_v47  ;;  %v3080_v61 = vmul.f32 %v6462_v33, %v2103_v47  ;;  %v2105_v5 = vmax.f32 %v1859_v22, 0.0  ;;  %v6480_v22 = vld [vmem:[#allocation64_spill] sm:$0xff] }
 0x1a6   : > { %v1818_v49 = vadd.f32 %v6477_v6, %v6468_v24  ;;  %v1861_v2 = vadd.f32 %v6478_v58, %v470_v20  ;;  %v2249_v53 = vmul.f32 %v6474_v9, %v2066_v1  ;;  %v2532_v11 = vmul.f32 %v6475_v0, %v2066_v1  ;;  %v6481_v24 = vld [vmem:[#allocation29_spill] sm:$0xff] }
 0x1a7   : > { %v2814_v32 = vmul.f32 %v5636_v38, %v2066_v1  ;;  %v3096_v3 = vmul.f32 %v5639_v7, %v2066_v1  ;;  %v5714_v47 = vadd.f32 %v2233_v16, %v6479_v40  ;;  %v5717_v62 = vadd.f32 %v2516_v34, %v6480_v22  ;;  %v6482_v6 = vld [vmem:[#allocation41_spill] sm:$0xff] }
 0x1a8   : > { %v5720_v20 = vadd.f32 %v2798_v39, %v6481_v24  ;;  %v5723_v58 = vadd.f32 %v3080_v61, %v6482_v6  ;;  %v5731_v1 = vadd.f32 %v2249_v53, %v5523_v14  ;;  %v5734_v52 = vadd.f32 %v2532_v11, %v5526_v36  ;;  %v6484_v53 = vld [vmem:[#allocation13_spill] sm:$0xff]  ;;  %v6485_v11 = vld [vmem:[#allocation14_spill] sm:$0xff] }
 0x1a9   : > { %v5737_v16 = vadd.f32 %v2814_v32, %v5529_v37  ;;  %v5740_v34 = vadd.f32 %v3096_v3, %v5532_v56  ;;  %v2253_v39 = vmul.f32 %v6474_v9, %v2105_v5  ;;  %v2536_v61 = vmul.f32 %v6475_v0, %v2105_v5 }
 0x1aa   : > { %v2818_v40 = vmul.f32 %v5636_v38, %v2105_v5  ;;  %v3100_v14 = vmul.f32 %v5639_v7, %v2105_v5  ;;  %v2104_v36 = vmax.f32 %v1818_v49, 0.0  ;;  %v2106_v37 = vmax.f32 %v1861_v2, 0.0 }
 0x1ab   : > { %6483 = vst [vmem:[#allocation27_spill] sm:$0xff] %v5740_v34  ;;  %v474_v56 = vrot.slane %v5726_v17, %v6484_v53  ;;  %v482_v32 = vrot.slane %v5726_v17, %v6485_v11  ;;  %v5758_v3 = vadd.f32 %v2253_v39, %v5609_v50  ;;  %v5761_v22 = vadd.f32 %v2536_v61, %v5612_v26  ;;  %v6493_v11 = vld [vmem:[#allocation16_spill] sm:$0xff] }
 0x1ac   : > { %v5764_v5 = vadd.f32 %v2818_v40, %v5615_v48  ;;  %v5767_v24 = vadd.f32 %v3100_v14, %v5618_v18  ;;  %v2234_v49 = vmul.f32 %v6459_v54, %v2104_v36  ;;  %v2517_v2 = vmul.f32 %v6460_v45, %v2104_v36 }
 0x1ad   : > { %v2799_v6 = vmul.f32 %v6461_v63, %v2104_v36  ;;  %v3081_v53 = vmul.f32 %v6462_v33, %v2104_v36  ;;  %v2254_v50 = vmul.f32 %v6474_v9, %v2106_v37  ;;  %v2537_v26 = vmul.f32 %v6475_v0, %v2106_v37  ;;  %v6491_v36 = vld [vmem:[#allocation33_spill] sm:$0xff] }
 0x1ae   : > { %v2819_v48 = vmul.f32 %v5636_v38, %v2106_v37  ;;  %v3101_v18 = vmul.f32 %v5639_v7, %v2106_v37  ;;  %v5778_v54 = vadd.f32 %v2234_v49, %v5577_v60  ;;  %v5781_v45 = vadd.f32 %v2517_v2, %v5580_v29  ;;  %v6490_v29 = vld [vmem:[#allocation24_spill] sm:$0xff]  ;;  %v6492_v37 = vld [vmem:[#allocation15_spill] sm:$0xff] }
 0x1af   : > { %v5784_v63 = vadd.f32 %v2799_v6, %v5583_v27  ;;  %v5787_v33 = vadd.f32 %v3081_v53, %v5586_v10  ;;  %v5790_v39 = vadd.f32 %v2254_v50, %v5589_v31  ;;  %v5793_v61 = vadd.f32 %v2537_v26, %v5592_v13  ;;  %v6494_v53 = vld [vmem:[#allocation57_spill] sm:$0xff]  ;;  %v6495_v26 = vld [vmem:[#allocation34_spill] sm:$0xff] }
 0x1b0   : > { %v5796_v40 = vadd.f32 %v2819_v48, %v5595_v28  ;;  %v5799_v60 = vadd.f32 %v3101_v18, %v5598_v59  ;;  %v1898_v14 = vadd.f32 %v6490_v29, %v474_v56  ;;  %v1941_v27 = vadd.f32 %v6491_v36, %v482_v32  ;;  %v6496_v29 = vld [vmem:[#allocation58_spill] sm:$0xff] }
 0x1b1   : > { %6486 = vst [vmem:[#allocation21_spill] sm:$0xff] %v5790_v39  ;;  %6487 = vst [vmem:[#allocation66_spill] sm:$0xff] %v5793_v61  ;;  %v478_v10 = vrot.slane %v5726_v17, %v6492_v37  ;;  %v486_v31 = vrot.slane %v5726_v17, %v6493_v11  ;;  %v5808_v49 = vstv %s5728_s6  ;;  %v5811_v13 = vstv %s5749_s18  ;;  %v6497_v37 = vld [vmem:[#allocation37_spill] sm:$0xff] }
 0x1b2   : > { %6488 = vst [vmem:[#allocation67_spill] sm:$0xff] %v5796_v40  ;;  %6489 = vst [vmem:[#allocation68_spill] sm:$0xff] %v5799_v60  ;;  %v5814_v2 = vstv %s5742_s14  ;;  %v5817_v28 = vstv %s5751_s25  ;;  %v2067_v59 = vmax.f32 %v1898_v14, 0.0  ;;  %v2069_v6 = vmax.f32 %v1941_v27, 0.0  ;;  %v6498_v60 = vld [vmem:[#allocation59_spill] sm:$0xff] }
 0x1b3   : > { %v1900_v50 = vadd.f32 %v6494_v53, %v478_v10  ;;  %v1943_v48 = vadd.f32 %v6495_v26, %v486_v31  ;;  %v5821_v18 = vstv %s3116_s15  ;;  %v1902_v36 = vadd.f32 %v6496_v29, %v474_v56 }
 0x1b4   : > { %v1945_v11 = vadd.f32 %v6497_v37, %v482_v32  ;;  %v1904_v40 = vadd.f32 %v6498_v60, %v478_v10  ;;  %v2250_v61 = vmul.f32 %v6474_v9, %v2067_v59  ;;  %v2533_v39 = vmul.f32 %v6475_v0, %v2067_v59 }
 0x1b5   : > { %v2815_v34 = vmul.f32 %v5636_v38, %v2067_v59  ;;  %v3097_v14 = vmul.f32 %v5639_v7, %v2067_v59  ;;  %v2252_v27 = vmul.f32 %v6474_v9, %v2069_v6  ;;  %v2535_v53 = vmul.f32 %v6475_v0, %v2069_v6 }
 0x1b6   : > { %v2817_v26 = vmul.f32 %v5636_v38, %v2069_v6  ;;  %v3099_v56 = vmul.f32 %v5639_v7, %v2069_v6  ;;  %v5835_v32 = vadd.f32 %v2250_v61, %v5553_v51  ;;  %v5838_v60 = vadd.f32 %v2533_v39, %v5556_v55 }
 0x1b7   : > { %v5841_v10 = vadd.f32 %v2815_v34, %v5559_v19  ;;  %v5844_v29 = vadd.f32 %v3097_v14, %v5562_v46  ;;  %v5847_v59 = vadd.f32 %v2252_v27, %v5687_v4  ;;  %v5850_v37 = vadd.f32 %v2535_v53, %v5690_v30  ;;  %v6501_v14 = vld [vmem:[#allocation17_spill] sm:$0xff]  ;;  %v6502_v27 = vld [vmem:[#allocation18_spill] sm:$0xff] }
 0x1b8   : > { %v5853_v6 = vadd.f32 %v2817_v26, %v5693_v21  ;;  %v5856_v51 = vadd.f32 %v3099_v56, %v5696_v43  ;;  %v2068_v55 = vmax.f32 %v1900_v50, 0.0  ;;  %v2070_v39 = vmax.f32 %v1943_v48, 0.0 }
 0x1b9   : > { %6499 = vst [vmem:[#allocation30_spill] sm:$0xff] %v5841_v10  ;;  %v2107_v61 = vmax.f32 %v1902_v36, 0.0  ;;  %v2109_v19 = vmax.f32 %v1945_v11, 0.0  ;;  %v2108_v34 = vmax.f32 %v1904_v40, 0.0  ;;  %v6500_v10 = vld [vmem:[#allocation38_spill] sm:$0xff]  ;;  %v5861_v4 = vrot.slane %v5726_v17, %v6501_v14 }
 0x1ba   : > { %v1947_v46 = vadd.f32 %v6500_v10, %v486_v31  ;;  %v5865_v30 = vrot.slane %v5726_v17, %v6502_v27  ;;  %v2251_v21 = vmul.f32 %v6474_v9, %v2068_v55  ;;  %v2534_v43 = vmul.f32 %v6475_v0, %v2068_v55 }
 0x1bb   : > { %v2816_v50 = vmul.f32 %v5636_v38, %v2068_v55  ;;  %v3098_v48 = vmul.f32 %v5639_v7, %v2068_v55  ;;  %v2271_v40 = vmul.f32 %v5808_v49, %v2070_v39  ;;  %v2554_v31 = vmul.f32 %v5814_v2, %v2070_v39 }
 0x1bc   : > { %v2836_v36 = vmul.f32 %v5817_v28, %v2070_v39  ;;  %v3118_v11 = vmul.f32 %v5821_v18, %v2070_v39  ;;  %v5876_v53 = vadd.f32 %v2251_v21, %v5655_v8  ;;  %v5879_v26 = vadd.f32 %v2534_v43, %v5658_v57 }
 0x1bd   : > { %v5882_v56 = vadd.f32 %v2816_v50, %v5661_v25  ;;  %v5885_v10 = vadd.f32 %v3098_v48, %v5664_v23  ;;  %v2281_v55 = vadd.f32 %v2271_v40, %v5675_v42  ;;  %v2564_v14 = vadd.f32 %v2554_v31, %v5678_v15  ;;  %v6503_v50 = vld [vmem:[#allocation44_spill] sm:$0xff]  ;;  %v6504_v40 = vld [vmem:[#allocation45_spill] sm:$0xff] }
 0x1be   : > { %v2846_v27 = vadd.f32 %v2836_v36, %v5681_v35  ;;  %v3128_v39 = vadd.f32 %v3118_v11, %v5684_v41  ;;  %v2255_v8 = vmul.f32 %v6474_v9, %v2107_v61  ;;  %v2538_v21 = vmul.f32 %v6475_v0, %v2107_v61 }
 0x1bf   : > { %v2820_v57 = vmul.f32 %v5636_v38, %v2107_v61  ;;  %v3102_v25 = vmul.f32 %v5639_v7, %v2107_v61  ;;  %v2292_v43 = vadd.f32 %v5811_v13, %v2281_v55  ;;  %v2574_v23 = vadd.f32 %v2564_v14, %v5811_v13 }
 0x1c0   : > { %v2856_v42 = vadd.f32 %v2846_v27, %v5811_v13  ;;  %v3138_v15 = vadd.f32 %v3128_v39, %v5811_v13  ;;  %v5900_v35 = vadd.f32 %v2255_v8, %v5621_v44  ;;  %v5903_v41 = vadd.f32 %v2538_v21, %v5624_v12 }
 0x1c1   : > { %v5906_v48 = vadd.f32 %v2820_v57, %v6503_v50  ;;  %v5909_v31 = vadd.f32 %v3102_v25, %v6504_v40  ;;  %v2302_v61 = vsub.f32 0.0, %v2292_v43  ;;  %v2584_v36 = vsub.f32 0.0, %v2574_v23 }
 0x1c2   : > { %v2866_v11 = vsub.f32 0.0, %v2856_v42  ;;  %v3148_v55 = vsub.f32 0.0, %v3138_v15  ;;  %v2257_v14 = vmul.f32 %v6474_v9, %v2109_v19  ;;  %v2540_v27 = vmul.f32 %v6475_v0, %v2109_v19 }
 0x1c3   : > { %v2822_v44 = vmul.f32 %v5636_v38, %v2109_v19  ;;  %v3104_v39 = vmul.f32 %v5639_v7, %v2109_v19  ;;  %v2312_v12 = vmul.f32 1.442695, %v2302_v61  ;;  %v2594_v8 = vmul.f32 1.442695, %v2584_v36 }
 0x1c4   : > { %v2876_v21 = vmul.f32 1.442695, %v2866_v11  ;;  %v2256_v57 = vmul.f32 %v6474_v9, %v2108_v34  ;;  %v3158_v50 = vmul.f32 1.442695, %v3148_v55  ;;  %v5917_v25 = vadd.f32 %v2257_v14, %v5778_v54  ;;  %v6507_v14 = vld [vmem:[#allocation19_spill] sm:$0xff] }
 0x1c5   : > { %v5920_v43 = vadd.f32 %v2540_v27, %v5781_v45  ;;  %v5923_v23 = vadd.f32 %v2822_v44, %v5784_v63  ;;  %3667 = vpow2.f32 %v2312_v12  ;;  %v5926_v42 = vadd.f32 %v3104_v39, %v5787_v33  ;;  %v6505_v63 = vld [vmem:[#allocation60_spill] sm:$0xff]  ;;  %v6506_v33 = vld [vmem:[#allocation62_spill] sm:$0xff] }
 0x1c6   : > { %v5929_v19 = vadd.f32 %v2256_v57, %v5714_v47  ;;  %v2539_v15 = vmul.f32 %v6475_v0, %v2108_v34  ;;  %3669 = vpow2.f32 %v2594_v8  ;;  %v2821_v9 = vmul.f32 %v5636_v38, %v2108_v34 }
 0x1c7   : > { %v3103_v54 = vmul.f32 %v5639_v7, %v2108_v34  ;;  %v2110_v40 = vmax.f32 %v1947_v46, 0.0  ;;  %3671 = vpow2.f32 %v2876_v21  ;;  %v1984_v61 = vadd.f32 %v6505_v63, %v5861_v4 }
 0x1c8   : > { %v5935_v45 = vadd.f32 %v2539_v15, %v5717_v62  ;;  %v2027_v36 = vadd.f32 %v6506_v33, %v5865_v30  ;;  %3673 = vpow2.f32 %v3158_v50  ;;  %v5942_v47 = vadd.f32 %v2821_v9, %v5720_v20  ;;  %v6508_v20 = vld [vmem:[#allocation20_spill] sm:$0xff] }
 0x1c9   : > { %v5945_v0 = vadd.f32 %v3103_v54, %v5723_v58  ;;  %v2276_v38 = vmul.f32 %v5808_v49, %v2110_v40  ;;  %v2559_v7 = vmul.f32 %v5814_v2, %v2110_v40  ;;  %v2841_v62 = vmul.f32 %v5817_v28, %v2110_v40 }
 0x1ca   : > { %v3123_v34 = vmul.f32 %v5821_v18, %v2110_v40  ;;  %v2071_v46 = vmax.f32 %v1984_v61, 0.0  ;;  %v2073_v55 = vmax.f32 %v2027_v36, 0.0  ;;  %v5954_v27 = vrot.slane %v5726_v17, %v6507_v14  ;;  %v6509_v40 = vld [vmem:[#allocation27_spill] sm:$0xff] }
 0x1cb   : > { %v2286_v11 = vadd.f32 %v2276_v38, %v5758_v3  ;;  %v5958_v58 = vrot.slane %v5726_v17, %v6508_v20  ;;  %v2569_v44 = vadd.f32 %v2559_v7, %v5761_v22  ;;  %v2851_v39 = vadd.f32 %v2841_v62, %v5764_v5 }
 0x1cc   : > { %v3133_v12 = vadd.f32 %v3123_v34, %v5767_v24  ;;  %v2272_v8 = vmul.f32 %v5808_v49, %v2071_v46  ;;  %v2555_v3 = vmul.f32 %v5814_v2, %v2071_v46  ;;  %v2837_v57 = vmul.f32 %v5817_v28, %v2071_v46 }
 0x1cd   : > { %v2297_v21 = vadd.f32 %v5811_v13, %v2286_v11  ;;  %v3119_v50 = vmul.f32 %v5821_v18, %v2071_v46  ;;  %v2579_v15 = vadd.f32 %v2569_v44, %v5811_v13  ;;  %v2861_v17 = vadd.f32 %v2851_v39, %v5811_v13 }
 0x1ce   : > { %v3143_v22 = vadd.f32 %v3133_v12, %v5811_v13  ;;  %v2282_v5 = vadd.f32 %v2272_v8, %v5731_v1  ;;  %v2565_v24 = vadd.f32 %v2555_v3, %v5734_v52  ;;  %v2847_v54 = vadd.f32 %v2837_v57, %v5737_v16 }
 0x1cf   : > { %v2307_v9 = vsub.f32 0.0, %v2297_v21  ;;  %v3129_v63 = vadd.f32 %v3119_v50, %v6509_v40  ;;  %v3668_v61 = vpop.eup %3667  ;;  %v2589_v33 = vsub.f32 0.0, %v2579_v15  ;;  %v2871_v36 = vsub.f32 0.0, %v2861_v17 }
 0x1d0   : > { %v3153_v38 = vsub.f32 0.0, %v3143_v22  ;;  %v2293_v7 = vadd.f32 %v5811_v13, %v2282_v5  ;;  %v3670_v62 = vpop.eup %3669  ;;  %v2332_v34 = vadd.f32 1.0, %v3668_v61  ;;  %v2575_v11 = vadd.f32 %v2565_v24, %v5811_v13 }
 0x1d1   : > { %v2322_v46 = vmul.f32 1.442695, %v2307_v9  ;;  %v2857_v1 = vadd.f32 %v2847_v54, %v5811_v13  ;;  %v3672_v14 = vpop.eup %3671  ;;  %v2614_v20 = vadd.f32 1.0, %v3670_v62  ;;  %v2604_v52 = vmul.f32 1.442695, %v2589_v33 }
 0x1d2   : > { %v2886_v44 = vmul.f32 1.442695, %v2871_v36  ;;  %v2303_v16 = vsub.f32 0.0, %v2293_v7  ;;  %v3674_v39 = vpop.eup %3673  ;;  %3675 = vrcp.f32 %v2332_v34  ;;  %v2896_v12 = vadd.f32 1.0, %v3672_v14 }
 0x1d3   : > { %v3168_v8 = vmul.f32 1.442695, %v3153_v38  ;;  %v2585_v21 = vsub.f32 0.0, %v2575_v11  ;;  %3677 = vrcp.f32 %v2614_v20  ;;  %v3178_v3 = vadd.f32 1.0, %v3674_v39 }
 0x1d4   : > { %v2314_v57 = vmul.f32 1.442695, %v2303_v16  ;;  %v2867_v50 = vsub.f32 0.0, %v2857_v1  ;;  %3679 = vrcp.f32 %v2896_v12  ;;  %v3139_v17 = vadd.f32 %v3129_v63, %v5811_v13  ;;  %v6510_v63 = vld [vmem:[#allocation35_spill] sm:$0xff] }
 0x1d5   : > { %v2596_v15 = vmul.f32 1.442695, %v2585_v21  ;;  %v2274_v22 = vmul.f32 %v5808_v49, %v2073_v55  ;;  %3681 = vrcp.f32 %v3178_v3  ;;  %v2557_v9 = vmul.f32 %v5814_v2, %v2073_v55 }
 0x1d6   : > { %v2878_v5 = vmul.f32 1.442695, %v2867_v50  ;;  %v2839_v24 = vmul.f32 %v5817_v28, %v2073_v55  ;;  %3683 = vpow2.f32 %v2322_v46  ;;  %v3149_v54 = vsub.f32 0.0, %v3139_v17 }
 0x1d7   : > { %v2284_v40 = vadd.f32 %v2274_v22, %v5876_v53  ;;  %v3121_v61 = vmul.f32 %v5821_v18, %v2073_v55  ;;  %3685 = vpow2.f32 %v2604_v52  ;;  %v2567_v33 = vadd.f32 %v2557_v9, %v5879_v26 }
 0x1d8   : > { %v2849_v36 = vadd.f32 %v2839_v24, %v5882_v56  ;;  %v1986_v38 = vadd.f32 %v6510_v63, %v5954_v27  ;;  %3687 = vpow2.f32 %v2886_v44  ;;  %v3160_v7 = vmul.f32 1.442695, %v3149_v54  ;;  %v6511_v56 = vld [vmem:[#allocation36_spill] sm:$0xff] }
 0x1d9   : > { %v2295_v62 = vadd.f32 %v5811_v13, %v2284_v40  ;;  %v3131_v34 = vadd.f32 %v3121_v61, %v5885_v10  ;;  %3689 = vpow2.f32 %v3168_v8  ;;  %v2577_v46 = vadd.f32 %v2567_v33, %v5811_v13  ;;  %v6512_v40 = vld [vmem:[#allocation30_spill] sm:$0xff]  ;;  %v6513_v33 = vld [vmem:[#allocation39_spill] sm:$0xff] }
 0x1da   : > { %v2859_v53 = vadd.f32 %v2849_v36, %v5811_v13  ;;  %v2072_v55 = vmax.f32 %v1986_v38, 0.0  ;;  %3691 = vpow2.f32 %v2314_v57  ;;  %v2029_v1 = vadd.f32 %v6511_v56, %v5958_v58 }
 0x1db   : > { %v2305_v11 = vsub.f32 0.0, %v2295_v62  ;;  %v3141_v26 = vadd.f32 %v3131_v34, %v5811_v13  ;;  %3693 = vpow2.f32 %v2596_v15  ;;  %v2587_v14 = vsub.f32 0.0, %v2577_v46 }
 0x1dc   : > { %v2869_v20 = vsub.f32 0.0, %v2859_v53  ;;  %v2273_v52 = vmul.f32 %v5808_v49, %v2072_v55  ;;  %v5996_v44 = vpop.eup %3675  ;;  %3695 = vpow2.f32 %v2878_v5  ;;  %v2556_v39 = vmul.f32 %v5814_v2, %v2072_v55 }
 0x1dd   : > { %v2318_v10 = vmul.f32 1.442695, %v2305_v11  ;;  %v3151_v16 = vsub.f32 0.0, %v3141_v26  ;;  %v5999_v12 = vpop.eup %3677  ;;  %3697 = vpow2.f32 %v3160_v7  ;;  %v2600_v8 = vmul.f32 1.442695, %v2587_v14 }
 0x1de   : > { %v2882_v21 = vmul.f32 1.442695, %v2869_v20  ;;  %v2283_v3 = vadd.f32 %v2273_v52, %v5835_v32  ;;  %v6002_v57 = vpop.eup %3679  ;;  %v2566_v15 = vadd.f32 %v2556_v39, %v5838_v60  ;;  %v2838_v17 = vmul.f32 %v5817_v28, %v2072_v55 }
 0x1df   : > { %3699 = vpow2.f32 %v2318_v10  ;;  %v3164_v50 = vmul.f32 1.442695, %v3151_v16  ;;  %v6006_v22 = vpop.eup %3681  ;;  %v3120_v9 = vmul.f32 %v5821_v18, %v2072_v55  ;;  %v2074_v24 = vmax.f32 %v2029_v1, 0.0 }
 0x1e0   : > { %3701 = vpow2.f32 %v2600_v8  ;;  %v2294_v5 = vadd.f32 %v5811_v13, %v2283_v3  ;;  %v3684_v54 = vpop.eup %3683  ;;  %v2576_v32 = vadd.f32 %v2566_v15, %v5811_v13  ;;  %v2848_v61 = vadd.f32 %v2838_v17, %v6512_v40 }
 0x1e1   : > { %3703 = vpow2.f32 %v2882_v21  ;;  %v6014_v36 = vadd.f32 %v6513_v33, %v5861_v4  ;;  %v3686_v60 = vpop.eup %3685  ;;  %v2337_v63 = vadd.f32 1.0, %v3684_v54  ;;  %v3130_v7 = vadd.f32 %v3120_v9, %v5844_v29 }
 0x1e2   : > { %3705 = vpow2.f32 %v3164_v50  ;;  %v2304_v38 = vsub.f32 0.0, %v2294_v5  ;;  %v3688_v62 = vpop.eup %3687  ;;  %v2619_v34 = vadd.f32 1.0, %v3686_v60  ;;  %v2586_v46 = vsub.f32 0.0, %v2576_v32 }
 0x1e3   : > { %v2858_v53 = vadd.f32 %v2848_v61, %v5811_v13  ;;  %v2275_v55 = vmul.f32 %v5808_v49, %v2074_v24  ;;  %v6019_v11 = vpop.eup %3689  ;;  %3707 = vrcp.f32 %v2337_v63  ;;  %v2901_v26 = vadd.f32 1.0, %v3688_v62 }
 0x1e4   : > { %v3140_v4 = vadd.f32 %v3130_v7, %v5811_v13  ;;  %v3692_v56 = vpop.eup %3691  ;;  %3709 = vrcp.f32 %v2619_v34  ;;  %v2316_v1 = vmul.f32 1.442695, %v2304_v38  ;;  %v2598_v29 = vmul.f32 1.442695, %v2586_v46 }
 0x1e5   : > { %v2868_v14 = vsub.f32 0.0, %v2858_v53  ;;  %v3694_v20 = vpop.eup %3693  ;;  %v2333_v52 = vadd.f32 1.0, %v3692_v56  ;;  %v2285_v16 = vadd.f32 %v2275_v55, %v5847_v59  ;;  %3711 = vrcp.f32 %v2901_v26 }
 0x1e6   : > { %v3150_v10 = vsub.f32 0.0, %v3140_v4  ;;  %v3696_v39 = vpop.eup %3695  ;;  %v2615_v8 = vadd.f32 1.0, %v3694_v20  ;;  %v2558_v3 = vmul.f32 %v5814_v2, %v2074_v24  ;;  %v2840_v59 = vmul.f32 %v5817_v28, %v2074_v24 }
 0x1e7   : > { %v2880_v21 = vmul.f32 1.442695, %v2868_v14  ;;  %v3698_v50 = vpop.eup %3697  ;;  %3713 = vrcp.f32 %v2333_v52  ;;  %v2897_v15 = vadd.f32 1.0, %v3696_v39  ;;  %v2296_v5 = vadd.f32 %v5811_v13, %v2285_v16  ;;  %v6514_v14 = vld [vmem:[#allocation40_spill] sm:$0xff]  ;;  %v6515_v16 = vld [vmem:[#allocation25_spill] sm:$0xff] }
 0x1e8   : > { %v3162_v17 = vmul.f32 1.442695, %v3150_v10  ;;  %3715 = vrcp.f32 %v2615_v8  ;;  %v3179_v54 = vadd.f32 1.0, %v3698_v50  ;;  %v2568_v32 = vadd.f32 %v2558_v3, %v5850_v37 }
 0x1e9   : > { %v3700_v9 = vpop.eup %3699  ;;  %3717 = vrcp.f32 %v2897_v15  ;;  %v2306_v33 = vsub.f32 0.0, %v2296_v5  ;;  %v3122_v60 = vmul.f32 %v5821_v18, %v2074_v24  ;;  %v2850_v62 = vadd.f32 %v2840_v59, %v5853_v6 }
 0x1ea   : > { %v3702_v40 = vpop.eup %3701  ;;  %v2335_v61 = vadd.f32 1.0, %v3700_v9  ;;  %3719 = vrcp.f32 %v3179_v54  ;;  %v2578_v7 = vadd.f32 %v2568_v32, %v5811_v13  ;;  %v2111_v6 = vmax.f32 %v6014_v36, 0.0  ;;  %v6516_v32 = vld [vmem:[#allocation21_spill] sm:$0xff] }
 0x1eb   : > { %v3704_v63 = vpop.eup %3703  ;;  %v2617_v38 = vadd.f32 1.0, %v3702_v40  ;;  %v2320_v46 = vmul.f32 1.442695, %v2306_v33  ;;  %v3132_v53 = vadd.f32 %v3122_v60, %v5856_v51  ;;  %v2860_v24 = vadd.f32 %v2850_v62, %v5811_v13  ;;  %v6518_v33 = vld [vmem:[#allocation67_spill] sm:$0xff] }
 0x1ec   : > { %v3706_v34 = vpop.eup %3705  ;;  %3721 = vrcp.f32 %v2335_v61  ;;  %v2899_v37 = vadd.f32 1.0, %v3704_v63  ;;  %v2588_v26 = vsub.f32 0.0, %v2578_v7  ;;  %v2031_v20 = vadd.f32 %v6514_v14, %v5865_v30 }
 0x1ed   : > { %3723 = vrcp.f32 %v2617_v38  ;;  %v3181_v55 = vadd.f32 1.0, %v3706_v34  ;;  %v6033_v4 = vpop.eup %3707  ;;  %v3142_v56 = vadd.f32 %v3132_v53, %v5811_v13  ;;  %v2870_v10 = vsub.f32 0.0, %v2860_v24 }
 0x1ee   : > { %3725 = vrcp.f32 %v2899_v37  ;;  %v6043_v52 = vpop.eup %3709  ;;  %v2602_v51 = vmul.f32 1.442695, %v2588_v26  ;;  %v1990_v39 = vadd.f32 %v6515_v16, %v5954_v27  ;;  %v2277_v3 = vmul.f32 %v5808_v49, %v2111_v6 }
 0x1ef   : > { %3727 = vrcp.f32 %v3181_v55  ;;  %v3152_v8 = vsub.f32 0.0, %v3142_v56  ;;  %v2560_v50 = vmul.f32 %v5814_v2, %v2111_v6  ;;  %v6049_v15 = vpop.eup %3711  ;;  %v2884_v36 = vmul.f32 1.442695, %v2870_v10 }
 0x1f0   : > { %3729 = vpow2.f32 %v2316_v1  ;;  %v2842_v30 = vmul.f32 %v5817_v28, %v2111_v6  ;;  %v3124_v5 = vmul.f32 %v5821_v18, %v2111_v6  ;;  %v2287_v27 = vadd.f32 %v2277_v3, %v6516_v32  ;;  %v6517_v1 = vld [vmem:[#allocation66_spill] sm:$0xff] }
 0x1f1   : > { %3731 = vpow2.f32 %v2598_v29  ;;  %v3714_v9 = vpop.eup %3713  ;;  %v3166_v54 = vmul.f32 1.442695, %v3152_v8  ;;  %v2570_v59 = vadd.f32 %v2560_v50, %v6517_v1  ;;  %v6519_v29 = vld [vmem:[#allocation68_spill] sm:$0xff]  ;;  %v6075_v24 = vadd.f32 1.0, %v6019_v11 }
 0x1f2   : > { %3733 = vpow2.f32 %v2880_v21  ;;  %v3716_v40 = vpop.eup %3715  ;;  %v3539_v61 = vpack.c.bf16 %v3714_v9, %v5996_v44  ;;  %v2852_v60 = vadd.f32 %v2842_v30, %v6518_v33  ;;  %v3134_v63 = vadd.f32 %v3124_v5, %v6519_v29 }
 0x1f3   : > { %3735 = vpow2.f32 %v3162_v17  ;;  %v3718_v38 = vpop.eup %3717  ;;  %v3545_v7 = vpack.c.bf16 %v3716_v40, %v5999_v12  ;;  %v2298_v62 = vadd.f32 %v5811_v13, %v2287_v27  ;;  %v2580_v21 = vadd.f32 %v2570_v59, %v5811_v13 }
 0x1f4   : > { %3737 = vpow2.f32 %v2320_v46  ;;  %v3720_v34 = vpop.eup %3719  ;;  %2394 = vst [vmem:[%s6062_s11] sm:$0xff] %v3539_v61  ;;  %v3551_v44 = vpack.c.bf16 %v3718_v38, %v6002_v57  ;;  %v2862_v17 = vadd.f32 %v2852_v60, %v5811_v13  ;;  %v3144_v12 = vadd.f32 %v3134_v63, %v5811_v13 }
 0x1f5   : > { %3739 = vpow2.f32 %v2602_v51  ;;  %2676 = vst [vmem:[%s6062_s11 + $0x14] sm:$0xff] %v3545_v7  ;;  %v3557_v46 = vpack.c.bf16 %v3720_v34, %v6006_v22  ;;  %v2308_v53 = vsub.f32 0.0, %v2298_v62  ;;  %v2590_v55 = vsub.f32 0.0, %v2580_v21  ;;  %v6520_v22 = vld [vmem:[#allocation26_spill] sm:$0xff] }
 0x1f6   : > { %v6068_v37 = vpop.eup %3721  ;;  %3741 = vpow2.f32 %v2884_v36  ;;  %2958 = vst [vmem:[%s6062_s11 + $0x28] sm:$0xff] %v3551_v44  ;;  %v2872_v57 = vsub.f32 0.0, %v2862_v17  ;;  %v2113_v56 = vmax.f32 %v2031_v20, 0.0  ;;  %v2112_v10 = vmax.f32 %v1990_v39, 0.0 }
 0x1f7   : > { %v6072_v26 = vpop.eup %3723  ;;  %3743 = vpow2.f32 %v3166_v54  ;;  %3240 = vst [vmem:[%s6062_s11 + $0x3c] sm:$0xff] %v3557_v46  ;;  %v2324_v14 = vmul.f32 1.442695, %v2308_v53  ;;  %v2606_v51 = vmul.f32 1.442695, %v2590_v55  ;;  %v2033_v16 = vadd.f32 %v6520_v22, %v5958_v58 }
 0x1f8   : > { %v6078_v6 = vpop.eup %3725  ;;  %v2888_v3 = vmul.f32 1.442695, %v2872_v57  ;;  %v3154_v50 = vsub.f32 0.0, %v3144_v12  ;;  %v2279_v11 = vmul.f32 %v5808_v49, %v2113_v56  ;;  %v2562_v36 = vmul.f32 %v5814_v2, %v2113_v56 }
 0x1f9   : > { %v6083_v8 = vpop.eup %3727  ;;  %3745 = vpow2.f32 %v2324_v14  ;;  %v2844_v20 = vmul.f32 %v5817_v28, %v2113_v56  ;;  %v3126_v5 = vmul.f32 %v5821_v18, %v2113_v56  ;;  %v2278_v9 = vmul.f32 %v5808_v49, %v2112_v10 }
 0x1fa   : > { %v3730_v30 = vpop.eup %3729  ;;  %3747 = vpow2.f32 %v2606_v51  ;;  %v2289_v58 = vadd.f32 %v2279_v11, %v5929_v19  ;;  %v2572_v32 = vadd.f32 %v2562_v36, %v5935_v45  ;;  %v3170_v53 = vmul.f32 1.442695, %v3154_v50 }
 0x1fb   : > { %v3732_v39 = vpop.eup %3731  ;;  %v2334_v54 = vadd.f32 1.0, %v3730_v30  ;;  %3749 = vpow2.f32 %v2888_v3  ;;  %v2854_v59 = vadd.f32 %v2844_v20, %v5942_v47  ;;  %v3136_v40 = vadd.f32 %v3126_v5, %v5945_v0 }
 0x1fc   : > { %v3734_v27 = vpop.eup %3733  ;;  %v2616_v1 = vadd.f32 1.0, %v3732_v39  ;;  %v2300_v60 = vadd.f32 %v5811_v13, %v2289_v58  ;;  %v2582_v29 = vadd.f32 %v2572_v32, %v5811_v13  ;;  %v2288_v51 = vadd.f32 %v2278_v9, %v5900_v35 }
 0x1fd   : > { %v3736_v61 = vpop.eup %3735  ;;  %3751 = vrcp.f32 %v2334_v54  ;;  %v2898_v33 = vadd.f32 1.0, %v3734_v27  ;;  %v2864_v19 = vadd.f32 %v2854_v59, %v5811_v13  ;;  %v3146_v45 = vadd.f32 %v3136_v40, %v5811_v13 }
 0x1fe   : > { %v3738_v63 = vpop.eup %3737  ;;  %3753 = vrcp.f32 %v2616_v1  ;;  %v3180_v38 = vadd.f32 1.0, %v3736_v61  ;;  %v2310_v47 = vsub.f32 0.0, %v2300_v60  ;;  %v2592_v21 = vsub.f32 0.0, %v2582_v29 }
 0x1ff   : > { %v3740_v7 = vpop.eup %3739  ;;  %3755 = vrcp.f32 %v2898_v33  ;;  %v2336_v62 = vadd.f32 1.0, %v3738_v63  ;;  %v2874_v44 = vsub.f32 0.0, %v2864_v19  ;;  %v3156_v17 = vsub.f32 0.0, %v3146_v45 }
 0x200   : > { %v3742_v0 = vpop.eup %3741  ;;  %3757 = vrcp.f32 %v3180_v38  ;;  %v2618_v34 = vadd.f32 1.0, %v3740_v7  ;;  %v2328_v55 = vmul.f32 1.442695, %v2310_v47  ;;  %v2610_v56 = vmul.f32 1.442695, %v2592_v21 }
 0x201   : > { %v3744_v12 = vpop.eup %3743  ;;  %3759 = vrcp.f32 %v2336_v62  ;;  %v2900_v46 = vadd.f32 1.0, %v3742_v0  ;;  %v2892_v14 = vmul.f32 1.442695, %v2874_v44  ;;  %v2561_v22 = vmul.f32 %v5814_v2, %v2112_v10 }
 0x202   : > { %3761 = vrcp.f32 %v2618_v34  ;;  %v3182_v57 = vadd.f32 1.0, %v3744_v12  ;;  %v2843_v3 = vmul.f32 %v5817_v28, %v2112_v10  ;;  %v3174_v36 = vmul.f32 1.442695, %v3156_v17 }
 0x203   : > { %3763 = vrcp.f32 %v2900_v46  ;;  %v3746_v11 = vpop.eup %3745  ;;  %v3125_v30 = vmul.f32 %v5821_v18, %v2112_v10  ;;  %v2114_v20 = vmax.f32 %v2033_v16, 0.0  ;;  %v2299_v39 = vadd.f32 %v5811_v13, %v2288_v51 }
 0x204   : > { %3765 = vrcp.f32 %v3182_v57  ;;  %v3748_v5 = vpop.eup %3747  ;;  %v2338_v50 = vadd.f32 1.0, %v3746_v11  ;;  %v2571_v54 = vadd.f32 %v2561_v22, %v5903_v41  ;;  %v2853_v35 = vadd.f32 %v2843_v3, %v5906_v48 }
 0x205   : > { %3767 = vpow2.f32 %v3170_v53  ;;  %v3750_v58 = vpop.eup %3749  ;;  %v2620_v32 = vadd.f32 1.0, %v3748_v5  ;;  %v3135_v9 = vadd.f32 %v3125_v30, %v5909_v31  ;;  %v2309_v10 = vsub.f32 0.0, %v2299_v39 }
 0x206   : > { %3769 = vpow2.f32 %v2328_v55  ;;  %v2902_v1 = vadd.f32 1.0, %v3750_v58  ;;  %v2581_v16 = vadd.f32 %v2571_v54, %v5811_v13  ;;  %v2863_v41 = vadd.f32 %v2853_v35, %v5811_v13 }
 0x207   : > { %v3752_v27 = vpop.eup %3751  ;;  %3771 = vrcp.f32 %v2338_v50  ;;  %v3145_v61 = vadd.f32 %v3135_v9, %v5811_v13  ;;  %v2326_v31 = vmul.f32 1.442695, %v2309_v10  ;;  %v3127_v46 = vmul.f32 %v5821_v18, %v2114_v20 }
 0x208   : > { %v3754_v59 = vpop.eup %3753  ;;  %v3540_v40 = vpack.c.bf16 %v6068_v37, %v3752_v27  ;;  %3773 = vrcp.f32 %v2620_v32  ;;  %v2591_v60 = vsub.f32 0.0, %v2581_v16  ;;  %v2873_v37 = vsub.f32 0.0, %v2863_v41 }
 0x209   : > { %v3756_v33 = vpop.eup %3755  ;;  %v3546_v48 = vpack.c.bf16 %v6072_v26, %v3754_v59  ;;  %3775 = vrcp.f32 %v2902_v1  ;;  %v3155_v38 = vsub.f32 0.0, %v3145_v61  ;;  %v2280_v26 = vmul.f32 %v5808_v49, %v2114_v20 }
 0x20a   : > { %v3758_v29 = vpop.eup %3757  ;;  %2395 = vst [vmem:[%s6062_s11 + $0x8] sm:$0xff] %v3540_v40  ;;  %v3552_v63 = vpack.c.bf16 %v6078_v6, %v3756_v33  ;;  %3777 = vpow2.f32 %v2610_v56  ;;  %v2608_v7 = vmul.f32 1.442695, %v2591_v60  ;;  %v2890_v21 = vmul.f32 1.442695, %v2873_v37 }
 0x20b   : > { %v3760_v19 = vpop.eup %3759  ;;  %2677 = vst [vmem:[%s6062_s11 + $0x1c] sm:$0xff] %v3546_v48  ;;  %v3558_v45 = vpack.c.bf16 %v6083_v8, %v3758_v29  ;;  %3779 = vpow2.f32 %v2892_v14  ;;  %v3172_v6 = vmul.f32 1.442695, %v3155_v38  ;;  %v2290_v44 = vadd.f32 %v2280_v26, %v5917_v25 }
 0x20c   : > { %v3762_v62 = vpop.eup %3761  ;;  %2959 = vst [vmem:[%s6062_s11 + $0x30] sm:$0xff] %v3552_v63  ;;  %v3541_v47 = vpack.c.bf16 %v3760_v19, %v3760_v19  ;;  %3781 = vpow2.f32 %v3174_v36  ;;  %v2563_v8 = vmul.f32 %v5814_v2, %v2114_v20  ;;  %v2845_v49 = vmul.f32 %v5817_v28, %v2114_v20 }
 0x20d   : > { %v3764_v0 = vpop.eup %3763  ;;  %3241 = vst [vmem:[%s6062_s11 + $0x44] sm:$0xff] %v3558_v45  ;;  %v3547_v34 = vpack.c.bf16 %v3762_v62, %v3762_v62  ;;  %3783 = vpow2.f32 %v2326_v31  ;;  %v2301_v57 = vadd.f32 %v5811_v13, %v2290_v44  ;;  %v3137_v28 = vadd.f32 %v3127_v46, %v5926_v42 }
 0x20e   : > { %v3766_v17 = vpop.eup %3765  ;;  %2396 = vst [vmem:[%s6062_s11 + $0x10] sm:$0xf] %v3541_v47  ;;  %v3553_v12 = vpack.c.bf16 %v3764_v0, %v3764_v0  ;;  %3785 = vpow2.f32 %v2608_v7  ;;  %v2573_v56 = vadd.f32 %v2563_v8, %v5920_v43  ;;  %v2855_v14 = vadd.f32 %v2845_v49, %v5923_v23 }
 0x20f   : > { %v3768_v53 = vpop.eup %3767  ;;  %2678 = vst [vmem:[%s6062_s11 + $0x24] sm:$0xf] %v3547_v34  ;;  %v3559_v55 = vpack.c.bf16 %v3766_v17, %v3766_v17  ;;  %3787 = vpow2.f32 %v2890_v21  ;;  %v2311_v18 = vsub.f32 0.0, %v2301_v57  ;;  %v3147_v5 = vadd.f32 %v3137_v28, %v5811_v13 }
 0x210   : > { %v3770_v25 = vpop.eup %3769  ;;  %2960 = vst [vmem:[%s6062_s11 + $0x38] sm:$0xf] %v3553_v12  ;;  %v3184_v2 = vadd.f32 1.0, %v3768_v53  ;;  %3789 = vpow2.f32 %v3172_v6  ;;  %v2583_v11 = vadd.f32 %v2573_v56, %v5811_v13  ;;  %v2865_v42 = vadd.f32 %v2855_v14, %v5811_v13 }
 0x211   : > { %v3772_v51 = vpop.eup %3771  ;;  %3791 = vrcp.f32 %v6075_v24  ;;  %3242 = vst [vmem:[%s6062_s11 + $0x4c] sm:$0xf] %v3559_v55  ;;  %v2340_v43 = vadd.f32 1.0, %v3770_v25  ;;  %v2330_v30 = vmul.f32 1.442695, %v2311_v18  ;;  %v3157_v1 = vsub.f32 0.0, %v3147_v5 }
 0x212   : > { %v3774_v22 = vpop.eup %3773  ;;  %v3542_v3 = vpack.c.bf16 %v3772_v51, %v6033_v4  ;;  %3793 = vrcp.f32 %v3184_v2  ;;  %v2593_v58 = vsub.f32 0.0, %v2583_v11  ;;  %v2875_v35 = vsub.f32 0.0, %v2865_v42 }
 0x213   : > { %v3776_v36 = vpop.eup %3775  ;;  %v3548_v23 = vpack.c.bf16 %v3774_v22, %v6043_v52  ;;  %3795 = vpow2.f32 %v2330_v30  ;;  %v3176_v48 = vmul.f32 1.442695, %v3157_v1 }
 0x214   : > { %v3778_v20 = vpop.eup %3777  ;;  %2397 = vst [vmem:[%s6062_s11 + $0x50] sm:$0xff] %v3542_v3  ;;  %v3554_v24 = vpack.c.bf16 %v3776_v36, %v6049_v15  ;;  %3797 = vrcp.f32 %v2340_v43  ;;  %v2612_v59 = vmul.f32 1.442695, %v2593_v58  ;;  %v2894_v61 = vmul.f32 1.442695, %v2875_v35 }
 0x215   : > { %v3780_v50 = vpop.eup %3779  ;;  %2679 = vst [vmem:[%s6062_s11 + $0x64] sm:$0xff] %v3548_v23  ;;  %v2622_v4 = vadd.f32 1.0, %v3778_v20 }
 0x216   : > { %v3782_v39 = vpop.eup %3781  ;;  %2961 = vst [vmem:[%s6062_s11 + $0x78] sm:$0xff] %v3554_v24  ;;  %v2904_v54 = vadd.f32 1.0, %v3780_v50 }
 0x217   : > { %v3784_v32 = vpop.eup %3783  ;;  %3799 = vrcp.f32 %v2622_v4  ;;  %v3186_v52 = vadd.f32 1.0, %v3782_v39 }
 0x218   : > { %v3786_v9 = vpop.eup %3785  ;;  %3801 = vrcp.f32 %v2904_v54  ;;  %v2339_v27 = vadd.f32 1.0, %v3784_v32 }
 0x219   : > { %v3788_v15 = vpop.eup %3787  ;;  %3803 = vrcp.f32 %v3186_v52  ;;  %v2621_v13 = vadd.f32 1.0, %v3786_v9 }
 0x21a   : > { %v3790_v10 = vpop.eup %3789  ;;  %3805 = vrcp.f32 %v2339_v27  ;;  %v2903_v16 = vadd.f32 1.0, %v3788_v15 }
 0x21b   : > { %v3792_v40 = vpop.eup %3791  ;;  %3807 = vrcp.f32 %v2621_v13  ;;  %v3185_v41 = vadd.f32 1.0, %v3790_v10 }
 0x21c   : > { %v3794_v33 = vpop.eup %3793  ;;  %3809 = vrcp.f32 %v2903_v16 }
 0x21d   : > { %v3560_v31 = vpack.c.bf16 %v3794_v33, %v3792_v40  ;;  %3811 = vrcp.f32 %v3185_v41  ;;  %v3796_v60 = vpop.eup %3795 }
 0x21e   : > { %3813 = vpow2.f32 %v2612_v59  ;;  %v3798_v29 = vpop.eup %3797  ;;  %v2341_v63 = vadd.f32 1.0, %v3796_v60 }
 0x21f   : > { %3243 = vst [vmem:[%s6062_s11 + $0x8c] sm:$0xff] %v3560_v31  ;;  %3815 = vpow2.f32 %v2894_v61 }
 0x220   : > { %3817 = vpow2.f32 %v3176_v48 }
 0x221   : > { %v3800_v37 = vpop.eup %3799  ;;  %3819 = vrcp.f32 %v2341_v63 }
 0x222   : > { %v3802_v38 = vpop.eup %3801 }
 0x223   : > { %v3804_v19 = vpop.eup %3803 }
 0x224   : > { %v3806_v45 = vpop.eup %3805 }
 0x225   : > { %v3808_v7 = vpop.eup %3807  ;;  %v3543_v26 = vpack.c.bf16 %v3798_v29, %v3806_v45 }
 0x226   : > { %v3810_v62 = vpop.eup %3809  ;;  %v3549_v47 = vpack.c.bf16 %v3800_v37, %v3808_v7 }
 0x227   : > { %v3812_v21 = vpop.eup %3811  ;;  %2398 = vst [vmem:[%s6062_s11 + $0x58] sm:$0xff] %v3543_v26  ;;  %v3555_v6 = vpack.c.bf16 %v3802_v38, %v3810_v62 }
 0x228   : > { %v3814_v0 = vpop.eup %3813  ;;  %2680 = vst [vmem:[%s6062_s11 + $0x6c] sm:$0xff] %v3549_v47  ;;  %v3561_v34 = vpack.c.bf16 %v3804_v19, %v3812_v21 }
 0x229   : > { %v3816_v44 = vpop.eup %3815  ;;  %2962 = vst [vmem:[%s6062_s11 + $0x80] sm:$0xff] %v3555_v6  ;;  %v2623_v8 = vadd.f32 1.0, %v3814_v0 }
 0x22a   : > { %v3818_v17 = vpop.eup %3817  ;;  %3244 = vst [vmem:[%s6062_s11 + $0x94] sm:$0xff] %v3561_v34  ;;  %v2905_v12 = vadd.f32 1.0, %v3816_v44 }
 0x22b   : > { %3821 = vrcp.f32 %v2623_v8  ;;  %v3187_v49 = vadd.f32 1.0, %v3818_v17  ;;  %v3820_v46 = vpop.eup %3819 }
 0x22c   : > { %3823 = vrcp.f32 %v2905_v12  ;;  %v3544_v53 = vpack.c.bf16 %v3820_v46, %v3820_v46 }
 0x22d   : > { %3825 = vrcp.f32 %v3187_v49 }
 0x22e   : > { %2399 = vst [vmem:[%s6062_s11 + $0x60] sm:$0xf] %v3544_v53 }
 0x235   : > { %v3822_v55 = vpop.eup %3821 }
 0x236   : > { %v3824_v57 = vpop.eup %3823  ;;  %v3550_v56 = vpack.c.bf16 %v3822_v55, %v3822_v55 }
 0x237   : > { %v3826_v25 = vpop.eup %3825  ;;  %v3556_v2 = vpack.c.bf16 %v3824_v57, %v3824_v57 }
 0x238   : > { %2681 = vst [vmem:[%s6062_s11 + $0x74] sm:$0xf] %v3550_v56  ;;  %v3562_v14 = vpack.c.bf16 %v3826_v25, %v3826_v25 }
 0x239   : > { %2963 = vst [vmem:[%s6062_s11 + $0x88] sm:$0xf] %v3556_v2 }
 0x23a   : > { %3245 = vst [vmem:[%s6062_s11 + $0x9c] sm:$0xf] %v3562_v14 }
 0x23b   : > { %3853 = shalt.err (!%p3850_p10)
}
 0x23c   : > { %s3854_s8 = scalar_lea.hbm %s6151_s3, 2560  ;;  %s3858_s19 = scalar_lea.hbm %s6210_s4, 5120 }
 0x23d   : > { %p3855_p11 = scmp.ne.s32.totalorder %s6151_s3, %s3854_s8  ;;  %p3859_p1 = scmp.lt.u32.totalorder %s6151_s3, %s6210_s4 }
 0x23e   : > { %p3860_p2 = scmp.lt.u32.totalorder %s3858_s19, %s3854_s8  ;;  %p3862_p4 = scmp.lt.u32.totalorder %s3854_s8, %s6151_s3 }
 0x23f   : > { %p3856_p12 = pnand %p3855_p11, %p3995_p9 }
 0x240   : > { %p3861_p3 = por %p3860_p2, %p3859_p1 }
 0x241   : > { %p3857_p0 = pneg %p3856_p12 }
 0x242   : > { %p3863_p5 = por %p3862_p4, %p3861_p3 }
 0x244   : > { %p3864_p6 = pnand %p3863_p5, %p3857_p0 }
 0x246   : > { %3867 = shalt.err (!%p3864_p6)
}
 0x247   : > { %s3925_s27 = smov 1280   ;;  %s3926_s6 = smov 80  }
 0x248   : > { %3567 = dma.vmem_to_hbm [thread:$0]  (%p3995_p9), %s6153_s5, 2560, %s6151_s3, %s6160_s22, %s3925_s27, %s3925_s27, %s3926_s6  }
 0x249 PF: > { %p3573_p7 = scmp.ge.s32.totalorder %s3920_s24, 2  ;;  %s3278_s17 = sand.u32 1, %s3900_s20  }
 0x24a   : > { %s3279_s18 = scalar_lea.sflag [#allocation5], %s3278_s17 }
 0x24b   : > { %p3570_p8 = pnand %p3573_p7, %p4002_p13 }
 0x24d   : > { %3895 = dma.done.wait (!%p3570_p8), %s3279_s18, 2560  }
 0x24e   : > { %3897 = vsyncadd (!%p3570_p8), %s3279_s18, 4294964736  ;;  %s23_s24 = sadd.s32 1, %s3920_s24   ;;  %s6522_s25 = sld [smem:[#allocation8_spill]] }
 0x24f   : > { %p20_p10 = scmp.ge.s32.totalorder %s23_s24, 4   ;;  %s6523_s0 = sld [smem:[#allocation12_spill]] }
 0x250   : > { %s6524_s22 = sld [smem:[#allocation9_spill]]  ;;  %s6525_s23 = sld [smem:[#allocation10_spill]] }
 0x251   : > { %s6526_s20 = smov %s3904_s21  ;;  %22 = sbr.rel (!%p20_p10) target bundleno = 20 (0x14), region = 73 }
 0x254   : > { %s6527_s21 = smov %s6522_s25 }
 0x258   :  { %3284 = vsyncpa [#allocation5], 1 }
 0x259   :  { %3286 = vsyncpa [#allocation5 + $0x1], 1 }

</bundles_post_ra>
